<compile_context>
chip_gen: v6e
topology: v6e:2x2x1
jax: 0.10.0
libtpu: 0.0.40
codegen_flags: <defaults>
</compile_context>

<pallas_src>
import functools

import jax
import jax.numpy as jnp
from jax import lax
from jax.experimental import pallas as pl
from jax.experimental.pallas import tpu as pltpu


# ----------------------------------------------------------------------------
# Shared LSTM cell math (PyTorch gate order: i, f, g, o)
# ----------------------------------------------------------------------------
def _lstm_gates(gates, c_prev, H):
    i = jax.nn.sigmoid(gates[:, 0 * H:1 * H])
    f = jax.nn.sigmoid(gates[:, 1 * H:2 * H])
    g = jnp.tanh(gates[:, 2 * H:3 * H])
    o = jax.nn.sigmoid(gates[:, 3 * H:4 * H])
    c_new = f * c_prev + i * g
    h_new = o * jnp.tanh(c_new)
    return h_new, c_new


# ----------------------------------------------------------------------------
# Kernel 1: fused bidirectional LSTM layer (full sequence output)
# ----------------------------------------------------------------------------
def _bidir_lstm_seq_kernel(gxf_ref, gxb_ref, whh_ref, o_ref):
    # gxf_ref: (T, B, 4H)  precomputed x@W_ih_fwd + b_fwd
    # gxb_ref: (T, B, 4H)  precomputed x@W_ih_bwd + b_bwd
    # whh_ref: (2H, 8H)    block-diagonal [[W_hh_fwd, 0], [0, W_hh_bwd]]
    # o_ref:   (T, B, 2H)  concat(h_fwd(t), h_bwd(t)) per time position
    T, B, G = gxf_ref.shape
    H = G // 4

    h0 = jnp.zeros((B, 2 * H), jnp.float32)
    c0 = jnp.zeros((B, H), jnp.float32)

    def step(s, carry):
        h, c_f, c_b = carry                      # state lives in vregs
        # One block-diagonal matmul covers both directions' h @ W_hh.
        gh = jnp.dot(h, whh_ref[...], preferred_element_type=jnp.float32)
        g_f = gxf_ref[s] + gh[:, :G]
        g_b = gxb_ref[T - 1 - s] + gh[:, G:]
        h_f, c_f = _lstm_gates(g_f, c_f, H)
        h_b, c_b = _lstm_gates(g_b, c_b, H)
        o_ref[s, :, 0:H] = h_f                   # forward half at position s
        o_ref[T - 1 - s, :, H:2 * H] = h_b       # backward half at T-1-s
        return (jnp.concatenate([h_f, h_b], axis=-1), c_f, c_b)

    lax.fori_loop(0, T, step, (h0, c0, c0), unroll=True)


# ----------------------------------------------------------------------------
# Kernel 2: last layer — recurrence fused with max-pool over time,
#           Linear(2H -> 1) and sigmoid (sequence never written to HBM)
# ----------------------------------------------------------------------------
def _bidir_lstm_pool_head_kernel(gxf_ref, gxb_ref, whh_ref, w_ref, b_ref,
                                 out_ref):
    T, B, G = gxf_ref.shape
    H = G // 4

    h0 = jnp.zeros((B, 2 * H), jnp.float32)
    c0 = jnp.zeros((B, H), jnp.float32)
    m0 = jnp.full((B, 2 * H), -jnp.inf, jnp.float32)

    def step(s, carry):
        h, c_f, c_b, m = carry
        gh = jnp.dot(h, whh_ref[...], preferred_element_type=jnp.float32)
        g_f = gxf_ref[s] + gh[:, :G]
        g_b = gxb_ref[T - 1 - s] + gh[:, G:]
        h_f, c_f = _lstm_gates(g_f, c_f, H)
        h_b, c_b = _lstm_gates(g_b, c_b, H)
        h_new = jnp.concatenate([h_f, h_b], axis=-1)
        # Max over time factorizes per direction, so visiting the backward
        # positions in reverse order gives the same pooled result.
        return (h_new, c_f, c_b, jnp.maximum(m, h_new))

    _, _, _, pooled = lax.fori_loop(0, T, step, (h0, c0, c0, m0), unroll=True)
    logit = jnp.dot(pooled, w_ref[...],
                    preferred_element_type=jnp.float32) + b_ref[...]
    out_ref[...] = jax.nn.sigmoid(logit)


_COMPILER_PARAMS = pltpu.CompilerParams(
    dimension_semantics=("arbitrary",),
    vmem_limit_bytes=32 * 1024 * 1024,   # headroom over v5e's 16 MiB default
)


def bidir_lstm_layer(gx_f, gx_b, whh_comb, hidden_size):
    """(T,B,4H) fwd/bwd gate inputs + (2H,8H) W_hh -> (T,B,2H) hidden seq."""
    T, B, G = gx_f.shape
    H = hidden_size
    return pl.pallas_call(
        _bidir_lstm_seq_kernel,
        out_shape=jax.ShapeDtypeStruct((T, B, 2 * H), jnp.float32),
        grid_spec=pltpu.PrefetchScalarGridSpec(
            num_scalar_prefetch=0,
            grid=(1,),
            in_specs=[
                pl.BlockSpec((T, B, G), lambda i: (0, 0, 0)),
                pl.BlockSpec((T, B, G), lambda i: (0, 0, 0)),
                pl.BlockSpec((2 * H, 8 * H), lambda i: (0, 0)),
            ],
            out_specs=pl.BlockSpec((T, B, 2 * H), lambda i: (0, 0, 0)),
        ),
        compiler_params=_COMPILER_PARAMS,
    )(gx_f, gx_b, whh_comb)


def bidir_lstm_pool_head(gx_f, gx_b, whh_comb, pool_w, pool_b, hidden_size):
    """Last layer fused with max-pool over time + Linear(2H,1) + sigmoid."""
    T, B, G = gx_f.shape
    H = hidden_size
    return pl.pallas_call(
        _bidir_lstm_pool_head_kernel,
        out_shape=jax.ShapeDtypeStruct((B, 1), jnp.float32),
        grid_spec=pltpu.PrefetchScalarGridSpec(
            num_scalar_prefetch=0,
            grid=(1,),
            in_specs=[
                pl.BlockSpec((T, B, G), lambda i: (0, 0, 0)),
                pl.BlockSpec((T, B, G), lambda i: (0, 0, 0)),
                pl.BlockSpec((2 * H, 8 * H), lambda i: (0, 0)),
                pl.BlockSpec((2 * H, 1), lambda i: (0, 0)),
                pl.BlockSpec((1, 1), lambda i: (0, 0)),
            ],
            out_specs=pl.BlockSpec((B, 1), lambda i: (0, 0)),
        ),
        compiler_params=_COMPILER_PARAMS,
    )(gx_f, gx_b, whh_comb, pool_w, pool_b)


# ----------------------------------------------------------------------------
# Full forward (glue in plain JAX: embedding gather, hoisted input projection)
# ----------------------------------------------------------------------------
def _input_projection(x_tbd, lw):
    # Hoisted out of the serial recurrence: one large (T*B,D)@(D,4H) MXU-sized
    # matmul per direction, bias folded in (single broadcast, outside the loop).
    gx_f = jnp.einsum("tbd,dg->tbg", x_tbd, lw["w_ih_f"],
                      preferred_element_type=jnp.float32) + lw["b_f"]
    gx_b = jnp.einsum("tbd,dg->tbg", x_tbd, lw["w_ih_b"],
                      preferred_element_type=jnp.float32) + lw["b_b"]
    return gx_f, gx_b


def lstm_pooling_classifier_forward(params, token_ids):
    # Embedding gather directly in time-major (T, B, E) layout — activations
    # never get transposed anywhere in the pipeline.
    x_tbd = params["embedding"][token_ids.T]          # (T, B, E) f32
    H = params["hidden_size"]
    layers = params["lstm"]
    L = len(layers)

    for l in range(L - 1):
        gx_f, gx_b = _input_projection(x_tbd, layers[l])
        x_tbd = bidir_lstm_layer(gx_f, gx_b, layers[l]["w_hh_comb"], H)
        # TODO(synk): nn.LSTM inter-layer dropout (p=0.5) is identity in eval
        # mode; training-mode dropout not implemented.

    gx_f, gx_b = _input_projection(x_tbd, layers[L - 1])
    # Dropout before the linear head is identity in eval mode.
    out = bidir_lstm_pool_head(gx_f, gx_b, layers[L - 1]["w_hh_comb"],
                               params["pool_w"], params["pool_b"], H)
    return jnp.squeeze(out, axis=-1)                  # (B,)


# ----------------------------------------------------------------------------
# Deterministic parameter init (shapes follow the nn.Module __init__)
# ----------------------------------------------------------------------------
def init_params(key, num_embeddings, embedding_dim, hidden_size, num_layers,
                pad_idx):
    keys = jax.random.split(key, 2 + num_layers)
    emb = 0.1 * jax.random.normal(
        keys[0], (num_embeddings, embedding_dim), jnp.float32)
    emb = emb.at[pad_idx].set(0.0)                    # padding_idx row = 0

    H = hidden_size
    scale = 1.0 / jnp.sqrt(H)
    lstm_layers = []
    for l in range(num_layers):
        d_in = embedding_dim if l == 0 else 2 * H
        lk = jax.random.split(keys[2 + l], 8)

        def u(k, shape):
            return jax.random.uniform(k, shape, jnp.float32, -scale, scale)

        w_hh_f = u(lk[1], (H, 4 * H))
        w_hh_b = u(lk[5], (H, 4 * H))
        # Block-diagonal combined hidden-to-hidden weights: one matmul/step.
        w_hh_comb = jnp.zeros((2 * H, 8 * H), jnp.float32)
        w_hh_comb = w_hh_comb.at[:H, :4 * H].set(w_hh_f)
        w_hh_comb = w_hh_comb.at[H:, 4 * H:].set(w_hh_b)

        lstm_layers.append(dict(
            w_ih_f=u(lk[0], (d_in, 4 * H)),
            b_f=u(lk[2], (1, 4 * H)) + u(lk[3], (1, 4 * H)),  # b_ih + b_hh
            w_ih_b=u(lk[4], (d_in, 4 * H)),
            b_b=u(lk[6], (1, 4 * H)) + u(lk[7], (1, 4 * H)),
            w_hh_comb=w_hh_comb,
        ))

    wk, bk = jax.random.split(keys[1])
    pool_w = jax.random.uniform(wk, (2 * H, 1), jnp.float32, -scale, scale)
    pool_b = jax.random.uniform(bk, (1, 1), jnp.float32, -scale, scale)

    return dict(embedding=emb, lstm=lstm_layers, pool_w=pool_w,
                pool_b=pool_b, hidden_size=H)


if __name__ == "__main__":
    # Small shapes consistent with the module's forward.
    B, T = 2, 8
    num_embeddings = 100
    embedding_dim = 32
    hidden_size = 32
    num_layers = 2
    pad_idx = 0

    key = jax.random.PRNGKey(0)
    pkey, xkey = jax.random.split(key)
    params = init_params(pkey, num_embeddings, embedding_dim, hidden_size,
                         num_layers, pad_idx)

    token_ids = jax.random.randint(xkey, (B, T), 1, num_embeddings,
                                   dtype=jnp.int32)

    fwd = jax.jit(functools.partial(lstm_pooling_classifier_forward, params))
    out = fwd(token_ids)
    jax.block_until_ready(out)

    assert out.shape == (B,), out.shape
    assert bool(jnp.all(jnp.isfinite(out)))
    assert bool(jnp.all((out >= 0.0) & (out <= 1.0)))
    print("KERNEL_OK")
</pallas_src>

<mosaic_0001>
module attributes {stable_mosaic.version = 11 : i64} {
  func.func @_bidir_lstm_pool_head_kernel(%arg0: i32, %arg1: memref<8x2x128xf32, #tpu.memory_space<vmem>>, %arg2: memref<8x2x128xf32, #tpu.memory_space<vmem>>, %arg3: memref<64x256xf32, #tpu.memory_space<vmem>>, %arg4: memref<64x1xf32, #tpu.memory_space<vmem>>, %arg5: memref<1x1xf32, #tpu.memory_space<vmem>>, %arg6: memref<2x1xf32, #tpu.memory_space<vmem>>) attributes {dimension_semantics = [#tpu.dimension_semantics<arbitrary>], iteration_bounds = array<i64: 1>, scalar_prefetch = 0 : i64, scratch_operands = 0 : i64, tpu.core_type = #tpu.core_type<tc>, window_params = [{pipeline_mode = #tpu.pipeline_mode<synchronous>, transform_indices = @transform_0, window_bounds = array<i64: 8, 2, 128>}, {pipeline_mode = #tpu.pipeline_mode<synchronous>, transform_indices = @transform_1, window_bounds = array<i64: 8, 2, 128>}, {pipeline_mode = #tpu.pipeline_mode<synchronous>, transform_indices = @transform_2, window_bounds = array<i64: 64, 256>}, {pipeline_mode = #tpu.pipeline_mode<synchronous>, transform_indices = @transform_3, window_bounds = array<i64: 64, 1>}, {pipeline_mode = #tpu.pipeline_mode<synchronous>, transform_indices = @transform_4, window_bounds = array<i64: 1, 1>}, {pipeline_mode = #tpu.pipeline_mode<synchronous>, transform_indices = @transform_5, window_bounds = array<i64: 2, 1>}]} {
    %cst = arith.constant 0.000000e+00 : f32
    %0 = vector.broadcast %cst : f32 to vector<2x64xf32>
    %cst_0 = arith.constant 0.000000e+00 : f32
    %1 = vector.broadcast %cst_0 : f32 to vector<2x32xf32>
    %cst_1 = arith.constant 0xFF800000 : f32
    %2 = vector.broadcast %cst_1 : f32 to vector<2x64xf32>
    %c0_i32 = arith.constant 0 : i32
    %c0 = arith.constant 0 : index
    %c0_2 = arith.constant 0 : index
    %3 = vector.load %arg3[%c0, %c0_2] : memref<64x256xf32, #tpu.memory_space<vmem>>, vector<64x256xf32>
    %cst_3 = arith.constant dense<0.000000e+00> : vector<2x256xf32>
    %4 = tpu.matmul %0, %3, %cst_3 {dimension_numbers = #tpu.dot_dimension_numbers<[1], [0], [0], [1], [0, 0, 1, 1], [], []>} : vector<2x64xf32>, vector<64x256xf32>, vector<2x256xf32> -> vector<2x256xf32>
    %5 = arith.index_cast %c0_i32 : i32 to index
    %c0_4 = arith.constant 0 : index
    %c0_5 = arith.constant 0 : index
    %6 = vector.load %arg1[%5, %c0_4, %c0_5] : memref<8x2x128xf32, #tpu.memory_space<vmem>>, vector<1x2x128xf32>
    %7 = vector.shape_cast %6 : vector<1x2x128xf32> to vector<2x128xf32>
    %8 = vector.extract_strided_slice %4 {offsets = [0, 0], sizes = [2, 128], strides = [1, 1]} : vector<2x256xf32> to vector<2x128xf32>
    %9 = arith.addf %7, %8 : vector<2x128xf32>
    %c7_i32 = arith.constant 7 : i32
    %10 = arith.subi %c7_i32, %c0_i32 : i32
    %11 = arith.index_cast %10 : i32 to index
    %c0_6 = arith.constant 0 : index
    %c0_7 = arith.constant 0 : index
    %12 = vector.load %arg2[%11, %c0_6, %c0_7] : memref<8x2x128xf32, #tpu.memory_space<vmem>>, vector<1x2x128xf32>
    %13 = vector.shape_cast %12 : vector<1x2x128xf32> to vector<2x128xf32>
    %14 = vector.extract_strided_slice %4 {offsets = [0, 128], sizes = [2, 128], strides = [1, 1]} : vector<2x256xf32> to vector<2x128xf32>
    %15 = arith.addf %13, %14 : vector<2x128xf32>
    %16 = vector.extract_strided_slice %9 {offsets = [0, 0], sizes = [2, 32], strides = [1, 1]} : vector<2x128xf32> to vector<2x32xf32>
    %17 = arith.negf %16 : vector<2x32xf32>
    %18 = math.exp %17 : vector<2x32xf32>
    %cst_8 = arith.constant 1.000000e+00 : f32
    %19 = vector.broadcast %cst_8 : f32 to vector<2x32xf32>
    %20 = arith.addf %19, %18 : vector<2x32xf32>
    %21 = arith.divf %19, %20 : vector<2x32xf32>
    %22 = vector.extract_strided_slice %9 {offsets = [0, 32], sizes = [2, 32], strides = [1, 1]} : vector<2x128xf32> to vector<2x32xf32>
    %23 = arith.negf %22 : vector<2x32xf32>
    %24 = math.exp %23 : vector<2x32xf32>
    %cst_9 = arith.constant 1.000000e+00 : f32
    %25 = vector.broadcast %cst_9 : f32 to vector<2x32xf32>
    %26 = arith.addf %25, %24 : vector<2x32xf32>
    %27 = arith.divf %25, %26 : vector<2x32xf32>
    %28 = vector.extract_strided_slice %9 {offsets = [0, 64], sizes = [2, 32], strides = [1, 1]} : vector<2x128xf32> to vector<2x32xf32>
    %29 = math.tanh %28 : vector<2x32xf32>
    %30 = vector.extract_strided_slice %9 {offsets = [0, 96], sizes = [2, 32], strides = [1, 1]} : vector<2x128xf32> to vector<2x32xf32>
    %31 = arith.negf %30 : vector<2x32xf32>
    %32 = math.exp %31 : vector<2x32xf32>
    %cst_10 = arith.constant 1.000000e+00 : f32
    %33 = vector.broadcast %cst_10 : f32 to vector<2x32xf32>
    %34 = arith.addf %33, %32 : vector<2x32xf32>
    %35 = arith.divf %33, %34 : vector<2x32xf32>
    %36 = arith.mulf %27, %1 : vector<2x32xf32>
    %37 = arith.mulf %21, %29 : vector<2x32xf32>
    %38 = arith.addf %36, %37 : vector<2x32xf32>
    %39 = math.tanh %38 : vector<2x32xf32>
    %40 = arith.mulf %35, %39 : vector<2x32xf32>
    %41 = vector.extract_strided_slice %15 {offsets = [0, 0], sizes = [2, 32], strides = [1, 1]} : vector<2x128xf32> to vector<2x32xf32>
    %42 = arith.negf %41 : vector<2x32xf32>
    %43 = math.exp %42 : vector<2x32xf32>
    %cst_11 = arith.constant 1.000000e+00 : f32
    %44 = vector.broadcast %cst_11 : f32 to vector<2x32xf32>
    %45 = arith.addf %44, %43 : vector<2x32xf32>
    %46 = arith.divf %44, %45 : vector<2x32xf32>
    %47 = vector.extract_strided_slice %15 {offsets = [0, 32], sizes = [2, 32], strides = [1, 1]} : vector<2x128xf32> to vector<2x32xf32>
    %48 = arith.negf %47 : vector<2x32xf32>
    %49 = math.exp %48 : vector<2x32xf32>
    %cst_12 = arith.constant 1.000000e+00 : f32
    %50 = vector.broadcast %cst_12 : f32 to vector<2x32xf32>
    %51 = arith.addf %50, %49 : vector<2x32xf32>
    %52 = arith.divf %50, %51 : vector<2x32xf32>
    %53 = vector.extract_strided_slice %15 {offsets = [0, 64], sizes = [2, 32], strides = [1, 1]} : vector<2x128xf32> to vector<2x32xf32>
    %54 = math.tanh %53 : vector<2x32xf32>
    %55 = vector.extract_strided_slice %15 {offsets = [0, 96], sizes = [2, 32], strides = [1, 1]} : vector<2x128xf32> to vector<2x32xf32>
    %56 = arith.negf %55 : vector<2x32xf32>
    %57 = math.exp %56 : vector<2x32xf32>
    %cst_13 = arith.constant 1.000000e+00 : f32
    %58 = vector.broadcast %cst_13 : f32 to vector<2x32xf32>
    %59 = arith.addf %58, %57 : vector<2x32xf32>
    %60 = arith.divf %58, %59 : vector<2x32xf32>
    %61 = arith.mulf %52, %1 : vector<2x32xf32>
    %62 = arith.mulf %46, %54 : vector<2x32xf32>
    %63 = arith.addf %61, %62 : vector<2x32xf32>
    %64 = math.tanh %63 : vector<2x32xf32>
    %65 = arith.mulf %60, %64 : vector<2x32xf32>
    %66 = tpu.concatenate %40, %65 in 1 : vector<2x32xf32>, vector<2x32xf32> -> vector<2x64xf32>
    %67 = arith.maximumf %2, %66 : vector<2x64xf32>
    %c1_i32 = arith.constant 1 : i32
    %c0_14 = arith.constant 0 : index
    %c0_15 = arith.constant 0 : index
    %68 = vector.load %arg3[%c0_14, %c0_15] : memref<64x256xf32, #tpu.memory_space<vmem>>, vector<64x256xf32>
    %cst_16 = arith.constant dense<0.000000e+00> : vector<2x256xf32>
    %69 = tpu.matmul %66, %68, %cst_16 {dimension_numbers = #tpu.dot_dimension_numbers<[1], [0], [0], [1], [0, 0, 1, 1], [], []>} : vector<2x64xf32>, vector<64x256xf32>, vector<2x256xf32> -> vector<2x256xf32>
    %70 = arith.index_cast %c1_i32 : i32 to index
    %c0_17 = arith.constant 0 : index
    %c0_18 = arith.constant 0 : index
    %71 = vector.load %arg1[%70, %c0_17, %c0_18] : memref<8x2x128xf32, #tpu.memory_space<vmem>>, vector<1x2x128xf32>
    %72 = vector.shape_cast %71 : vector<1x2x128xf32> to vector<2x128xf32>
    %73 = vector.extract_strided_slice %69 {offsets = [0, 0], sizes = [2, 128], strides = [1, 1]} : vector<2x256xf32> to vector<2x128xf32>
    %74 = arith.addf %72, %73 : vector<2x128xf32>
    %c7_i32_19 = arith.constant 7 : i32
    %75 = arith.subi %c7_i32_19, %c1_i32 : i32
    %76 = arith.index_cast %75 : i32 to index
    %c0_20 = arith.constant 0 : index
    %c0_21 = arith.constant 0 : index
    %77 = vector.load %arg2[%76, %c0_20, %c0_21] : memref<8x2x128xf32, #tpu.memory_space<vmem>>, vector<1x2x128xf32>
    %78 = vector.shape_cast %77 : vector<1x2x128xf32> to vector<2x128xf32>
    %79 = vector.extract_strided_slice %69 {offsets = [0, 128], sizes = [2, 128], strides = [1, 1]} : vector<2x256xf32> to vector<2x128xf32>
    %80 = arith.addf %78, %79 : vector<2x128xf32>
    %81 = vector.extract_strided_slice %74 {offsets = [0, 0], sizes = [2, 32], strides = [1, 1]} : vector<2x128xf32> to vector<2x32xf32>
    %82 = arith.negf %81 : vector<2x32xf32>
    %83 = math.exp %82 : vector<2x32xf32>
    %cst_22 = arith.constant 1.000000e+00 : f32
    %84 = vector.broadcast %cst_22 : f32 to vector<2x32xf32>
    %85 = arith.addf %84, %83 : vector<2x32xf32>
    %86 = arith.divf %84, %85 : vector<2x32xf32>
    %87 = vector.extract_strided_slice %74 {offsets = [0, 32], sizes = [2, 32], strides = [1, 1]} : vector<2x128xf32> to vector<2x32xf32>
    %88 = arith.negf %87 : vector<2x32xf32>
    %89 = math.exp %88 : vector<2x32xf32>
    %cst_23 = arith.constant 1.000000e+00 : f32
    %90 = vector.broadcast %cst_23 : f32 to vector<2x32xf32>
    %91 = arith.addf %90, %89 : vector<2x32xf32>
    %92 = arith.divf %90, %91 : vector<2x32xf32>
    %93 = vector.extract_strided_slice %74 {offsets = [0, 64], sizes = [2, 32], strides = [1, 1]} : vector<2x128xf32> to vector<2x32xf32>
    %94 = math.tanh %93 : vector<2x32xf32>
    %95 = vector.extract_strided_slice %74 {offsets = [0, 96], sizes = [2, 32], strides = [1, 1]} : vector<2x128xf32> to vector<2x32xf32>
    %96 = arith.negf %95 : vector<2x32xf32>
    %97 = math.exp %96 : vector<2x32xf32>
    %cst_24 = arith.constant 1.000000e+00 : f32
    %98 = vector.broadcast %cst_24 : f32 to vector<2x32xf32>
    %99 = arith.addf %98, %97 : vector<2x32xf32>
    %100 = arith.divf %98, %99 : vector<2x32xf32>
    %101 = arith.mulf %92, %38 : vector<2x32xf32>
    %102 = arith.mulf %86, %94 : vector<2x32xf32>
    %103 = arith.addf %101, %102 : vector<2x32xf32>
    %104 = math.tanh %103 : vector<2x32xf32>
    %105 = arith.mulf %100, %104 : vector<2x32xf32>
    %106 = vector.extract_strided_slice %80 {offsets = [0, 0], sizes = [2, 32], strides = [1, 1]} : vector<2x128xf32> to vector<2x32xf32>
    %107 = arith.negf %106 : vector<2x32xf32>
    %108 = math.exp %107 : vector<2x32xf32>
    %cst_25 = arith.constant 1.000000e+00 : f32
    %109 = vector.broadcast %cst_25 : f32 to vector<2x32xf32>
    %110 = arith.addf %109, %108 : vector<2x32xf32>
    %111 = arith.divf %109, %110 : vector<2x32xf32>
    %112 = vector.extract_strided_slice %80 {offsets = [0, 32], sizes = [2, 32], strides = [1, 1]} : vector<2x128xf32> to vector<2x32xf32>
    %113 = arith.negf %112 : vector<2x32xf32>
    %114 = math.exp %113 : vector<2x32xf32>
    %cst_26 = arith.constant 1.000000e+00 : f32
    %115 = vector.broadcast %cst_26 : f32 to vector<2x32xf32>
    %116 = arith.addf %115, %114 : vector<2x32xf32>
    %117 = arith.divf %115, %116 : vector<2x32xf32>
    %118 = vector.extract_strided_slice %80 {offsets = [0, 64], sizes = [2, 32], strides = [1, 1]} : vector<2x128xf32> to vector<2x32xf32>
    %119 = math.tanh %118 : vector<2x32xf32>
    %120 = vector.extract_strided_slice %80 {offsets = [0, 96], sizes = [2, 32], strides = [1, 1]} : vector<2x128xf32> to vector<2x32xf32>
    %121 = arith.negf %120 : vector<2x32xf32>
    %122 = math.exp %121 : vector<2x32xf32>
    %cst_27 = arith.constant 1.000000e+00 : f32
    %123 = vector.broadcast %cst_27 : f32 to vector<2x32xf32>
    %124 = arith.addf %123, %122 : vector<2x32xf32>
    %125 = arith.divf %123, %124 : vector<2x32xf32>
    %126 = arith.mulf %117, %63 : vector<2x32xf32>
    %127 = arith.mulf %111, %119 : vector<2x32xf32>
    %128 = arith.addf %126, %127 : vector<2x32xf32>
    %129 = math.tanh %128 : vector<2x32xf32>
    %130 = arith.mulf %125, %129 : vector<2x32xf32>
    %131 = tpu.concatenate %105, %130 in 1 : vector<2x32xf32>, vector<2x32xf32> -> vector<2x64xf32>
    %132 = arith.maximumf %67, %131 : vector<2x64xf32>
    %c2_i32 = arith.constant 2 : i32
    %c0_28 = arith.constant 0 : index
    %c0_29 = arith.constant 0 : index
    %133 = vector.load %arg3[%c0_28, %c0_29] : memref<64x256xf32, #tpu.memory_space<vmem>>, vector<64x256xf32>
    %cst_30 = arith.constant dense<0.000000e+00> : vector<2x256xf32>
    %134 = tpu.matmul %131, %133, %cst_30 {dimension_numbers = #tpu.dot_dimension_numbers<[1], [0], [0], [1], [0, 0, 1, 1], [], []>} : vector<2x64xf32>, vector<64x256xf32>, vector<2x256xf32> -> vector<2x256xf32>
    %135 = arith.index_cast %c2_i32 : i32 to index
    %c0_31 = arith.constant 0 : index
    %c0_32 = arith.constant 0 : index
    %136 = vector.load %arg1[%135, %c0_31, %c0_32] : memref<8x2x128xf32, #tpu.memory_space<vmem>>, vector<1x2x128xf32>
    %137 = vector.shape_cast %136 : vector<1x2x128xf32> to vector<2x128xf32>
    %138 = vector.extract_strided_slice %134 {offsets = [0, 0], sizes = [2, 128], strides = [1, 1]} : vector<2x256xf32> to vector<2x128xf32>
    %139 = arith.addf %137, %138 : vector<2x128xf32>
    %c7_i32_33 = arith.constant 7 : i32
    %140 = arith.subi %c7_i32_33, %c2_i32 : i32
    %141 = arith.index_cast %140 : i32 to index
    %c0_34 = arith.constant 0 : index
    %c0_35 = arith.constant 0 : index
    %142 = vector.load %arg2[%141, %c0_34, %c0_35] : memref<8x2x128xf32, #tpu.memory_space<vmem>>, vector<1x2x128xf32>
    %143 = vector.shape_cast %142 : vector<1x2x128xf32> to vector<2x128xf32>
    %144 = vector.extract_strided_slice %134 {offsets = [0, 128], sizes = [2, 128], strides = [1, 1]} : vector<2x256xf32> to vector<2x128xf32>
    %145 = arith.addf %143, %144 : vector<2x128xf32>
    %146 = vector.extract_strided_slice %139 {offsets = [0, 0], sizes = [2, 32], strides = [1, 1]} : vector<2x128xf32> to vector<2x32xf32>
    %147 = arith.negf %146 : vector<2x32xf32>
    %148 = math.exp %147 : vector<2x32xf32>
    %cst_36 = arith.constant 1.000000e+00 : f32
    %149 = vector.broadcast %cst_36 : f32 to vector<2x32xf32>
    %150 = arith.addf %149, %148 : vector<2x32xf32>
    %151 = arith.divf %149, %150 : vector<2x32xf32>
    %152 = vector.extract_strided_slice %139 {offsets = [0, 32], sizes = [2, 32], strides = [1, 1]} : vector<2x128xf32> to vector<2x32xf32>
    %153 = arith.negf %152 : vector<2x32xf32>
    %154 = math.exp %153 : vector<2x32xf32>
    %cst_37 = arith.constant 1.000000e+00 : f32
    %155 = vector.broadcast %cst_37 : f32 to vector<2x32xf32>
    %156 = arith.addf %155, %154 : vector<2x32xf32>
    %157 = arith.divf %155, %156 : vector<2x32xf32>
    %158 = vector.extract_strided_slice %139 {offsets = [0, 64], sizes = [2, 32], strides = [1, 1]} : vector<2x128xf32> to vector<2x32xf32>
    %159 = math.tanh %158 : vector<2x32xf32>
    %160 = vector.extract_strided_slice %139 {offsets = [0, 96], sizes = [2, 32], strides = [1, 1]} : vector<2x128xf32> to vector<2x32xf32>
    %161 = arith.negf %160 : vector<2x32xf32>
    %162 = math.exp %161 : vector<2x32xf32>
    %cst_38 = arith.constant 1.000000e+00 : f32
    %163 = vector.broadcast %cst_38 : f32 to vector<2x32xf32>
    %164 = arith.addf %163, %162 : vector<2x32xf32>
    %165 = arith.divf %163, %164 : vector<2x32xf32>
    %166 = arith.mulf %157, %103 : vector<2x32xf32>
    %167 = arith.mulf %151, %159 : vector<2x32xf32>
    %168 = arith.addf %166, %167 : vector<2x32xf32>
    %169 = math.tanh %168 : vector<2x32xf32>
    %170 = arith.mulf %165, %169 : vector<2x32xf32>
    %171 = vector.extract_strided_slice %145 {offsets = [0, 0], sizes = [2, 32], strides = [1, 1]} : vector<2x128xf32> to vector<2x32xf32>
    %172 = arith.negf %171 : vector<2x32xf32>
    %173 = math.exp %172 : vector<2x32xf32>
    %cst_39 = arith.constant 1.000000e+00 : f32
    %174 = vector.broadcast %cst_39 : f32 to vector<2x32xf32>
    %175 = arith.addf %174, %173 : vector<2x32xf32>
    %176 = arith.divf %174, %175 : vector<2x32xf32>
    %177 = vector.extract_strided_slice %145 {offsets = [0, 32], sizes = [2, 32], strides = [1, 1]} : vector<2x128xf32> to vector<2x32xf32>
    %178 = arith.negf %177 : vector<2x32xf32>
    %179 = math.exp %178 : vector<2x32xf32>
    %cst_40 = arith.constant 1.000000e+00 : f32
    %180 = vector.broadcast %cst_40 : f32 to vector<2x32xf32>
    %181 = arith.addf %180, %179 : vector<2x32xf32>
    %182 = arith.divf %180, %181 : vector<2x32xf32>
    %183 = vector.extract_strided_slice %145 {offsets = [0, 64], sizes = [2, 32], strides = [1, 1]} : vector<2x128xf32> to vector<2x32xf32>
    %184 = math.tanh %183 : vector<2x32xf32>
    %185 = vector.extract_strided_slice %145 {offsets = [0, 96], sizes = [2, 32], strides = [1, 1]} : vector<2x128xf32> to vector<2x32xf32>
    %186 = arith.negf %185 : vector<2x32xf32>
    %187 = math.exp %186 : vector<2x32xf32>
    %cst_41 = arith.constant 1.000000e+00 : f32
    %188 = vector.broadcast %cst_41 : f32 to vector<2x32xf32>
    %189 = arith.addf %188, %187 : vector<2x32xf32>
    %190 = arith.divf %188, %189 : vector<2x32xf32>
    %191 = arith.mulf %182, %128 : vector<2x32xf32>
    %192 = arith.mulf %176, %184 : vector<2x32xf32>
    %193 = arith.addf %191, %192 : vector<2x32xf32>
    %194 = math.tanh %193 : vector<2x32xf32>
    %195 = arith.mulf %190, %194 : vector<2x32xf32>
    %196 = tpu.concatenate %170, %195 in 1 : vector<2x32xf32>, vector<2x32xf32> -> vector<2x64xf32>
    %197 = arith.maximumf %132, %196 : vector<2x64xf32>
    %c3_i32 = arith.constant 3 : i32
    %c0_42 = arith.constant 0 : index
    %c0_43 = arith.constant 0 : index
    %198 = vector.load %arg3[%c0_42, %c0_43] : memref<64x256xf32, #tpu.memory_space<vmem>>, vector<64x256xf32>
    %cst_44 = arith.constant dense<0.000000e+00> : vector<2x256xf32>
    %199 = tpu.matmul %196, %198, %cst_44 {dimension_numbers = #tpu.dot_dimension_numbers<[1], [0], [0], [1], [0, 0, 1, 1], [], []>} : vector<2x64xf32>, vector<64x256xf32>, vector<2x256xf32> -> vector<2x256xf32>
    %200 = arith.index_cast %c3_i32 : i32 to index
    %c0_45 = arith.constant 0 : index
    %c0_46 = arith.constant 0 : index
    %201 = vector.load %arg1[%200, %c0_45, %c0_46] : memref<8x2x128xf32, #tpu.memory_space<vmem>>, vector<1x2x128xf32>
    %202 = vector.shape_cast %201 : vector<1x2x128xf32> to vector<2x128xf32>
    %203 = vector.extract_strided_slice %199 {offsets = [0, 0], sizes = [2, 128], strides = [1, 1]} : vector<2x256xf32> to vector<2x128xf32>
    %204 = arith.addf %202, %203 : vector<2x128xf32>
    %c7_i32_47 = arith.constant 7 : i32
    %205 = arith.subi %c7_i32_47, %c3_i32 : i32
    %206 = arith.index_cast %205 : i32 to index
    %c0_48 = arith.constant 0 : index
    %c0_49 = arith.constant 0 : index
    %207 = vector.load %arg2[%206, %c0_48, %c0_49] : memref<8x2x128xf32, #tpu.memory_space<vmem>>, vector<1x2x128xf32>
    %208 = vector.shape_cast %207 : vector<1x2x128xf32> to vector<2x128xf32>
    %209 = vector.extract_strided_slice %199 {offsets = [0, 128], sizes = [2, 128], strides = [1, 1]} : vector<2x256xf32> to vector<2x128xf32>
    %210 = arith.addf %208, %209 : vector<2x128xf32>
    %211 = vector.extract_strided_slice %204 {offsets = [0, 0], sizes = [2, 32], strides = [1, 1]} : vector<2x128xf32> to vector<2x32xf32>
    %212 = arith.negf %211 : vector<2x32xf32>
    %213 = math.exp %212 : vector<2x32xf32>
    %cst_50 = arith.constant 1.000000e+00 : f32
    %214 = vector.broadcast %cst_50 : f32 to vector<2x32xf32>
    %215 = arith.addf %214, %213 : vector<2x32xf32>
    %216 = arith.divf %214, %215 : vector<2x32xf32>
    %217 = vector.extract_strided_slice %204 {offsets = [0, 32], sizes = [2, 32], strides = [1, 1]} : vector<2x128xf32> to vector<2x32xf32>
    %218 = arith.negf %217 : vector<2x32xf32>
    %219 = math.exp %218 : vector<2x32xf32>
    %cst_51 = arith.constant 1.000000e+00 : f32
    %220 = vector.broadcast %cst_51 : f32 to vector<2x32xf32>
    %221 = arith.addf %220, %219 : vector<2x32xf32>
    %222 = arith.divf %220, %221 : vector<2x32xf32>
    %223 = vector.extract_strided_slice %204 {offsets = [0, 64], sizes = [2, 32], strides = [1, 1]} : vector<2x128xf32> to vector<2x32xf32>
    %224 = math.tanh %223 : vector<2x32xf32>
    %225 = vector.extract_strided_slice %204 {offsets = [0, 96], sizes = [2, 32], strides = [1, 1]} : vector<2x128xf32> to vector<2x32xf32>
    %226 = arith.negf %225 : vector<2x32xf32>
    %227 = math.exp %226 : vector<2x32xf32>
    %cst_52 = arith.constant 1.000000e+00 : f32
    %228 = vector.broadcast %cst_52 : f32 to vector<2x32xf32>
    %229 = arith.addf %228, %227 : vector<2x32xf32>
    %230 = arith.divf %228, %229 : vector<2x32xf32>
    %231 = arith.mulf %222, %168 : vector<2x32xf32>
    %232 = arith.mulf %216, %224 : vector<2x32xf32>
    %233 = arith.addf %231, %232 : vector<2x32xf32>
    %234 = math.tanh %233 : vector<2x32xf32>
    %235 = arith.mulf %230, %234 : vector<2x32xf32>
    %236 = vector.extract_strided_slice %210 {offsets = [0, 0], sizes = [2, 32], strides = [1, 1]} : vector<2x128xf32> to vector<2x32xf32>
    %237 = arith.negf %236 : vector<2x32xf32>
    %238 = math.exp %237 : vector<2x32xf32>
    %cst_53 = arith.constant 1.000000e+00 : f32
    %239 = vector.broadcast %cst_53 : f32 to vector<2x32xf32>
    %240 = arith.addf %239, %238 : vector<2x32xf32>
    %241 = arith.divf %239, %240 : vector<2x32xf32>
    %242 = vector.extract_strided_slice %210 {offsets = [0, 32], sizes = [2, 32], strides = [1, 1]} : vector<2x128xf32> to vector<2x32xf32>
    %243 = arith.negf %242 : vector<2x32xf32>
    %244 = math.exp %243 : vector<2x32xf32>
    %cst_54 = arith.constant 1.000000e+00 : f32
    %245 = vector.broadcast %cst_54 : f32 to vector<2x32xf32>
    %246 = arith.addf %245, %244 : vector<2x32xf32>
    %247 = arith.divf %245, %246 : vector<2x32xf32>
    %248 = vector.extract_strided_slice %210 {offsets = [0, 64], sizes = [2, 32], strides = [1, 1]} : vector<2x128xf32> to vector<2x32xf32>
    %249 = math.tanh %248 : vector<2x32xf32>
    %250 = vector.extract_strided_slice %210 {offsets = [0, 96], sizes = [2, 32], strides = [1, 1]} : vector<2x128xf32> to vector<2x32xf32>
    %251 = arith.negf %250 : vector<2x32xf32>
    %252 = math.exp %251 : vector<2x32xf32>
    %cst_55 = arith.constant 1.000000e+00 : f32
    %253 = vector.broadcast %cst_55 : f32 to vector<2x32xf32>
    %254 = arith.addf %253, %252 : vector<2x32xf32>
    %255 = arith.divf %253, %254 : vector<2x32xf32>
    %256 = arith.mulf %247, %193 : vector<2x32xf32>
    %257 = arith.mulf %241, %249 : vector<2x32xf32>
    %258 = arith.addf %256, %257 : vector<2x32xf32>
    %259 = math.tanh %258 : vector<2x32xf32>
    %260 = arith.mulf %255, %259 : vector<2x32xf32>
    %261 = tpu.concatenate %235, %260 in 1 : vector<2x32xf32>, vector<2x32xf32> -> vector<2x64xf32>
    %262 = arith.maximumf %197, %261 : vector<2x64xf32>
    %c4_i32 = arith.constant 4 : i32
    %c0_56 = arith.constant 0 : index
    %c0_57 = arith.constant 0 : index
    %263 = vector.load %arg3[%c0_56, %c0_57] : memref<64x256xf32, #tpu.memory_space<vmem>>, vector<64x256xf32>
    %cst_58 = arith.constant dense<0.000000e+00> : vector<2x256xf32>
    %264 = tpu.matmul %261, %263, %cst_58 {dimension_numbers = #tpu.dot_dimension_numbers<[1], [0], [0], [1], [0, 0, 1, 1], [], []>} : vector<2x64xf32>, vector<64x256xf32>, vector<2x256xf32> -> vector<2x256xf32>
    %265 = arith.index_cast %c4_i32 : i32 to index
    %c0_59 = arith.constant 0 : index
    %c0_60 = arith.constant 0 : index
    %266 = vector.load %arg1[%265, %c0_59, %c0_60] : memref<8x2x128xf32, #tpu.memory_space<vmem>>, vector<1x2x128xf32>
    %267 = vector.shape_cast %266 : vector<1x2x128xf32> to vector<2x128xf32>
    %268 = vector.extract_strided_slice %264 {offsets = [0, 0], sizes = [2, 128], strides = [1, 1]} : vector<2x256xf32> to vector<2x128xf32>
    %269 = arith.addf %267, %268 : vector<2x128xf32>
    %c7_i32_61 = arith.constant 7 : i32
    %270 = arith.subi %c7_i32_61, %c4_i32 : i32
    %271 = arith.index_cast %270 : i32 to index
    %c0_62 = arith.constant 0 : index
    %c0_63 = arith.constant 0 : index
    %272 = vector.load %arg2[%271, %c0_62, %c0_63] : memref<8x2x128xf32, #tpu.memory_space<vmem>>, vector<1x2x128xf32>
    %273 = vector.shape_cast %272 : vector<1x2x128xf32> to vector<2x128xf32>
    %274 = vector.extract_strided_slice %264 {offsets = [0, 128], sizes = [2, 128], strides = [1, 1]} : vector<2x256xf32> to vector<2x128xf32>
    %275 = arith.addf %273, %274 : vector<2x128xf32>
    %276 = vector.extract_strided_slice %269 {offsets = [0, 0], sizes = [2, 32], strides = [1, 1]} : vector<2x128xf32> to vector<2x32xf32>
    %277 = arith.negf %276 : vector<2x32xf32>
    %278 = math.exp %277 : vector<2x32xf32>
    %cst_64 = arith.constant 1.000000e+00 : f32
    %279 = vector.broadcast %cst_64 : f32 to vector<2x32xf32>
    %280 = arith.addf %279, %278 : vector<2x32xf32>
    %281 = arith.divf %279, %280 : vector<2x32xf32>
    %282 = vector.extract_strided_slice %269 {offsets = [0, 32], sizes = [2, 32], strides = [1, 1]} : vector<2x128xf32> to vector<2x32xf32>
    %283 = arith.negf %282 : vector<2x32xf32>
    %284 = math.exp %283 : vector<2x32xf32>
    %cst_65 = arith.constant 1.000000e+00 : f32
    %285 = vector.broadcast %cst_65 : f32 to vector<2x32xf32>
    %286 = arith.addf %285, %284 : vector<2x32xf32>
    %287 = arith.divf %285, %286 : vector<2x32xf32>
    %288 = vector.extract_strided_slice %269 {offsets = [0, 64], sizes = [2, 32], strides = [1, 1]} : vector<2x128xf32> to vector<2x32xf32>
    %289 = math.tanh %288 : vector<2x32xf32>
    %290 = vector.extract_strided_slice %269 {offsets = [0, 96], sizes = [2, 32], strides = [1, 1]} : vector<2x128xf32> to vector<2x32xf32>
    %291 = arith.negf %290 : vector<2x32xf32>
    %292 = math.exp %291 : vector<2x32xf32>
    %cst_66 = arith.constant 1.000000e+00 : f32
    %293 = vector.broadcast %cst_66 : f32 to vector<2x32xf32>
    %294 = arith.addf %293, %292 : vector<2x32xf32>
    %295 = arith.divf %293, %294 : vector<2x32xf32>
    %296 = arith.mulf %287, %233 : vector<2x32xf32>
    %297 = arith.mulf %281, %289 : vector<2x32xf32>
    %298 = arith.addf %296, %297 : vector<2x32xf32>
    %299 = math.tanh %298 : vector<2x32xf32>
    %300 = arith.mulf %295, %299 : vector<2x32xf32>
    %301 = vector.extract_strided_slice %275 {offsets = [0, 0], sizes = [2, 32], strides = [1, 1]} : vector<2x128xf32> to vector<2x32xf32>
    %302 = arith.negf %301 : vector<2x32xf32>
    %303 = math.exp %302 : vector<2x32xf32>
    %cst_67 = arith.constant 1.000000e+00 : f32
    %304 = vector.broadcast %cst_67 : f32 to vector<2x32xf32>
    %305 = arith.addf %304, %303 : vector<2x32xf32>
    %306 = arith.divf %304, %305 : vector<2x32xf32>
    %307 = vector.extract_strided_slice %275 {offsets = [0, 32], sizes = [2, 32], strides = [1, 1]} : vector<2x128xf32> to vector<2x32xf32>
    %308 = arith.negf %307 : vector<2x32xf32>
    %309 = math.exp %308 : vector<2x32xf32>
    %cst_68 = arith.constant 1.000000e+00 : f32
    %310 = vector.broadcast %cst_68 : f32 to vector<2x32xf32>
    %311 = arith.addf %310, %309 : vector<2x32xf32>
    %312 = arith.divf %310, %311 : vector<2x32xf32>
    %313 = vector.extract_strided_slice %275 {offsets = [0, 64], sizes = [2, 32], strides = [1, 1]} : vector<2x128xf32> to vector<2x32xf32>
    %314 = math.tanh %313 : vector<2x32xf32>
    %315 = vector.extract_strided_slice %275 {offsets = [0, 96], sizes = [2, 32], strides = [1, 1]} : vector<2x128xf32> to vector<2x32xf32>
    %316 = arith.negf %315 : vector<2x32xf32>
    %317 = math.exp %316 : vector<2x32xf32>
    %cst_69 = arith.constant 1.000000e+00 : f32
    %318 = vector.broadcast %cst_69 : f32 to vector<2x32xf32>
    %319 = arith.addf %318, %317 : vector<2x32xf32>
    %320 = arith.divf %318, %319 : vector<2x32xf32>
    %321 = arith.mulf %312, %258 : vector<2x32xf32>
    %322 = arith.mulf %306, %314 : vector<2x32xf32>
    %323 = arith.addf %321, %322 : vector<2x32xf32>
    %324 = math.tanh %323 : vector<2x32xf32>
    %325 = arith.mulf %320, %324 : vector<2x32xf32>
    %326 = tpu.concatenate %300, %325 in 1 : vector<2x32xf32>, vector<2x32xf32> -> vector<2x64xf32>
    %327 = arith.maximumf %262, %326 : vector<2x64xf32>
    %c5_i32 = arith.constant 5 : i32
    %c0_70 = arith.constant 0 : index
    %c0_71 = arith.constant 0 : index
    %328 = vector.load %arg3[%c0_70, %c0_71] : memref<64x256xf32, #tpu.memory_space<vmem>>, vector<64x256xf32>
    %cst_72 = arith.constant dense<0.000000e+00> : vector<2x256xf32>
    %329 = tpu.matmul %326, %328, %cst_72 {dimension_numbers = #tpu.dot_dimension_numbers<[1], [0], [0], [1], [0, 0, 1, 1], [], []>} : vector<2x64xf32>, vector<64x256xf32>, vector<2x256xf32> -> vector<2x256xf32>
    %330 = arith.index_cast %c5_i32 : i32 to index
    %c0_73 = arith.constant 0 : index
    %c0_74 = arith.constant 0 : index
    %331 = vector.load %arg1[%330, %c0_73, %c0_74] : memref<8x2x128xf32, #tpu.memory_space<vmem>>, vector<1x2x128xf32>
    %332 = vector.shape_cast %331 : vector<1x2x128xf32> to vector<2x128xf32>
    %333 = vector.extract_strided_slice %329 {offsets = [0, 0], sizes = [2, 128], strides = [1, 1]} : vector<2x256xf32> to vector<2x128xf32>
    %334 = arith.addf %332, %333 : vector<2x128xf32>
    %c7_i32_75 = arith.constant 7 : i32
    %335 = arith.subi %c7_i32_75, %c5_i32 : i32
    %336 = arith.index_cast %335 : i32 to index
    %c0_76 = arith.constant 0 : index
    %c0_77 = arith.constant 0 : index
    %337 = vector.load %arg2[%336, %c0_76, %c0_77] : memref<8x2x128xf32, #tpu.memory_space<vmem>>, vector<1x2x128xf32>
    %338 = vector.shape_cast %337 : vector<1x2x128xf32> to vector<2x128xf32>
    %339 = vector.extract_strided_slice %329 {offsets = [0, 128], sizes = [2, 128], strides = [1, 1]} : vector<2x256xf32> to vector<2x128xf32>
    %340 = arith.addf %338, %339 : vector<2x128xf32>
    %341 = vector.extract_strided_slice %334 {offsets = [0, 0], sizes = [2, 32], strides = [1, 1]} : vector<2x128xf32> to vector<2x32xf32>
    %342 = arith.negf %341 : vector<2x32xf32>
    %343 = math.exp %342 : vector<2x32xf32>
    %cst_78 = arith.constant 1.000000e+00 : f32
    %344 = vector.broadcast %cst_78 : f32 to vector<2x32xf32>
    %345 = arith.addf %344, %343 : vector<2x32xf32>
    %346 = arith.divf %344, %345 : vector<2x32xf32>
    %347 = vector.extract_strided_slice %334 {offsets = [0, 32], sizes = [2, 32], strides = [1, 1]} : vector<2x128xf32> to vector<2x32xf32>
    %348 = arith.negf %347 : vector<2x32xf32>
    %349 = math.exp %348 : vector<2x32xf32>
    %cst_79 = arith.constant 1.000000e+00 : f32
    %350 = vector.broadcast %cst_79 : f32 to vector<2x32xf32>
    %351 = arith.addf %350, %349 : vector<2x32xf32>
    %352 = arith.divf %350, %351 : vector<2x32xf32>
    %353 = vector.extract_strided_slice %334 {offsets = [0, 64], sizes = [2, 32], strides = [1, 1]} : vector<2x128xf32> to vector<2x32xf32>
    %354 = math.tanh %353 : vector<2x32xf32>
    %355 = vector.extract_strided_slice %334 {offsets = [0, 96], sizes = [2, 32], strides = [1, 1]} : vector<2x128xf32> to vector<2x32xf32>
    %356 = arith.negf %355 : vector<2x32xf32>
    %357 = math.exp %356 : vector<2x32xf32>
    %cst_80 = arith.constant 1.000000e+00 : f32
    %358 = vector.broadcast %cst_80 : f32 to vector<2x32xf32>
    %359 = arith.addf %358, %357 : vector<2x32xf32>
    %360 = arith.divf %358, %359 : vector<2x32xf32>
    %361 = arith.mulf %352, %298 : vector<2x32xf32>
    %362 = arith.mulf %346, %354 : vector<2x32xf32>
    %363 = arith.addf %361, %362 : vector<2x32xf32>
    %364 = math.tanh %363 : vector<2x32xf32>
    %365 = arith.mulf %360, %364 : vector<2x32xf32>
    %366 = vector.extract_strided_slice %340 {offsets = [0, 0], sizes = [2, 32], strides = [1, 1]} : vector<2x128xf32> to vector<2x32xf32>
    %367 = arith.negf %366 : vector<2x32xf32>
    %368 = math.exp %367 : vector<2x32xf32>
    %cst_81 = arith.constant 1.000000e+00 : f32
    %369 = vector.broadcast %cst_81 : f32 to vector<2x32xf32>
    %370 = arith.addf %369, %368 : vector<2x32xf32>
    %371 = arith.divf %369, %370 : vector<2x32xf32>
    %372 = vector.extract_strided_slice %340 {offsets = [0, 32], sizes = [2, 32], strides = [1, 1]} : vector<2x128xf32> to vector<2x32xf32>
    %373 = arith.negf %372 : vector<2x32xf32>
    %374 = math.exp %373 : vector<2x32xf32>
    %cst_82 = arith.constant 1.000000e+00 : f32
    %375 = vector.broadcast %cst_82 : f32 to vector<2x32xf32>
    %376 = arith.addf %375, %374 : vector<2x32xf32>
    %377 = arith.divf %375, %376 : vector<2x32xf32>
    %378 = vector.extract_strided_slice %340 {offsets = [0, 64], sizes = [2, 32], strides = [1, 1]} : vector<2x128xf32> to vector<2x32xf32>
    %379 = math.tanh %378 : vector<2x32xf32>
    %380 = vector.extract_strided_slice %340 {offsets = [0, 96], sizes = [2, 32], strides = [1, 1]} : vector<2x128xf32> to vector<2x32xf32>
    %381 = arith.negf %380 : vector<2x32xf32>
    %382 = math.exp %381 : vector<2x32xf32>
    %cst_83 = arith.constant 1.000000e+00 : f32
    %383 = vector.broadcast %cst_83 : f32 to vector<2x32xf32>
    %384 = arith.addf %383, %382 : vector<2x32xf32>
    %385 = arith.divf %383, %384 : vector<2x32xf32>
    %386 = arith.mulf %377, %323 : vector<2x32xf32>
    %387 = arith.mulf %371, %379 : vector<2x32xf32>
    %388 = arith.addf %386, %387 : vector<2x32xf32>
    %389 = math.tanh %388 : vector<2x32xf32>
    %390 = arith.mulf %385, %389 : vector<2x32xf32>
    %391 = tpu.concatenate %365, %390 in 1 : vector<2x32xf32>, vector<2x32xf32> -> vector<2x64xf32>
    %392 = arith.maximumf %327, %391 : vector<2x64xf32>
    %c6_i32 = arith.constant 6 : i32
    %c0_84 = arith.constant 0 : index
    %c0_85 = arith.constant 0 : index
    %393 = vector.load %arg3[%c0_84, %c0_85] : memref<64x256xf32, #tpu.memory_space<vmem>>, vector<64x256xf32>
    %cst_86 = arith.constant dense<0.000000e+00> : vector<2x256xf32>
    %394 = tpu.matmul %391, %393, %cst_86 {dimension_numbers = #tpu.dot_dimension_numbers<[1], [0], [0], [1], [0, 0, 1, 1], [], []>} : vector<2x64xf32>, vector<64x256xf32>, vector<2x256xf32> -> vector<2x256xf32>
    %395 = arith.index_cast %c6_i32 : i32 to index
    %c0_87 = arith.constant 0 : index
    %c0_88 = arith.constant 0 : index
    %396 = vector.load %arg1[%395, %c0_87, %c0_88] : memref<8x2x128xf32, #tpu.memory_space<vmem>>, vector<1x2x128xf32>
    %397 = vector.shape_cast %396 : vector<1x2x128xf32> to vector<2x128xf32>
    %398 = vector.extract_strided_slice %394 {offsets = [0, 0], sizes = [2, 128], strides = [1, 1]} : vector<2x256xf32> to vector<2x128xf32>
    %399 = arith.addf %397, %398 : vector<2x128xf32>
    %c7_i32_89 = arith.constant 7 : i32
    %400 = arith.subi %c7_i32_89, %c6_i32 : i32
    %401 = arith.index_cast %400 : i32 to index
    %c0_90 = arith.constant 0 : index
    %c0_91 = arith.constant 0 : index
    %402 = vector.load %arg2[%401, %c0_90, %c0_91] : memref<8x2x128xf32, #tpu.memory_space<vmem>>, vector<1x2x128xf32>
    %403 = vector.shape_cast %402 : vector<1x2x128xf32> to vector<2x128xf32>
    %404 = vector.extract_strided_slice %394 {offsets = [0, 128], sizes = [2, 128], strides = [1, 1]} : vector<2x256xf32> to vector<2x128xf32>
    %405 = arith.addf %403, %404 : vector<2x128xf32>
    %406 = vector.extract_strided_slice %399 {offsets = [0, 0], sizes = [2, 32], strides = [1, 1]} : vector<2x128xf32> to vector<2x32xf32>
    %407 = arith.negf %406 : vector<2x32xf32>
    %408 = math.exp %407 : vector<2x32xf32>
    %cst_92 = arith.constant 1.000000e+00 : f32
    %409 = vector.broadcast %cst_92 : f32 to vector<2x32xf32>
    %410 = arith.addf %409, %408 : vector<2x32xf32>
    %411 = arith.divf %409, %410 : vector<2x32xf32>
    %412 = vector.extract_strided_slice %399 {offsets = [0, 32], sizes = [2, 32], strides = [1, 1]} : vector<2x128xf32> to vector<2x32xf32>
    %413 = arith.negf %412 : vector<2x32xf32>
    %414 = math.exp %413 : vector<2x32xf32>
    %cst_93 = arith.constant 1.000000e+00 : f32
    %415 = vector.broadcast %cst_93 : f32 to vector<2x32xf32>
    %416 = arith.addf %415, %414 : vector<2x32xf32>
    %417 = arith.divf %415, %416 : vector<2x32xf32>
    %418 = vector.extract_strided_slice %399 {offsets = [0, 64], sizes = [2, 32], strides = [1, 1]} : vector<2x128xf32> to vector<2x32xf32>
    %419 = math.tanh %418 : vector<2x32xf32>
    %420 = vector.extract_strided_slice %399 {offsets = [0, 96], sizes = [2, 32], strides = [1, 1]} : vector<2x128xf32> to vector<2x32xf32>
    %421 = arith.negf %420 : vector<2x32xf32>
    %422 = math.exp %421 : vector<2x32xf32>
    %cst_94 = arith.constant 1.000000e+00 : f32
    %423 = vector.broadcast %cst_94 : f32 to vector<2x32xf32>
    %424 = arith.addf %423, %422 : vector<2x32xf32>
    %425 = arith.divf %423, %424 : vector<2x32xf32>
    %426 = arith.mulf %417, %363 : vector<2x32xf32>
    %427 = arith.mulf %411, %419 : vector<2x32xf32>
    %428 = arith.addf %426, %427 : vector<2x32xf32>
    %429 = math.tanh %428 : vector<2x32xf32>
    %430 = arith.mulf %425, %429 : vector<2x32xf32>
    %431 = vector.extract_strided_slice %405 {offsets = [0, 0], sizes = [2, 32], strides = [1, 1]} : vector<2x128xf32> to vector<2x32xf32>
    %432 = arith.negf %431 : vector<2x32xf32>
    %433 = math.exp %432 : vector<2x32xf32>
    %cst_95 = arith.constant 1.000000e+00 : f32
    %434 = vector.broadcast %cst_95 : f32 to vector<2x32xf32>
    %435 = arith.addf %434, %433 : vector<2x32xf32>
    %436 = arith.divf %434, %435 : vector<2x32xf32>
    %437 = vector.extract_strided_slice %405 {offsets = [0, 32], sizes = [2, 32], strides = [1, 1]} : vector<2x128xf32> to vector<2x32xf32>
    %438 = arith.negf %437 : vector<2x32xf32>
    %439 = math.exp %438 : vector<2x32xf32>
    %cst_96 = arith.constant 1.000000e+00 : f32
    %440 = vector.broadcast %cst_96 : f32 to vector<2x32xf32>
    %441 = arith.addf %440, %439 : vector<2x32xf32>
    %442 = arith.divf %440, %441 : vector<2x32xf32>
    %443 = vector.extract_strided_slice %405 {offsets = [0, 64], sizes = [2, 32], strides = [1, 1]} : vector<2x128xf32> to vector<2x32xf32>
    %444 = math.tanh %443 : vector<2x32xf32>
    %445 = vector.extract_strided_slice %405 {offsets = [0, 96], sizes = [2, 32], strides = [1, 1]} : vector<2x128xf32> to vector<2x32xf32>
    %446 = arith.negf %445 : vector<2x32xf32>
    %447 = math.exp %446 : vector<2x32xf32>
    %cst_97 = arith.constant 1.000000e+00 : f32
    %448 = vector.broadcast %cst_97 : f32 to vector<2x32xf32>
    %449 = arith.addf %448, %447 : vector<2x32xf32>
    %450 = arith.divf %448, %449 : vector<2x32xf32>
    %451 = arith.mulf %442, %388 : vector<2x32xf32>
    %452 = arith.mulf %436, %444 : vector<2x32xf32>
    %453 = arith.addf %451, %452 : vector<2x32xf32>
    %454 = math.tanh %453 : vector<2x32xf32>
    %455 = arith.mulf %450, %454 : vector<2x32xf32>
    %456 = tpu.concatenate %430, %455 in 1 : vector<2x32xf32>, vector<2x32xf32> -> vector<2x64xf32>
    %457 = arith.maximumf %392, %456 : vector<2x64xf32>
    %c7_i32_98 = arith.constant 7 : i32
    %c0_99 = arith.constant 0 : index
    %c0_100 = arith.constant 0 : index
    %458 = vector.load %arg3[%c0_99, %c0_100] : memref<64x256xf32, #tpu.memory_space<vmem>>, vector<64x256xf32>
    %cst_101 = arith.constant dense<0.000000e+00> : vector<2x256xf32>
    %459 = tpu.matmul %456, %458, %cst_101 {dimension_numbers = #tpu.dot_dimension_numbers<[1], [0], [0], [1], [0, 0, 1, 1], [], []>} : vector<2x64xf32>, vector<64x256xf32>, vector<2x256xf32> -> vector<2x256xf32>
    %460 = arith.index_cast %c7_i32_98 : i32 to index
    %c0_102 = arith.constant 0 : index
    %c0_103 = arith.constant 0 : index
    %461 = vector.load %arg1[%460, %c0_102, %c0_103] : memref<8x2x128xf32, #tpu.memory_space<vmem>>, vector<1x2x128xf32>
    %462 = vector.shape_cast %461 : vector<1x2x128xf32> to vector<2x128xf32>
    %463 = vector.extract_strided_slice %459 {offsets = [0, 0], sizes = [2, 128], strides = [1, 1]} : vector<2x256xf32> to vector<2x128xf32>
    %464 = arith.addf %462, %463 : vector<2x128xf32>
    %c7_i32_104 = arith.constant 7 : i32
    %465 = arith.subi %c7_i32_104, %c7_i32_98 : i32
    %466 = arith.index_cast %465 : i32 to index
    %c0_105 = arith.constant 0 : index
    %c0_106 = arith.constant 0 : index
    %467 = vector.load %arg2[%466, %c0_105, %c0_106] : memref<8x2x128xf32, #tpu.memory_space<vmem>>, vector<1x2x128xf32>
    %468 = vector.shape_cast %467 : vector<1x2x128xf32> to vector<2x128xf32>
    %469 = vector.extract_strided_slice %459 {offsets = [0, 128], sizes = [2, 128], strides = [1, 1]} : vector<2x256xf32> to vector<2x128xf32>
    %470 = arith.addf %468, %469 : vector<2x128xf32>
    %471 = vector.extract_strided_slice %464 {offsets = [0, 0], sizes = [2, 32], strides = [1, 1]} : vector<2x128xf32> to vector<2x32xf32>
    %472 = arith.negf %471 : vector<2x32xf32>
    %473 = math.exp %472 : vector<2x32xf32>
    %cst_107 = arith.constant 1.000000e+00 : f32
    %474 = vector.broadcast %cst_107 : f32 to vector<2x32xf32>
    %475 = arith.addf %474, %473 : vector<2x32xf32>
    %476 = arith.divf %474, %475 : vector<2x32xf32>
    %477 = vector.extract_strided_slice %464 {offsets = [0, 32], sizes = [2, 32], strides = [1, 1]} : vector<2x128xf32> to vector<2x32xf32>
    %478 = arith.negf %477 : vector<2x32xf32>
    %479 = math.exp %478 : vector<2x32xf32>
    %cst_108 = arith.constant 1.000000e+00 : f32
    %480 = vector.broadcast %cst_108 : f32 to vector<2x32xf32>
    %481 = arith.addf %480, %479 : vector<2x32xf32>
    %482 = arith.divf %480, %481 : vector<2x32xf32>
    %483 = vector.extract_strided_slice %464 {offsets = [0, 64], sizes = [2, 32], strides = [1, 1]} : vector<2x128xf32> to vector<2x32xf32>
    %484 = math.tanh %483 : vector<2x32xf32>
    %485 = vector.extract_strided_slice %464 {offsets = [0, 96], sizes = [2, 32], strides = [1, 1]} : vector<2x128xf32> to vector<2x32xf32>
    %486 = arith.negf %485 : vector<2x32xf32>
    %487 = math.exp %486 : vector<2x32xf32>
    %cst_109 = arith.constant 1.000000e+00 : f32
    %488 = vector.broadcast %cst_109 : f32 to vector<2x32xf32>
    %489 = arith.addf %488, %487 : vector<2x32xf32>
    %490 = arith.divf %488, %489 : vector<2x32xf32>
    %491 = arith.mulf %482, %428 : vector<2x32xf32>
    %492 = arith.mulf %476, %484 : vector<2x32xf32>
    %493 = arith.addf %491, %492 : vector<2x32xf32>
    %494 = math.tanh %493 : vector<2x32xf32>
    %495 = arith.mulf %490, %494 : vector<2x32xf32>
    %496 = vector.extract_strided_slice %470 {offsets = [0, 0], sizes = [2, 32], strides = [1, 1]} : vector<2x128xf32> to vector<2x32xf32>
    %497 = arith.negf %496 : vector<2x32xf32>
    %498 = math.exp %497 : vector<2x32xf32>
    %cst_110 = arith.constant 1.000000e+00 : f32
    %499 = vector.broadcast %cst_110 : f32 to vector<2x32xf32>
    %500 = arith.addf %499, %498 : vector<2x32xf32>
    %501 = arith.divf %499, %500 : vector<2x32xf32>
    %502 = vector.extract_strided_slice %470 {offsets = [0, 32], sizes = [2, 32], strides = [1, 1]} : vector<2x128xf32> to vector<2x32xf32>
    %503 = arith.negf %502 : vector<2x32xf32>
    %504 = math.exp %503 : vector<2x32xf32>
    %cst_111 = arith.constant 1.000000e+00 : f32
    %505 = vector.broadcast %cst_111 : f32 to vector<2x32xf32>
    %506 = arith.addf %505, %504 : vector<2x32xf32>
    %507 = arith.divf %505, %506 : vector<2x32xf32>
    %508 = vector.extract_strided_slice %470 {offsets = [0, 64], sizes = [2, 32], strides = [1, 1]} : vector<2x128xf32> to vector<2x32xf32>
    %509 = math.tanh %508 : vector<2x32xf32>
    %510 = vector.extract_strided_slice %470 {offsets = [0, 96], sizes = [2, 32], strides = [1, 1]} : vector<2x128xf32> to vector<2x32xf32>
    %511 = arith.negf %510 : vector<2x32xf32>
    %512 = math.exp %511 : vector<2x32xf32>
    %cst_112 = arith.constant 1.000000e+00 : f32
    %513 = vector.broadcast %cst_112 : f32 to vector<2x32xf32>
    %514 = arith.addf %513, %512 : vector<2x32xf32>
    %515 = arith.divf %513, %514 : vector<2x32xf32>
    %516 = arith.mulf %507, %453 : vector<2x32xf32>
    %517 = arith.mulf %501, %509 : vector<2x32xf32>
    %518 = arith.addf %516, %517 : vector<2x32xf32>
    %519 = math.tanh %518 : vector<2x32xf32>
    %520 = arith.mulf %515, %519 : vector<2x32xf32>
    %521 = tpu.concatenate %495, %520 in 1 : vector<2x32xf32>, vector<2x32xf32> -> vector<2x64xf32>
    %522 = arith.maximumf %457, %521 : vector<2x64xf32>
    %c8_i32 = arith.constant 8 : i32
    %c0_113 = arith.constant 0 : index
    %c0_114 = arith.constant 0 : index
    %523 = vector.load %arg4[%c0_113, %c0_114] : memref<64x1xf32, #tpu.memory_space<vmem>>, vector<64x1xf32>
    %cst_115 = arith.constant dense<0.000000e+00> : vector<2x1xf32>
    %524 = tpu.matmul %522, %523, %cst_115 {dimension_numbers = #tpu.dot_dimension_numbers<[1], [0], [0], [1], [0, 0, 1, 1], [], []>} : vector<2x64xf32>, vector<64x1xf32>, vector<2x1xf32> -> vector<2x1xf32>
    %c0_116 = arith.constant 0 : index
    %c0_117 = arith.constant 0 : index
    %525 = vector.load %arg5[%c0_116, %c0_117] : memref<1x1xf32, #tpu.memory_space<vmem>>, vector<1x1xf32>
    %526 = vector.broadcast %525 : vector<1x1xf32> to vector<2x1xf32>
    %527 = arith.addf %524, %526 : vector<2x1xf32>
    %528 = arith.negf %527 : vector<2x1xf32>
    %529 = math.exp %528 : vector<2x1xf32>
    %cst_118 = arith.constant 1.000000e+00 : f32
    %530 = vector.broadcast %cst_118 : f32 to vector<2x1xf32>
    %531 = arith.addf %530, %529 : vector<2x1xf32>
    %532 = arith.divf %530, %531 : vector<2x1xf32>
    %c0_119 = arith.constant 0 : index
    %c0_120 = arith.constant 0 : index
    %533 = vector.load %arg6[%c0_119, %c0_120] : memref<2x1xf32, #tpu.memory_space<vmem>>, vector<2x1xf32>
    tpu.vector_store %arg6[%c0_119, %c0_120], %532 {strides = array<i32>} : memref<2x1xf32, #tpu.memory_space<vmem>>, vector<2x1xf32>,
    return
  }
  func.func @transform_0(%arg0: i32) -> (i32, i32, i32) {
    %c0_i32 = arith.constant 0 : i32
    %c0_i32_0 = arith.constant 0 : i32
    %c0_i32_1 = arith.constant 0 : i32
    %c0_i32_2 = arith.constant 0 : i32
    return %c0_i32, %c0_i32_0, %c0_i32_1 : i32, i32, i32
  }
  func.func @transform_1(%arg0: i32) -> (i32, i32, i32) {
    %c0_i32 = arith.constant 0 : i32
    %c0_i32_0 = arith.constant 0 : i32
    %c0_i32_1 = arith.constant 0 : i32
    %c0_i32_2 = arith.constant 0 : i32
    return %c0_i32, %c0_i32_0, %c0_i32_1 : i32, i32, i32
  }
  func.func @transform_2(%arg0: i32) -> (i32, i32) {
    %c0_i32 = arith.constant 0 : i32
    %c0_i32_0 = arith.constant 0 : i32
    %c0_i32_1 = arith.constant 0 : i32
    return %c0_i32, %c0_i32_0 : i32, i32
  }
  func.func @transform_3(%arg0: i32) -> (i32, i32) {
    %c0_i32 = arith.constant 0 : i32
    %c0_i32_0 = arith.constant 0 : i32
    %c0_i32_1 = arith.constant 0 : i32
    return %c0_i32, %c0_i32_0 : i32, i32
  }
  func.func @transform_4(%arg0: i32) -> (i32, i32) {
    %c0_i32 = arith.constant 0 : i32
    %c0_i32_0 = arith.constant 0 : i32
    %c0_i32_1 = arith.constant 0 : i32
    return %c0_i32, %c0_i32_0 : i32, i32
  }
  func.func @transform_5(%arg0: i32) -> (i32, i32) {
    %c0_i32 = arith.constant 0 : i32
    %c0_i32_0 = arith.constant 0 : i32
    %c0_i32_1 = arith.constant 0 : i32
    return %c0_i32, %c0_i32_0 : i32, i32
  }
}

module attributes {stable_mosaic.version = 11 : i64} {
  func.func @_bidir_lstm_seq_kernel(%arg0: i32, %arg1: memref<8x2x128xf32, #tpu.memory_space<vmem>>, %arg2: memref<8x2x128xf32, #tpu.memory_space<vmem>>, %arg3: memref<64x256xf32, #tpu.memory_space<vmem>>, %arg4: memref<8x2x64xf32, #tpu.memory_space<vmem>>) attributes {dimension_semantics = [#tpu.dimension_semantics<arbitrary>], iteration_bounds = array<i64: 1>, scalar_prefetch = 0 : i64, scratch_operands = 0 : i64, tpu.core_type = #tpu.core_type<tc>, window_params = [{pipeline_mode = #tpu.pipeline_mode<synchronous>, transform_indices = @transform_0, window_bounds = array<i64: 8, 2, 128>}, {pipeline_mode = #tpu.pipeline_mode<synchronous>, transform_indices = @transform_1, window_bounds = array<i64: 8, 2, 128>}, {pipeline_mode = #tpu.pipeline_mode<synchronous>, transform_indices = @transform_2, window_bounds = array<i64: 64, 256>}, {pipeline_mode = #tpu.pipeline_mode<synchronous>, transform_indices = @transform_3, window_bounds = array<i64: 8, 2, 64>}]} {
    %cst = arith.constant 0.000000e+00 : f32
    %0 = vector.broadcast %cst : f32 to vector<2x64xf32>
    %cst_0 = arith.constant 0.000000e+00 : f32
    %1 = vector.broadcast %cst_0 : f32 to vector<2x32xf32>
    %c0_i32 = arith.constant 0 : i32
    %c0 = arith.constant 0 : index
    %c0_1 = arith.constant 0 : index
    %2 = vector.load %arg3[%c0, %c0_1] : memref<64x256xf32, #tpu.memory_space<vmem>>, vector<64x256xf32>
    %cst_2 = arith.constant dense<0.000000e+00> : vector<2x256xf32>
    %3 = tpu.matmul %0, %2, %cst_2 {dimension_numbers = #tpu.dot_dimension_numbers<[1], [0], [0], [1], [0, 0, 1, 1], [], []>} : vector<2x64xf32>, vector<64x256xf32>, vector<2x256xf32> -> vector<2x256xf32>
    %4 = arith.index_cast %c0_i32 : i32 to index
    %c0_3 = arith.constant 0 : index
    %c0_4 = arith.constant 0 : index
    %5 = vector.load %arg1[%4, %c0_3, %c0_4] : memref<8x2x128xf32, #tpu.memory_space<vmem>>, vector<1x2x128xf32>
    %6 = vector.shape_cast %5 : vector<1x2x128xf32> to vector<2x128xf32>
    %7 = vector.extract_strided_slice %3 {offsets = [0, 0], sizes = [2, 128], strides = [1, 1]} : vector<2x256xf32> to vector<2x128xf32>
    %8 = arith.addf %6, %7 : vector<2x128xf32>
    %c7_i32 = arith.constant 7 : i32
    %9 = arith.subi %c7_i32, %c0_i32 : i32
    %10 = arith.index_cast %9 : i32 to index
    %c0_5 = arith.constant 0 : index
    %c0_6 = arith.constant 0 : index
    %11 = vector.load %arg2[%10, %c0_5, %c0_6] : memref<8x2x128xf32, #tpu.memory_space<vmem>>, vector<1x2x128xf32>
    %12 = vector.shape_cast %11 : vector<1x2x128xf32> to vector<2x128xf32>
    %13 = vector.extract_strided_slice %3 {offsets = [0, 128], sizes = [2, 128], strides = [1, 1]} : vector<2x256xf32> to vector<2x128xf32>
    %14 = arith.addf %12, %13 : vector<2x128xf32>
    %15 = vector.extract_strided_slice %8 {offsets = [0, 0], sizes = [2, 32], strides = [1, 1]} : vector<2x128xf32> to vector<2x32xf32>
    %16 = arith.negf %15 : vector<2x32xf32>
    %17 = math.exp %16 : vector<2x32xf32>
    %cst_7 = arith.constant 1.000000e+00 : f32
    %18 = vector.broadcast %cst_7 : f32 to vector<2x32xf32>
    %19 = arith.addf %18, %17 : vector<2x32xf32>
    %20 = arith.divf %18, %19 : vector<2x32xf32>
    %21 = vector.extract_strided_slice %8 {offsets = [0, 32], sizes = [2, 32], strides = [1, 1]} : vector<2x128xf32> to vector<2x32xf32>
    %22 = arith.negf %21 : vector<2x32xf32>
    %23 = math.exp %22 : vector<2x32xf32>
    %cst_8 = arith.constant 1.000000e+00 : f32
    %24 = vector.broadcast %cst_8 : f32 to vector<2x32xf32>
    %25 = arith.addf %24, %23 : vector<2x32xf32>
    %26 = arith.divf %24, %25 : vector<2x32xf32>
    %27 = vector.extract_strided_slice %8 {offsets = [0, 64], sizes = [2, 32], strides = [1, 1]} : vector<2x128xf32> to vector<2x32xf32>
    %28 = math.tanh %27 : vector<2x32xf32>
    %29 = vector.extract_strided_slice %8 {offsets = [0, 96], sizes = [2, 32], strides = [1, 1]} : vector<2x128xf32> to vector<2x32xf32>
    %30 = arith.negf %29 : vector<2x32xf32>
    %31 = math.exp %30 : vector<2x32xf32>
    %cst_9 = arith.constant 1.000000e+00 : f32
    %32 = vector.broadcast %cst_9 : f32 to vector<2x32xf32>
    %33 = arith.addf %32, %31 : vector<2x32xf32>
    %34 = arith.divf %32, %33 : vector<2x32xf32>
    %35 = arith.mulf %26, %1 : vector<2x32xf32>
    %36 = arith.mulf %20, %28 : vector<2x32xf32>
    %37 = arith.addf %35, %36 : vector<2x32xf32>
    %38 = math.tanh %37 : vector<2x32xf32>
    %39 = arith.mulf %34, %38 : vector<2x32xf32>
    %40 = vector.extract_strided_slice %14 {offsets = [0, 0], sizes = [2, 32], strides = [1, 1]} : vector<2x128xf32> to vector<2x32xf32>
    %41 = arith.negf %40 : vector<2x32xf32>
    %42 = math.exp %41 : vector<2x32xf32>
    %cst_10 = arith.constant 1.000000e+00 : f32
    %43 = vector.broadcast %cst_10 : f32 to vector<2x32xf32>
    %44 = arith.addf %43, %42 : vector<2x32xf32>
    %45 = arith.divf %43, %44 : vector<2x32xf32>
    %46 = vector.extract_strided_slice %14 {offsets = [0, 32], sizes = [2, 32], strides = [1, 1]} : vector<2x128xf32> to vector<2x32xf32>
    %47 = arith.negf %46 : vector<2x32xf32>
    %48 = math.exp %47 : vector<2x32xf32>
    %cst_11 = arith.constant 1.000000e+00 : f32
    %49 = vector.broadcast %cst_11 : f32 to vector<2x32xf32>
    %50 = arith.addf %49, %48 : vector<2x32xf32>
    %51 = arith.divf %49, %50 : vector<2x32xf32>
    %52 = vector.extract_strided_slice %14 {offsets = [0, 64], sizes = [2, 32], strides = [1, 1]} : vector<2x128xf32> to vector<2x32xf32>
    %53 = math.tanh %52 : vector<2x32xf32>
    %54 = vector.extract_strided_slice %14 {offsets = [0, 96], sizes = [2, 32], strides = [1, 1]} : vector<2x128xf32> to vector<2x32xf32>
    %55 = arith.negf %54 : vector<2x32xf32>
    %56 = math.exp %55 : vector<2x32xf32>
    %cst_12 = arith.constant 1.000000e+00 : f32
    %57 = vector.broadcast %cst_12 : f32 to vector<2x32xf32>
    %58 = arith.addf %57, %56 : vector<2x32xf32>
    %59 = arith.divf %57, %58 : vector<2x32xf32>
    %60 = arith.mulf %51, %1 : vector<2x32xf32>
    %61 = arith.mulf %45, %53 : vector<2x32xf32>
    %62 = arith.addf %60, %61 : vector<2x32xf32>
    %63 = math.tanh %62 : vector<2x32xf32>
    %64 = arith.mulf %59, %63 : vector<2x32xf32>
    %65 = arith.index_cast %c0_i32 : i32 to index
    %c0_13 = arith.constant 0 : index
    %c0_14 = arith.constant 0 : index
    %66 = vector.load %arg4[%65, %c0_13, %c0_14] : memref<8x2x64xf32, #tpu.memory_space<vmem>>, vector<1x2x32xf32>
    %67 = vector.shape_cast %66 : vector<1x2x32xf32> to vector<2x32xf32>
    %68 = vector.shape_cast %39 : vector<2x32xf32> to vector<1x2x32xf32>
    tpu.vector_store %arg4[%65, %c0_13, %c0_14], %68 {strides = array<i32>} : memref<8x2x64xf32, #tpu.memory_space<vmem>>, vector<1x2x32xf32>,
    %c7_i32_15 = arith.constant 7 : i32
    %69 = arith.subi %c7_i32_15, %c0_i32 : i32
    %70 = arith.index_cast %69 : i32 to index
    %c0_16 = arith.constant 0 : index
    %c32 = arith.constant 32 : index
    %71 = vector.load %arg4[%70, %c0_16, %c32] : memref<8x2x64xf32, #tpu.memory_space<vmem>>, vector<1x2x32xf32>
    %72 = vector.shape_cast %71 : vector<1x2x32xf32> to vector<2x32xf32>
    %73 = vector.shape_cast %64 : vector<2x32xf32> to vector<1x2x32xf32>
    tpu.vector_store %arg4[%70, %c0_16, %c32], %73 {strides = array<i32>} : memref<8x2x64xf32, #tpu.memory_space<vmem>>, vector<1x2x32xf32>,
    %74 = tpu.concatenate %39, %64 in 1 : vector<2x32xf32>, vector<2x32xf32> -> vector<2x64xf32>
    %c1_i32 = arith.constant 1 : i32
    %c0_17 = arith.constant 0 : index
    %c0_18 = arith.constant 0 : index
    %75 = vector.load %arg3[%c0_17, %c0_18] : memref<64x256xf32, #tpu.memory_space<vmem>>, vector<64x256xf32>
    %cst_19 = arith.constant dense<0.000000e+00> : vector<2x256xf32>
    %76 = tpu.matmul %74, %75, %cst_19 {dimension_numbers = #tpu.dot_dimension_numbers<[1], [0], [0], [1], [0, 0, 1, 1], [], []>} : vector<2x64xf32>, vector<64x256xf32>, vector<2x256xf32> -> vector<2x256xf32>
    %77 = arith.index_cast %c1_i32 : i32 to index
    %c0_20 = arith.constant 0 : index
    %c0_21 = arith.constant 0 : index
    %78 = vector.load %arg1[%77, %c0_20, %c0_21] : memref<8x2x128xf32, #tpu.memory_space<vmem>>, vector<1x2x128xf32>
    %79 = vector.shape_cast %78 : vector<1x2x128xf32> to vector<2x128xf32>
    %80 = vector.extract_strided_slice %76 {offsets = [0, 0], sizes = [2, 128], strides = [1, 1]} : vector<2x256xf32> to vector<2x128xf32>
    %81 = arith.addf %79, %80 : vector<2x128xf32>
    %c7_i32_22 = arith.constant 7 : i32
    %82 = arith.subi %c7_i32_22, %c1_i32 : i32
    %83 = arith.index_cast %82 : i32 to index
    %c0_23 = arith.constant 0 : index
    %c0_24 = arith.constant 0 : index
    %84 = vector.load %arg2[%83, %c0_23, %c0_24] : memref<8x2x128xf32, #tpu.memory_space<vmem>>, vector<1x2x128xf32>
    %85 = vector.shape_cast %84 : vector<1x2x128xf32> to vector<2x128xf32>
    %86 = vector.extract_strided_slice %76 {offsets = [0, 128], sizes = [2, 128], strides = [1, 1]} : vector<2x256xf32> to vector<2x128xf32>
    %87 = arith.addf %85, %86 : vector<2x128xf32>
    %88 = vector.extract_strided_slice %81 {offsets = [0, 0], sizes = [2, 32], strides = [1, 1]} : vector<2x128xf32> to vector<2x32xf32>
    %89 = arith.negf %88 : vector<2x32xf32>
    %90 = math.exp %89 : vector<2x32xf32>
    %cst_25 = arith.constant 1.000000e+00 : f32
    %91 = vector.broadcast %cst_25 : f32 to vector<2x32xf32>
    %92 = arith.addf %91, %90 : vector<2x32xf32>
    %93 = arith.divf %91, %92 : vector<2x32xf32>
    %94 = vector.extract_strided_slice %81 {offsets = [0, 32], sizes = [2, 32], strides = [1, 1]} : vector<2x128xf32> to vector<2x32xf32>
    %95 = arith.negf %94 : vector<2x32xf32>
    %96 = math.exp %95 : vector<2x32xf32>
    %cst_26 = arith.constant 1.000000e+00 : f32
    %97 = vector.broadcast %cst_26 : f32 to vector<2x32xf32>
    %98 = arith.addf %97, %96 : vector<2x32xf32>
    %99 = arith.divf %97, %98 : vector<2x32xf32>
    %100 = vector.extract_strided_slice %81 {offsets = [0, 64], sizes = [2, 32], strides = [1, 1]} : vector<2x128xf32> to vector<2x32xf32>
    %101 = math.tanh %100 : vector<2x32xf32>
    %102 = vector.extract_strided_slice %81 {offsets = [0, 96], sizes = [2, 32], strides = [1, 1]} : vector<2x128xf32> to vector<2x32xf32>
    %103 = arith.negf %102 : vector<2x32xf32>
    %104 = math.exp %103 : vector<2x32xf32>
    %cst_27 = arith.constant 1.000000e+00 : f32
    %105 = vector.broadcast %cst_27 : f32 to vector<2x32xf32>
    %106 = arith.addf %105, %104 : vector<2x32xf32>
    %107 = arith.divf %105, %106 : vector<2x32xf32>
    %108 = arith.mulf %99, %37 : vector<2x32xf32>
    %109 = arith.mulf %93, %101 : vector<2x32xf32>
    %110 = arith.addf %108, %109 : vector<2x32xf32>
    %111 = math.tanh %110 : vector<2x32xf32>
    %112 = arith.mulf %107, %111 : vector<2x32xf32>
    %113 = vector.extract_strided_slice %87 {offsets = [0, 0], sizes = [2, 32], strides = [1, 1]} : vector<2x128xf32> to vector<2x32xf32>
    %114 = arith.negf %113 : vector<2x32xf32>
    %115 = math.exp %114 : vector<2x32xf32>
    %cst_28 = arith.constant 1.000000e+00 : f32
    %116 = vector.broadcast %cst_28 : f32 to vector<2x32xf32>
    %117 = arith.addf %116, %115 : vector<2x32xf32>
    %118 = arith.divf %116, %117 : vector<2x32xf32>
    %119 = vector.extract_strided_slice %87 {offsets = [0, 32], sizes = [2, 32], strides = [1, 1]} : vector<2x128xf32> to vector<2x32xf32>
    %120 = arith.negf %119 : vector<2x32xf32>
    %121 = math.exp %120 : vector<2x32xf32>
    %cst_29 = arith.constant 1.000000e+00 : f32
    %122 = vector.broadcast %cst_29 : f32 to vector<2x32xf32>
    %123 = arith.addf %122, %121 : vector<2x32xf32>
    %124 = arith.divf %122, %123 : vector<2x32xf32>
    %125 = vector.extract_strided_slice %87 {offsets = [0, 64], sizes = [2, 32], strides = [1, 1]} : vector<2x128xf32> to vector<2x32xf32>
    %126 = math.tanh %125 : vector<2x32xf32>
    %127 = vector.extract_strided_slice %87 {offsets = [0, 96], sizes = [2, 32], strides = [1, 1]} : vector<2x128xf32> to vector<2x32xf32>
    %128 = arith.negf %127 : vector<2x32xf32>
    %129 = math.exp %128 : vector<2x32xf32>
    %cst_30 = arith.constant 1.000000e+00 : f32
    %130 = vector.broadcast %cst_30 : f32 to vector<2x32xf32>
    %131 = arith.addf %130, %129 : vector<2x32xf32>
    %132 = arith.divf %130, %131 : vector<2x32xf32>
    %133 = arith.mulf %124, %62 : vector<2x32xf32>
    %134 = arith.mulf %118, %126 : vector<2x32xf32>
    %135 = arith.addf %133, %134 : vector<2x32xf32>
    %136 = math.tanh %135 : vector<2x32xf32>
    %137 = arith.mulf %132, %136 : vector<2x32xf32>
    %138 = arith.index_cast %c1_i32 : i32 to index
    %c0_31 = arith.constant 0 : index
    %c0_32 = arith.constant 0 : index
    %139 = vector.load %arg4[%138, %c0_31, %c0_32] : memref<8x2x64xf32, #tpu.memory_space<vmem>>, vector<1x2x32xf32>
    %140 = vector.shape_cast %139 : vector<1x2x32xf32> to vector<2x32xf32>
    %141 = vector.shape_cast %112 : vector<2x32xf32> to vector<1x2x32xf32>
    tpu.vector_store %arg4[%138, %c0_31, %c0_32], %141 {strides = array<i32>} : memref<8x2x64xf32, #tpu.memory_space<vmem>>, vector<1x2x32xf32>,
    %c7_i32_33 = arith.constant 7 : i32
    %142 = arith.subi %c7_i32_33, %c1_i32 : i32
    %143 = arith.index_cast %142 : i32 to index
    %c0_34 = arith.constant 0 : index
    %c32_35 = arith.constant 32 : index
    %144 = vector.load %arg4[%143, %c0_34, %c32_35] : memref<8x2x64xf32, #tpu.memory_space<vmem>>, vector<1x2x32xf32>
    %145 = vector.shape_cast %144 : vector<1x2x32xf32> to vector<2x32xf32>
    %146 = vector.shape_cast %137 : vector<2x32xf32> to vector<1x2x32xf32>
    tpu.vector_store %arg4[%143, %c0_34, %c32_35], %146 {strides = array<i32>} : memref<8x2x64xf32, #tpu.memory_space<vmem>>, vector<1x2x32xf32>,
    %147 = tpu.concatenate %112, %137 in 1 : vector<2x32xf32>, vector<2x32xf32> -> vector<2x64xf32>
    %c2_i32 = arith.constant 2 : i32
    %c0_36 = arith.constant 0 : index
    %c0_37 = arith.constant 0 : index
    %148 = vector.load %arg3[%c0_36, %c0_37] : memref<64x256xf32, #tpu.memory_space<vmem>>, vector<64x256xf32>
    %cst_38 = arith.constant dense<0.000000e+00> : vector<2x256xf32>
    %149 = tpu.matmul %147, %148, %cst_38 {dimension_numbers = #tpu.dot_dimension_numbers<[1], [0], [0], [1], [0, 0, 1, 1], [], []>} : vector<2x64xf32>, vector<64x256xf32>, vector<2x256xf32> -> vector<2x256xf32>
    %150 = arith.index_cast %c2_i32 : i32 to index
    %c0_39 = arith.constant 0 : index
    %c0_40 = arith.constant 0 : index
    %151 = vector.load %arg1[%150, %c0_39, %c0_40] : memref<8x2x128xf32, #tpu.memory_space<vmem>>, vector<1x2x128xf32>
    %152 = vector.shape_cast %151 : vector<1x2x128xf32> to vector<2x128xf32>
    %153 = vector.extract_strided_slice %149 {offsets = [0, 0], sizes = [2, 128], strides = [1, 1]} : vector<2x256xf32> to vector<2x128xf32>
    %154 = arith.addf %152, %153 : vector<2x128xf32>
    %c7_i32_41 = arith.constant 7 : i32
    %155 = arith.subi %c7_i32_41, %c2_i32 : i32
    %156 = arith.index_cast %155 : i32 to index
    %c0_42 = arith.constant 0 : index
    %c0_43 = arith.constant 0 : index
    %157 = vector.load %arg2[%156, %c0_42, %c0_43] : memref<8x2x128xf32, #tpu.memory_space<vmem>>, vector<1x2x128xf32>
    %158 = vector.shape_cast %157 : vector<1x2x128xf32> to vector<2x128xf32>
    %159 = vector.extract_strided_slice %149 {offsets = [0, 128], sizes = [2, 128], strides = [1, 1]} : vector<2x256xf32> to vector<2x128xf32>
    %160 = arith.addf %158, %159 : vector<2x128xf32>
    %161 = vector.extract_strided_slice %154 {offsets = [0, 0], sizes = [2, 32], strides = [1, 1]} : vector<2x128xf32> to vector<2x32xf32>
    %162 = arith.negf %161 : vector<2x32xf32>
    %163 = math.exp %162 : vector<2x32xf32>
    %cst_44 = arith.constant 1.000000e+00 : f32
    %164 = vector.broadcast %cst_44 : f32 to vector<2x32xf32>
    %165 = arith.addf %164, %163 : vector<2x32xf32>
    %166 = arith.divf %164, %165 : vector<2x32xf32>
    %167 = vector.extract_strided_slice %154 {offsets = [0, 32], sizes = [2, 32], strides = [1, 1]} : vector<2x128xf32> to vector<2x32xf32>
    %168 = arith.negf %167 : vector<2x32xf32>
    %169 = math.exp %168 : vector<2x32xf32>
    %cst_45 = arith.constant 1.000000e+00 : f32
    %170 = vector.broadcast %cst_45 : f32 to vector<2x32xf32>
    %171 = arith.addf %170, %169 : vector<2x32xf32>
    %172 = arith.divf %170, %171 : vector<2x32xf32>
    %173 = vector.extract_strided_slice %154 {offsets = [0, 64], sizes = [2, 32], strides = [1, 1]} : vector<2x128xf32> to vector<2x32xf32>
    %174 = math.tanh %173 : vector<2x32xf32>
    %175 = vector.extract_strided_slice %154 {offsets = [0, 96], sizes = [2, 32], strides = [1, 1]} : vector<2x128xf32> to vector<2x32xf32>
    %176 = arith.negf %175 : vector<2x32xf32>
    %177 = math.exp %176 : vector<2x32xf32>
    %cst_46 = arith.constant 1.000000e+00 : f32
    %178 = vector.broadcast %cst_46 : f32 to vector<2x32xf32>
    %179 = arith.addf %178, %177 : vector<2x32xf32>
    %180 = arith.divf %178, %179 : vector<2x32xf32>
    %181 = arith.mulf %172, %110 : vector<2x32xf32>
    %182 = arith.mulf %166, %174 : vector<2x32xf32>
    %183 = arith.addf %181, %182 : vector<2x32xf32>
    %184 = math.tanh %183 : vector<2x32xf32>
    %185 = arith.mulf %180, %184 : vector<2x32xf32>
    %186 = vector.extract_strided_slice %160 {offsets = [0, 0], sizes = [2, 32], strides = [1, 1]} : vector<2x128xf32> to vector<2x32xf32>
    %187 = arith.negf %186 : vector<2x32xf32>
    %188 = math.exp %187 : vector<2x32xf32>
    %cst_47 = arith.constant 1.000000e+00 : f32
    %189 = vector.broadcast %cst_47 : f32 to vector<2x32xf32>
    %190 = arith.addf %189, %188 : vector<2x32xf32>
    %191 = arith.divf %189, %190 : vector<2x32xf32>
    %192 = vector.extract_strided_slice %160 {offsets = [0, 32], sizes = [2, 32], strides = [1, 1]} : vector<2x128xf32> to vector<2x32xf32>
    %193 = arith.negf %192 : vector<2x32xf32>
    %194 = math.exp %193 : vector<2x32xf32>
    %cst_48 = arith.constant 1.000000e+00 : f32
    %195 = vector.broadcast %cst_48 : f32 to vector<2x32xf32>
    %196 = arith.addf %195, %194 : vector<2x32xf32>
    %197 = arith.divf %195, %196 : vector<2x32xf32>
    %198 = vector.extract_strided_slice %160 {offsets = [0, 64], sizes = [2, 32], strides = [1, 1]} : vector<2x128xf32> to vector<2x32xf32>
    %199 = math.tanh %198 : vector<2x32xf32>
    %200 = vector.extract_strided_slice %160 {offsets = [0, 96], sizes = [2, 32], strides = [1, 1]} : vector<2x128xf32> to vector<2x32xf32>
    %201 = arith.negf %200 : vector<2x32xf32>
    %202 = math.exp %201 : vector<2x32xf32>
    %cst_49 = arith.constant 1.000000e+00 : f32
    %203 = vector.broadcast %cst_49 : f32 to vector<2x32xf32>
    %204 = arith.addf %203, %202 : vector<2x32xf32>
    %205 = arith.divf %203, %204 : vector<2x32xf32>
    %206 = arith.mulf %197, %135 : vector<2x32xf32>
    %207 = arith.mulf %191, %199 : vector<2x32xf32>
    %208 = arith.addf %206, %207 : vector<2x32xf32>
    %209 = math.tanh %208 : vector<2x32xf32>
    %210 = arith.mulf %205, %209 : vector<2x32xf32>
    %211 = arith.index_cast %c2_i32 : i32 to index
    %c0_50 = arith.constant 0 : index
    %c0_51 = arith.constant 0 : index
    %212 = vector.load %arg4[%211, %c0_50, %c0_51] : memref<8x2x64xf32, #tpu.memory_space<vmem>>, vector<1x2x32xf32>
    %213 = vector.shape_cast %212 : vector<1x2x32xf32> to vector<2x32xf32>
    %214 = vector.shape_cast %185 : vector<2x32xf32> to vector<1x2x32xf32>
    tpu.vector_store %arg4[%211, %c0_50, %c0_51], %214 {strides = array<i32>} : memref<8x2x64xf32, #tpu.memory_space<vmem>>, vector<1x2x32xf32>,
    %c7_i32_52 = arith.constant 7 : i32
    %215 = arith.subi %c7_i32_52, %c2_i32 : i32
    %216 = arith.index_cast %215 : i32 to index
    %c0_53 = arith.constant 0 : index
    %c32_54 = arith.constant 32 : index
    %217 = vector.load %arg4[%216, %c0_53, %c32_54] : memref<8x2x64xf32, #tpu.memory_space<vmem>>, vector<1x2x32xf32>
    %218 = vector.shape_cast %217 : vector<1x2x32xf32> to vector<2x32xf32>
    %219 = vector.shape_cast %210 : vector<2x32xf32> to vector<1x2x32xf32>
    tpu.vector_store %arg4[%216, %c0_53, %c32_54], %219 {strides = array<i32>} : memref<8x2x64xf32, #tpu.memory_space<vmem>>, vector<1x2x32xf32>,
    %220 = tpu.concatenate %185, %210 in 1 : vector<2x32xf32>, vector<2x32xf32> -> vector<2x64xf32>
    %c3_i32 = arith.constant 3 : i32
    %c0_55 = arith.constant 0 : index
    %c0_56 = arith.constant 0 : index
    %221 = vector.load %arg3[%c0_55, %c0_56] : memref<64x256xf32, #tpu.memory_space<vmem>>, vector<64x256xf32>
    %cst_57 = arith.constant dense<0.000000e+00> : vector<2x256xf32>
    %222 = tpu.matmul %220, %221, %cst_57 {dimension_numbers = #tpu.dot_dimension_numbers<[1], [0], [0], [1], [0, 0, 1, 1], [], []>} : vector<2x64xf32>, vector<64x256xf32>, vector<2x256xf32> -> vector<2x256xf32>
    %223 = arith.index_cast %c3_i32 : i32 to index
    %c0_58 = arith.constant 0 : index
    %c0_59 = arith.constant 0 : index
    %224 = vector.load %arg1[%223, %c0_58, %c0_59] : memref<8x2x128xf32, #tpu.memory_space<vmem>>, vector<1x2x128xf32>
    %225 = vector.shape_cast %224 : vector<1x2x128xf32> to vector<2x128xf32>
    %226 = vector.extract_strided_slice %222 {offsets = [0, 0], sizes = [2, 128], strides = [1, 1]} : vector<2x256xf32> to vector<2x128xf32>
    %227 = arith.addf %225, %226 : vector<2x128xf32>
    %c7_i32_60 = arith.constant 7 : i32
    %228 = arith.subi %c7_i32_60, %c3_i32 : i32
    %229 = arith.index_cast %228 : i32 to index
    %c0_61 = arith.constant 0 : index
    %c0_62 = arith.constant 0 : index
    %230 = vector.load %arg2[%229, %c0_61, %c0_62] : memref<8x2x128xf32, #tpu.memory_space<vmem>>, vector<1x2x128xf32>
    %231 = vector.shape_cast %230 : vector<1x2x128xf32> to vector<2x128xf32>
    %232 = vector.extract_strided_slice %222 {offsets = [0, 128], sizes = [2, 128], strides = [1, 1]} : vector<2x256xf32> to vector<2x128xf32>
    %233 = arith.addf %231, %232 : vector<2x128xf32>
    %234 = vector.extract_strided_slice %227 {offsets = [0, 0], sizes = [2, 32], strides = [1, 1]} : vector<2x128xf32> to vector<2x32xf32>
    %235 = arith.negf %234 : vector<2x32xf32>
    %236 = math.exp %235 : vector<2x32xf32>
    %cst_63 = arith.constant 1.000000e+00 : f32
    %237 = vector.broadcast %cst_63 : f32 to vector<2x32xf32>
    %238 = arith.addf %237, %236 : vector<2x32xf32>
    %239 = arith.divf %237, %238 : vector<2x32xf32>
    %240 = vector.extract_strided_slice %227 {offsets = [0, 32], sizes = [2, 32], strides = [1, 1]} : vector<2x128xf32> to vector<2x32xf32>
    %241 = arith.negf %240 : vector<2x32xf32>
    %242 = math.exp %241 : vector<2x32xf32>
    %cst_64 = arith.constant 1.000000e+00 : f32
    %243 = vector.broadcast %cst_64 : f32 to vector<2x32xf32>
    %244 = arith.addf %243, %242 : vector<2x32xf32>
    %245 = arith.divf %243, %244 : vector<2x32xf32>
    %246 = vector.extract_strided_slice %227 {offsets = [0, 64], sizes = [2, 32], strides = [1, 1]} : vector<2x128xf32> to vector<2x32xf32>
    %247 = math.tanh %246 : vector<2x32xf32>
    %248 = vector.extract_strided_slice %227 {offsets = [0, 96], sizes = [2, 32], strides = [1, 1]} : vector<2x128xf32> to vector<2x32xf32>
    %249 = arith.negf %248 : vector<2x32xf32>
    %250 = math.exp %249 : vector<2x32xf32>
    %cst_65 = arith.constant 1.000000e+00 : f32
    %251 = vector.broadcast %cst_65 : f32 to vector<2x32xf32>
    %252 = arith.addf %251, %250 : vector<2x32xf32>
    %253 = arith.divf %251, %252 : vector<2x32xf32>
    %254 = arith.mulf %245, %183 : vector<2x32xf32>
    %255 = arith.mulf %239, %247 : vector<2x32xf32>
    %256 = arith.addf %254, %255 : vector<2x32xf32>
    %257 = math.tanh %256 : vector<2x32xf32>
    %258 = arith.mulf %253, %257 : vector<2x32xf32>
    %259 = vector.extract_strided_slice %233 {offsets = [0, 0], sizes = [2, 32], strides = [1, 1]} : vector<2x128xf32> to vector<2x32xf32>
    %260 = arith.negf %259 : vector<2x32xf32>
    %261 = math.exp %260 : vector<2x32xf32>
    %cst_66 = arith.constant 1.000000e+00 : f32
    %262 = vector.broadcast %cst_66 : f32 to vector<2x32xf32>
    %263 = arith.addf %262, %261 : vector<2x32xf32>
    %264 = arith.divf %262, %263 : vector<2x32xf32>
    %265 = vector.extract_strided_slice %233 {offsets = [0, 32], sizes = [2, 32], strides = [1, 1]} : vector<2x128xf32> to vector<2x32xf32>
    %266 = arith.negf %265 : vector<2x32xf32>
    %267 = math.exp %266 : vector<2x32xf32>
    %cst_67 = arith.constant 1.000000e+00 : f32
    %268 = vector.broadcast %cst_67 : f32 to vector<2x32xf32>
    %269 = arith.addf %268, %267 : vector<2x32xf32>
    %270 = arith.divf %268, %269 : vector<2x32xf32>
    %271 = vector.extract_strided_slice %233 {offsets = [0, 64], sizes = [2, 32], strides = [1, 1]} : vector<2x128xf32> to vector<2x32xf32>
    %272 = math.tanh %271 : vector<2x32xf32>
    %273 = vector.extract_strided_slice %233 {offsets = [0, 96], sizes = [2, 32], strides = [1, 1]} : vector<2x128xf32> to vector<2x32xf32>
    %274 = arith.negf %273 : vector<2x32xf32>
    %275 = math.exp %274 : vector<2x32xf32>
    %cst_68 = arith.constant 1.000000e+00 : f32
    %276 = vector.broadcast %cst_68 : f32 to vector<2x32xf32>
    %277 = arith.addf %276, %275 : vector<2x32xf32>
    %278 = arith.divf %276, %277 : vector<2x32xf32>
    %279 = arith.mulf %270, %208 : vector<2x32xf32>
    %280 = arith.mulf %264, %272 : vector<2x32xf32>
    %281 = arith.addf %279, %280 : vector<2x32xf32>
    %282 = math.tanh %281 : vector<2x32xf32>
    %283 = arith.mulf %278, %282 : vector<2x32xf32>
    %284 = arith.index_cast %c3_i32 : i32 to index
    %c0_69 = arith.constant 0 : index
    %c0_70 = arith.constant 0 : index
    %285 = vector.load %arg4[%284, %c0_69, %c0_70] : memref<8x2x64xf32, #tpu.memory_space<vmem>>, vector<1x2x32xf32>
    %286 = vector.shape_cast %285 : vector<1x2x32xf32> to vector<2x32xf32>
    %287 = vector.shape_cast %258 : vector<2x32xf32> to vector<1x2x32xf32>
    tpu.vector_store %arg4[%284, %c0_69, %c0_70], %287 {strides = array<i32>} : memref<8x2x64xf32, #tpu.memory_space<vmem>>, vector<1x2x32xf32>,
    %c7_i32_71 = arith.constant 7 : i32
    %288 = arith.subi %c7_i32_71, %c3_i32 : i32
    %289 = arith.index_cast %288 : i32 to index
    %c0_72 = arith.constant 0 : index
    %c32_73 = arith.constant 32 : index
    %290 = vector.load %arg4[%289, %c0_72, %c32_73] : memref<8x2x64xf32, #tpu.memory_space<vmem>>, vector<1x2x32xf32>
    %291 = vector.shape_cast %290 : vector<1x2x32xf32> to vector<2x32xf32>
    %292 = vector.shape_cast %283 : vector<2x32xf32> to vector<1x2x32xf32>
    tpu.vector_store %arg4[%289, %c0_72, %c32_73], %292 {strides = array<i32>} : memref<8x2x64xf32, #tpu.memory_space<vmem>>, vector<1x2x32xf32>,
    %293 = tpu.concatenate %258, %283 in 1 : vector<2x32xf32>, vector<2x32xf32> -> vector<2x64xf32>
    %c4_i32 = arith.constant 4 : i32
    %c0_74 = arith.constant 0 : index
    %c0_75 = arith.constant 0 : index
    %294 = vector.load %arg3[%c0_74, %c0_75] : memref<64x256xf32, #tpu.memory_space<vmem>>, vector<64x256xf32>
    %cst_76 = arith.constant dense<0.000000e+00> : vector<2x256xf32>
    %295 = tpu.matmul %293, %294, %cst_76 {dimension_numbers = #tpu.dot_dimension_numbers<[1], [0], [0], [1], [0, 0, 1, 1], [], []>} : vector<2x64xf32>, vector<64x256xf32>, vector<2x256xf32> -> vector<2x256xf32>
    %296 = arith.index_cast %c4_i32 : i32 to index
    %c0_77 = arith.constant 0 : index
    %c0_78 = arith.constant 0 : index
    %297 = vector.load %arg1[%296, %c0_77, %c0_78] : memref<8x2x128xf32, #tpu.memory_space<vmem>>, vector<1x2x128xf32>
    %298 = vector.shape_cast %297 : vector<1x2x128xf32> to vector<2x128xf32>
    %299 = vector.extract_strided_slice %295 {offsets = [0, 0], sizes = [2, 128], strides = [1, 1]} : vector<2x256xf32> to vector<2x128xf32>
    %300 = arith.addf %298, %299 : vector<2x128xf32>
    %c7_i32_79 = arith.constant 7 : i32
    %301 = arith.subi %c7_i32_79, %c4_i32 : i32
    %302 = arith.index_cast %301 : i32 to index
    %c0_80 = arith.constant 0 : index
    %c0_81 = arith.constant 0 : index
    %303 = vector.load %arg2[%302, %c0_80, %c0_81] : memref<8x2x128xf32, #tpu.memory_space<vmem>>, vector<1x2x128xf32>
    %304 = vector.shape_cast %303 : vector<1x2x128xf32> to vector<2x128xf32>
    %305 = vector.extract_strided_slice %295 {offsets = [0, 128], sizes = [2, 128], strides = [1, 1]} : vector<2x256xf32> to vector<2x128xf32>
    %306 = arith.addf %304, %305 : vector<2x128xf32>
    %307 = vector.extract_strided_slice %300 {offsets = [0, 0], sizes = [2, 32], strides = [1, 1]} : vector<2x128xf32> to vector<2x32xf32>
    %308 = arith.negf %307 : vector<2x32xf32>
    %309 = math.exp %308 : vector<2x32xf32>
    %cst_82 = arith.constant 1.000000e+00 : f32
    %310 = vector.broadcast %cst_82 : f32 to vector<2x32xf32>
    %311 = arith.addf %310, %309 : vector<2x32xf32>
    %312 = arith.divf %310, %311 : vector<2x32xf32>
    %313 = vector.extract_strided_slice %300 {offsets = [0, 32], sizes = [2, 32], strides = [1, 1]} : vector<2x128xf32> to vector<2x32xf32>
    %314 = arith.negf %313 : vector<2x32xf32>
    %315 = math.exp %314 : vector<2x32xf32>
    %cst_83 = arith.constant 1.000000e+00 : f32
    %316 = vector.broadcast %cst_83 : f32 to vector<2x32xf32>
    %317 = arith.addf %316, %315 : vector<2x32xf32>
    %318 = arith.divf %316, %317 : vector<2x32xf32>
    %319 = vector.extract_strided_slice %300 {offsets = [0, 64], sizes = [2, 32], strides = [1, 1]} : vector<2x128xf32> to vector<2x32xf32>
    %320 = math.tanh %319 : vector<2x32xf32>
    %321 = vector.extract_strided_slice %300 {offsets = [0, 96], sizes = [2, 32], strides = [1, 1]} : vector<2x128xf32> to vector<2x32xf32>
    %322 = arith.negf %321 : vector<2x32xf32>
    %323 = math.exp %322 : vector<2x32xf32>
    %cst_84 = arith.constant 1.000000e+00 : f32
    %324 = vector.broadcast %cst_84 : f32 to vector<2x32xf32>
    %325 = arith.addf %324, %323 : vector<2x32xf32>
    %326 = arith.divf %324, %325 : vector<2x32xf32>
    %327 = arith.mulf %318, %256 : vector<2x32xf32>
    %328 = arith.mulf %312, %320 : vector<2x32xf32>
    %329 = arith.addf %327, %328 : vector<2x32xf32>
    %330 = math.tanh %329 : vector<2x32xf32>
    %331 = arith.mulf %326, %330 : vector<2x32xf32>
    %332 = vector.extract_strided_slice %306 {offsets = [0, 0], sizes = [2, 32], strides = [1, 1]} : vector<2x128xf32> to vector<2x32xf32>
    %333 = arith.negf %332 : vector<2x32xf32>
    %334 = math.exp %333 : vector<2x32xf32>
    %cst_85 = arith.constant 1.000000e+00 : f32
    %335 = vector.broadcast %cst_85 : f32 to vector<2x32xf32>
    %336 = arith.addf %335, %334 : vector<2x32xf32>
    %337 = arith.divf %335, %336 : vector<2x32xf32>
    %338 = vector.extract_strided_slice %306 {offsets = [0, 32], sizes = [2, 32], strides = [1, 1]} : vector<2x128xf32> to vector<2x32xf32>
    %339 = arith.negf %338 : vector<2x32xf32>
    %340 = math.exp %339 : vector<2x32xf32>
    %cst_86 = arith.constant 1.000000e+00 : f32
    %341 = vector.broadcast %cst_86 : f32 to vector<2x32xf32>
    %342 = arith.addf %341, %340 : vector<2x32xf32>
    %343 = arith.divf %341, %342 : vector<2x32xf32>
    %344 = vector.extract_strided_slice %306 {offsets = [0, 64], sizes = [2, 32], strides = [1, 1]} : vector<2x128xf32> to vector<2x32xf32>
    %345 = math.tanh %344 : vector<2x32xf32>
    %346 = vector.extract_strided_slice %306 {offsets = [0, 96], sizes = [2, 32], strides = [1, 1]} : vector<2x128xf32> to vector<2x32xf32>
    %347 = arith.negf %346 : vector<2x32xf32>
    %348 = math.exp %347 : vector<2x32xf32>
    %cst_87 = arith.constant 1.000000e+00 : f32
    %349 = vector.broadcast %cst_87 : f32 to vector<2x32xf32>
    %350 = arith.addf %349, %348 : vector<2x32xf32>
    %351 = arith.divf %349, %350 : vector<2x32xf32>
    %352 = arith.mulf %343, %281 : vector<2x32xf32>
    %353 = arith.mulf %337, %345 : vector<2x32xf32>
    %354 = arith.addf %352, %353 : vector<2x32xf32>
    %355 = math.tanh %354 : vector<2x32xf32>
    %356 = arith.mulf %351, %355 : vector<2x32xf32>
    %357 = arith.index_cast %c4_i32 : i32 to index
    %c0_88 = arith.constant 0 : index
    %c0_89 = arith.constant 0 : index
    %358 = vector.load %arg4[%357, %c0_88, %c0_89] : memref<8x2x64xf32, #tpu.memory_space<vmem>>, vector<1x2x32xf32>
    %359 = vector.shape_cast %358 : vector<1x2x32xf32> to vector<2x32xf32>
    %360 = vector.shape_cast %331 : vector<2x32xf32> to vector<1x2x32xf32>
    tpu.vector_store %arg4[%357, %c0_88, %c0_89], %360 {strides = array<i32>} : memref<8x2x64xf32, #tpu.memory_space<vmem>>, vector<1x2x32xf32>,
    %c7_i32_90 = arith.constant 7 : i32
    %361 = arith.subi %c7_i32_90, %c4_i32 : i32
    %362 = arith.index_cast %361 : i32 to index
    %c0_91 = arith.constant 0 : index
    %c32_92 = arith.constant 32 : index
    %363 = vector.load %arg4[%362, %c0_91, %c32_92] : memref<8x2x64xf32, #tpu.memory_space<vmem>>, vector<1x2x32xf32>
    %364 = vector.shape_cast %363 : vector<1x2x32xf32> to vector<2x32xf32>
    %365 = vector.shape_cast %356 : vector<2x32xf32> to vector<1x2x32xf32>
    tpu.vector_store %arg4[%362, %c0_91, %c32_92], %365 {strides = array<i32>} : memref<8x2x64xf32, #tpu.memory_space<vmem>>, vector<1x2x32xf32>,
    %366 = tpu.concatenate %331, %356 in 1 : vector<2x32xf32>, vector<2x32xf32> -> vector<2x64xf32>
    %c5_i32 = arith.constant 5 : i32
    %c0_93 = arith.constant 0 : index
    %c0_94 = arith.constant 0 : index
    %367 = vector.load %arg3[%c0_93, %c0_94] : memref<64x256xf32, #tpu.memory_space<vmem>>, vector<64x256xf32>
    %cst_95 = arith.constant dense<0.000000e+00> : vector<2x256xf32>
    %368 = tpu.matmul %366, %367, %cst_95 {dimension_numbers = #tpu.dot_dimension_numbers<[1], [0], [0], [1], [0, 0, 1, 1], [], []>} : vector<2x64xf32>, vector<64x256xf32>, vector<2x256xf32> -> vector<2x256xf32>
    %369 = arith.index_cast %c5_i32 : i32 to index
    %c0_96 = arith.constant 0 : index
    %c0_97 = arith.constant 0 : index
    %370 = vector.load %arg1[%369, %c0_96, %c0_97] : memref<8x2x128xf32, #tpu.memory_space<vmem>>, vector<1x2x128xf32>
    %371 = vector.shape_cast %370 : vector<1x2x128xf32> to vector<2x128xf32>
    %372 = vector.extract_strided_slice %368 {offsets = [0, 0], sizes = [2, 128], strides = [1, 1]} : vector<2x256xf32> to vector<2x128xf32>
    %373 = arith.addf %371, %372 : vector<2x128xf32>
    %c7_i32_98 = arith.constant 7 : i32
    %374 = arith.subi %c7_i32_98, %c5_i32 : i32
    %375 = arith.index_cast %374 : i32 to index
    %c0_99 = arith.constant 0 : index
    %c0_100 = arith.constant 0 : index
    %376 = vector.load %arg2[%375, %c0_99, %c0_100] : memref<8x2x128xf32, #tpu.memory_space<vmem>>, vector<1x2x128xf32>
    %377 = vector.shape_cast %376 : vector<1x2x128xf32> to vector<2x128xf32>
    %378 = vector.extract_strided_slice %368 {offsets = [0, 128], sizes = [2, 128], strides = [1, 1]} : vector<2x256xf32> to vector<2x128xf32>
    %379 = arith.addf %377, %378 : vector<2x128xf32>
    %380 = vector.extract_strided_slice %373 {offsets = [0, 0], sizes = [2, 32], strides = [1, 1]} : vector<2x128xf32> to vector<2x32xf32>
    %381 = arith.negf %380 : vector<2x32xf32>
    %382 = math.exp %381 : vector<2x32xf32>
    %cst_101 = arith.constant 1.000000e+00 : f32
    %383 = vector.broadcast %cst_101 : f32 to vector<2x32xf32>
    %384 = arith.addf %383, %382 : vector<2x32xf32>
    %385 = arith.divf %383, %384 : vector<2x32xf32>
    %386 = vector.extract_strided_slice %373 {offsets = [0, 32], sizes = [2, 32], strides = [1, 1]} : vector<2x128xf32> to vector<2x32xf32>
    %387 = arith.negf %386 : vector<2x32xf32>
    %388 = math.exp %387 : vector<2x32xf32>
    %cst_102 = arith.constant 1.000000e+00 : f32
    %389 = vector.broadcast %cst_102 : f32 to vector<2x32xf32>
    %390 = arith.addf %389, %388 : vector<2x32xf32>
    %391 = arith.divf %389, %390 : vector<2x32xf32>
    %392 = vector.extract_strided_slice %373 {offsets = [0, 64], sizes = [2, 32], strides = [1, 1]} : vector<2x128xf32> to vector<2x32xf32>
    %393 = math.tanh %392 : vector<2x32xf32>
    %394 = vector.extract_strided_slice %373 {offsets = [0, 96], sizes = [2, 32], strides = [1, 1]} : vector<2x128xf32> to vector<2x32xf32>
    %395 = arith.negf %394 : vector<2x32xf32>
    %396 = math.exp %395 : vector<2x32xf32>
    %cst_103 = arith.constant 1.000000e+00 : f32
    %397 = vector.broadcast %cst_103 : f32 to vector<2x32xf32>
    %398 = arith.addf %397, %396 : vector<2x32xf32>
    %399 = arith.divf %397, %398 : vector<2x32xf32>
    %400 = arith.mulf %391, %329 : vector<2x32xf32>
    %401 = arith.mulf %385, %393 : vector<2x32xf32>
    %402 = arith.addf %400, %401 : vector<2x32xf32>
    %403 = math.tanh %402 : vector<2x32xf32>
    %404 = arith.mulf %399, %403 : vector<2x32xf32>
    %405 = vector.extract_strided_slice %379 {offsets = [0, 0], sizes = [2, 32], strides = [1, 1]} : vector<2x128xf32> to vector<2x32xf32>
    %406 = arith.negf %405 : vector<2x32xf32>
    %407 = math.exp %406 : vector<2x32xf32>
    %cst_104 = arith.constant 1.000000e+00 : f32
    %408 = vector.broadcast %cst_104 : f32 to vector<2x32xf32>
    %409 = arith.addf %408, %407 : vector<2x32xf32>
    %410 = arith.divf %408, %409 : vector<2x32xf32>
    %411 = vector.extract_strided_slice %379 {offsets = [0, 32], sizes = [2, 32], strides = [1, 1]} : vector<2x128xf32> to vector<2x32xf32>
    %412 = arith.negf %411 : vector<2x32xf32>
    %413 = math.exp %412 : vector<2x32xf32>
    %cst_105 = arith.constant 1.000000e+00 : f32
    %414 = vector.broadcast %cst_105 : f32 to vector<2x32xf32>
    %415 = arith.addf %414, %413 : vector<2x32xf32>
    %416 = arith.divf %414, %415 : vector<2x32xf32>
    %417 = vector.extract_strided_slice %379 {offsets = [0, 64], sizes = [2, 32], strides = [1, 1]} : vector<2x128xf32> to vector<2x32xf32>
    %418 = math.tanh %417 : vector<2x32xf32>
    %419 = vector.extract_strided_slice %379 {offsets = [0, 96], sizes = [2, 32], strides = [1, 1]} : vector<2x128xf32> to vector<2x32xf32>
    %420 = arith.negf %419 : vector<2x32xf32>
    %421 = math.exp %420 : vector<2x32xf32>
    %cst_106 = arith.constant 1.000000e+00 : f32
    %422 = vector.broadcast %cst_106 : f32 to vector<2x32xf32>
    %423 = arith.addf %422, %421 : vector<2x32xf32>
    %424 = arith.divf %422, %423 : vector<2x32xf32>
    %425 = arith.mulf %416, %354 : vector<2x32xf32>
    %426 = arith.mulf %410, %418 : vector<2x32xf32>
    %427 = arith.addf %425, %426 : vector<2x32xf32>
    %428 = math.tanh %427 : vector<2x32xf32>
    %429 = arith.mulf %424, %428 : vector<2x32xf32>
    %430 = arith.index_cast %c5_i32 : i32 to index
    %c0_107 = arith.constant 0 : index
    %c0_108 = arith.constant 0 : index
    %431 = vector.load %arg4[%430, %c0_107, %c0_108] : memref<8x2x64xf32, #tpu.memory_space<vmem>>, vector<1x2x32xf32>
    %432 = vector.shape_cast %431 : vector<1x2x32xf32> to vector<2x32xf32>
    %433 = vector.shape_cast %404 : vector<2x32xf32> to vector<1x2x32xf32>
    tpu.vector_store %arg4[%430, %c0_107, %c0_108], %433 {strides = array<i32>} : memref<8x2x64xf32, #tpu.memory_space<vmem>>, vector<1x2x32xf32>,
    %c7_i32_109 = arith.constant 7 : i32
    %434 = arith.subi %c7_i32_109, %c5_i32 : i32
    %435 = arith.index_cast %434 : i32 to index
    %c0_110 = arith.constant 0 : index
    %c32_111 = arith.constant 32 : index
    %436 = vector.load %arg4[%435, %c0_110, %c32_111] : memref<8x2x64xf32, #tpu.memory_space<vmem>>, vector<1x2x32xf32>
    %437 = vector.shape_cast %436 : vector<1x2x32xf32> to vector<2x32xf32>
    %438 = vector.shape_cast %429 : vector<2x32xf32> to vector<1x2x32xf32>
    tpu.vector_store %arg4[%435, %c0_110, %c32_111], %438 {strides = array<i32>} : memref<8x2x64xf32, #tpu.memory_space<vmem>>, vector<1x2x32xf32>,
    %439 = tpu.concatenate %404, %429 in 1 : vector<2x32xf32>, vector<2x32xf32> -> vector<2x64xf32>
    %c6_i32 = arith.constant 6 : i32
    %c0_112 = arith.constant 0 : index
    %c0_113 = arith.constant 0 : index
    %440 = vector.load %arg3[%c0_112, %c0_113] : memref<64x256xf32, #tpu.memory_space<vmem>>, vector<64x256xf32>
    %cst_114 = arith.constant dense<0.000000e+00> : vector<2x256xf32>
    %441 = tpu.matmul %439, %440, %cst_114 {dimension_numbers = #tpu.dot_dimension_numbers<[1], [0], [0], [1], [0, 0, 1, 1], [], []>} : vector<2x64xf32>, vector<64x256xf32>, vector<2x256xf32> -> vector<2x256xf32>
    %442 = arith.index_cast %c6_i32 : i32 to index
    %c0_115 = arith.constant 0 : index
    %c0_116 = arith.constant 0 : index
    %443 = vector.load %arg1[%442, %c0_115, %c0_116] : memref<8x2x128xf32, #tpu.memory_space<vmem>>, vector<1x2x128xf32>
    %444 = vector.shape_cast %443 : vector<1x2x128xf32> to vector<2x128xf32>
    %445 = vector.extract_strided_slice %441 {offsets = [0, 0], sizes = [2, 128], strides = [1, 1]} : vector<2x256xf32> to vector<2x128xf32>
    %446 = arith.addf %444, %445 : vector<2x128xf32>
    %c7_i32_117 = arith.constant 7 : i32
    %447 = arith.subi %c7_i32_117, %c6_i32 : i32
    %448 = arith.index_cast %447 : i32 to index
    %c0_118 = arith.constant 0 : index
    %c0_119 = arith.constant 0 : index
    %449 = vector.load %arg2[%448, %c0_118, %c0_119] : memref<8x2x128xf32, #tpu.memory_space<vmem>>, vector<1x2x128xf32>
    %450 = vector.shape_cast %449 : vector<1x2x128xf32> to vector<2x128xf32>
    %451 = vector.extract_strided_slice %441 {offsets = [0, 128], sizes = [2, 128], strides = [1, 1]} : vector<2x256xf32> to vector<2x128xf32>
    %452 = arith.addf %450, %451 : vector<2x128xf32>
    %453 = vector.extract_strided_slice %446 {offsets = [0, 0], sizes = [2, 32], strides = [1, 1]} : vector<2x128xf32> to vector<2x32xf32>
    %454 = arith.negf %453 : vector<2x32xf32>
    %455 = math.exp %454 : vector<2x32xf32>
    %cst_120 = arith.constant 1.000000e+00 : f32
    %456 = vector.broadcast %cst_120 : f32 to vector<2x32xf32>
    %457 = arith.addf %456, %455 : vector<2x32xf32>
    %458 = arith.divf %456, %457 : vector<2x32xf32>
    %459 = vector.extract_strided_slice %446 {offsets = [0, 32], sizes = [2, 32], strides = [1, 1]} : vector<2x128xf32> to vector<2x32xf32>
    %460 = arith.negf %459 : vector<2x32xf32>
    %461 = math.exp %460 : vector<2x32xf32>
    %cst_121 = arith.constant 1.000000e+00 : f32
    %462 = vector.broadcast %cst_121 : f32 to vector<2x32xf32>
    %463 = arith.addf %462, %461 : vector<2x32xf32>
    %464 = arith.divf %462, %463 : vector<2x32xf32>
    %465 = vector.extract_strided_slice %446 {offsets = [0, 64], sizes = [2, 32], strides = [1, 1]} : vector<2x128xf32> to vector<2x32xf32>
    %466 = math.tanh %465 : vector<2x32xf32>
    %467 = vector.extract_strided_slice %446 {offsets = [0, 96], sizes = [2, 32], strides = [1, 1]} : vector<2x128xf32> to vector<2x32xf32>
    %468 = arith.negf %467 : vector<2x32xf32>
    %469 = math.exp %468 : vector<2x32xf32>
    %cst_122 = arith.constant 1.000000e+00 : f32
    %470 = vector.broadcast %cst_122 : f32 to vector<2x32xf32>
    %471 = arith.addf %470, %469 : vector<2x32xf32>
    %472 = arith.divf %470, %471 : vector<2x32xf32>
    %473 = arith.mulf %464, %402 : vector<2x32xf32>
    %474 = arith.mulf %458, %466 : vector<2x32xf32>
    %475 = arith.addf %473, %474 : vector<2x32xf32>
    %476 = math.tanh %475 : vector<2x32xf32>
    %477 = arith.mulf %472, %476 : vector<2x32xf32>
    %478 = vector.extract_strided_slice %452 {offsets = [0, 0], sizes = [2, 32], strides = [1, 1]} : vector<2x128xf32> to vector<2x32xf32>
    %479 = arith.negf %478 : vector<2x32xf32>
    %480 = math.exp %479 : vector<2x32xf32>
    %cst_123 = arith.constant 1.000000e+00 : f32
    %481 = vector.broadcast %cst_123 : f32 to vector<2x32xf32>
    %482 = arith.addf %481, %480 : vector<2x32xf32>
    %483 = arith.divf %481, %482 : vector<2x32xf32>
    %484 = vector.extract_strided_slice %452 {offsets = [0, 32], sizes = [2, 32], strides = [1, 1]} : vector<2x128xf32> to vector<2x32xf32>
    %485 = arith.negf %484 : vector<2x32xf32>
    %486 = math.exp %485 : vector<2x32xf32>
    %cst_124 = arith.constant 1.000000e+00 : f32
    %487 = vector.broadcast %cst_124 : f32 to vector<2x32xf32>
    %488 = arith.addf %487, %486 : vector<2x32xf32>
    %489 = arith.divf %487, %488 : vector<2x32xf32>
    %490 = vector.extract_strided_slice %452 {offsets = [0, 64], sizes = [2, 32], strides = [1, 1]} : vector<2x128xf32> to vector<2x32xf32>
    %491 = math.tanh %490 : vector<2x32xf32>
    %492 = vector.extract_strided_slice %452 {offsets = [0, 96], sizes = [2, 32], strides = [1, 1]} : vector<2x128xf32> to vector<2x32xf32>
    %493 = arith.negf %492 : vector<2x32xf32>
    %494 = math.exp %493 : vector<2x32xf32>
    %cst_125 = arith.constant 1.000000e+00 : f32
    %495 = vector.broadcast %cst_125 : f32 to vector<2x32xf32>
    %496 = arith.addf %495, %494 : vector<2x32xf32>
    %497 = arith.divf %495, %496 : vector<2x32xf32>
    %498 = arith.mulf %489, %427 : vector<2x32xf32>
    %499 = arith.mulf %483, %491 : vector<2x32xf32>
    %500 = arith.addf %498, %499 : vector<2x32xf32>
    %501 = math.tanh %500 : vector<2x32xf32>
    %502 = arith.mulf %497, %501 : vector<2x32xf32>
    %503 = arith.index_cast %c6_i32 : i32 to index
    %c0_126 = arith.constant 0 : index
    %c0_127 = arith.constant 0 : index
    %504 = vector.load %arg4[%503, %c0_126, %c0_127] : memref<8x2x64xf32, #tpu.memory_space<vmem>>, vector<1x2x32xf32>
    %505 = vector.shape_cast %504 : vector<1x2x32xf32> to vector<2x32xf32>
    %506 = vector.shape_cast %477 : vector<2x32xf32> to vector<1x2x32xf32>
    tpu.vector_store %arg4[%503, %c0_126, %c0_127], %506 {strides = array<i32>} : memref<8x2x64xf32, #tpu.memory_space<vmem>>, vector<1x2x32xf32>,
    %c7_i32_128 = arith.constant 7 : i32
    %507 = arith.subi %c7_i32_128, %c6_i32 : i32
    %508 = arith.index_cast %507 : i32 to index
    %c0_129 = arith.constant 0 : index
    %c32_130 = arith.constant 32 : index
    %509 = vector.load %arg4[%508, %c0_129, %c32_130] : memref<8x2x64xf32, #tpu.memory_space<vmem>>, vector<1x2x32xf32>
    %510 = vector.shape_cast %509 : vector<1x2x32xf32> to vector<2x32xf32>
    %511 = vector.shape_cast %502 : vector<2x32xf32> to vector<1x2x32xf32>
    tpu.vector_store %arg4[%508, %c0_129, %c32_130], %511 {strides = array<i32>} : memref<8x2x64xf32, #tpu.memory_space<vmem>>, vector<1x2x32xf32>,
    %512 = tpu.concatenate %477, %502 in 1 : vector<2x32xf32>, vector<2x32xf32> -> vector<2x64xf32>
    %c7_i32_131 = arith.constant 7 : i32
    %c0_132 = arith.constant 0 : index
    %c0_133 = arith.constant 0 : index
    %513 = vector.load %arg3[%c0_132, %c0_133] : memref<64x256xf32, #tpu.memory_space<vmem>>, vector<64x256xf32>
    %cst_134 = arith.constant dense<0.000000e+00> : vector<2x256xf32>
    %514 = tpu.matmul %512, %513, %cst_134 {dimension_numbers = #tpu.dot_dimension_numbers<[1], [0], [0], [1], [0, 0, 1, 1], [], []>} : vector<2x64xf32>, vector<64x256xf32>, vector<2x256xf32> -> vector<2x256xf32>
    %515 = arith.index_cast %c7_i32_131 : i32 to index
    %c0_135 = arith.constant 0 : index
    %c0_136 = arith.constant 0 : index
    %516 = vector.load %arg1[%515, %c0_135, %c0_136] : memref<8x2x128xf32, #tpu.memory_space<vmem>>, vector<1x2x128xf32>
    %517 = vector.shape_cast %516 : vector<1x2x128xf32> to vector<2x128xf32>
    %518 = vector.extract_strided_slice %514 {offsets = [0, 0], sizes = [2, 128], strides = [1, 1]} : vector<2x256xf32> to vector<2x128xf32>
    %519 = arith.addf %517, %518 : vector<2x128xf32>
    %c7_i32_137 = arith.constant 7 : i32
    %520 = arith.subi %c7_i32_137, %c7_i32_131 : i32
    %521 = arith.index_cast %520 : i32 to index
    %c0_138 = arith.constant 0 : index
    %c0_139 = arith.constant 0 : index
    %522 = vector.load %arg2[%521, %c0_138, %c0_139] : memref<8x2x128xf32, #tpu.memory_space<vmem>>, vector<1x2x128xf32>
    %523 = vector.shape_cast %522 : vector<1x2x128xf32> to vector<2x128xf32>
    %524 = vector.extract_strided_slice %514 {offsets = [0, 128], sizes = [2, 128], strides = [1, 1]} : vector<2x256xf32> to vector<2x128xf32>
    %525 = arith.addf %523, %524 : vector<2x128xf32>
    %526 = vector.extract_strided_slice %519 {offsets = [0, 0], sizes = [2, 32], strides = [1, 1]} : vector<2x128xf32> to vector<2x32xf32>
    %527 = arith.negf %526 : vector<2x32xf32>
    %528 = math.exp %527 : vector<2x32xf32>
    %cst_140 = arith.constant 1.000000e+00 : f32
    %529 = vector.broadcast %cst_140 : f32 to vector<2x32xf32>
    %530 = arith.addf %529, %528 : vector<2x32xf32>
    %531 = arith.divf %529, %530 : vector<2x32xf32>
    %532 = vector.extract_strided_slice %519 {offsets = [0, 32], sizes = [2, 32], strides = [1, 1]} : vector<2x128xf32> to vector<2x32xf32>
    %533 = arith.negf %532 : vector<2x32xf32>
    %534 = math.exp %533 : vector<2x32xf32>
    %cst_141 = arith.constant 1.000000e+00 : f32
    %535 = vector.broadcast %cst_141 : f32 to vector<2x32xf32>
    %536 = arith.addf %535, %534 : vector<2x32xf32>
    %537 = arith.divf %535, %536 : vector<2x32xf32>
    %538 = vector.extract_strided_slice %519 {offsets = [0, 64], sizes = [2, 32], strides = [1, 1]} : vector<2x128xf32> to vector<2x32xf32>
    %539 = math.tanh %538 : vector<2x32xf32>
    %540 = vector.extract_strided_slice %519 {offsets = [0, 96], sizes = [2, 32], strides = [1, 1]} : vector<2x128xf32> to vector<2x32xf32>
    %541 = arith.negf %540 : vector<2x32xf32>
    %542 = math.exp %541 : vector<2x32xf32>
    %cst_142 = arith.constant 1.000000e+00 : f32
    %543 = vector.broadcast %cst_142 : f32 to vector<2x32xf32>
    %544 = arith.addf %543, %542 : vector<2x32xf32>
    %545 = arith.divf %543, %544 : vector<2x32xf32>
    %546 = arith.mulf %537, %475 : vector<2x32xf32>
    %547 = arith.mulf %531, %539 : vector<2x32xf32>
    %548 = arith.addf %546, %547 : vector<2x32xf32>
    %549 = math.tanh %548 : vector<2x32xf32>
    %550 = arith.mulf %545, %549 : vector<2x32xf32>
    %551 = vector.extract_strided_slice %525 {offsets = [0, 0], sizes = [2, 32], strides = [1, 1]} : vector<2x128xf32> to vector<2x32xf32>
    %552 = arith.negf %551 : vector<2x32xf32>
    %553 = math.exp %552 : vector<2x32xf32>
    %cst_143 = arith.constant 1.000000e+00 : f32
    %554 = vector.broadcast %cst_143 : f32 to vector<2x32xf32>
    %555 = arith.addf %554, %553 : vector<2x32xf32>
    %556 = arith.divf %554, %555 : vector<2x32xf32>
    %557 = vector.extract_strided_slice %525 {offsets = [0, 32], sizes = [2, 32], strides = [1, 1]} : vector<2x128xf32> to vector<2x32xf32>
    %558 = arith.negf %557 : vector<2x32xf32>
    %559 = math.exp %558 : vector<2x32xf32>
    %cst_144 = arith.constant 1.000000e+00 : f32
    %560 = vector.broadcast %cst_144 : f32 to vector<2x32xf32>
    %561 = arith.addf %560, %559 : vector<2x32xf32>
    %562 = arith.divf %560, %561 : vector<2x32xf32>
    %563 = vector.extract_strided_slice %525 {offsets = [0, 64], sizes = [2, 32], strides = [1, 1]} : vector<2x128xf32> to vector<2x32xf32>
    %564 = math.tanh %563 : vector<2x32xf32>
    %565 = vector.extract_strided_slice %525 {offsets = [0, 96], sizes = [2, 32], strides = [1, 1]} : vector<2x128xf32> to vector<2x32xf32>
    %566 = arith.negf %565 : vector<2x32xf32>
    %567 = math.exp %566 : vector<2x32xf32>
    %cst_145 = arith.constant 1.000000e+00 : f32
    %568 = vector.broadcast %cst_145 : f32 to vector<2x32xf32>
    %569 = arith.addf %568, %567 : vector<2x32xf32>
    %570 = arith.divf %568, %569 : vector<2x32xf32>
    %571 = arith.mulf %562, %500 : vector<2x32xf32>
    %572 = arith.mulf %556, %564 : vector<2x32xf32>
    %573 = arith.addf %571, %572 : vector<2x32xf32>
    %574 = math.tanh %573 : vector<2x32xf32>
    %575 = arith.mulf %570, %574 : vector<2x32xf32>
    %576 = arith.index_cast %c7_i32_131 : i32 to index
    %c0_146 = arith.constant 0 : index
    %c0_147 = arith.constant 0 : index
    %577 = vector.load %arg4[%576, %c0_146, %c0_147] : memref<8x2x64xf32, #tpu.memory_space<vmem>>, vector<1x2x32xf32>
    %578 = vector.shape_cast %577 : vector<1x2x32xf32> to vector<2x32xf32>
    %579 = vector.shape_cast %550 : vector<2x32xf32> to vector<1x2x32xf32>
    tpu.vector_store %arg4[%576, %c0_146, %c0_147], %579 {strides = array<i32>} : memref<8x2x64xf32, #tpu.memory_space<vmem>>, vector<1x2x32xf32>,
    %c7_i32_148 = arith.constant 7 : i32
    %580 = arith.subi %c7_i32_148, %c7_i32_131 : i32
    %581 = arith.index_cast %580 : i32 to index
    %c0_149 = arith.constant 0 : index
    %c32_150 = arith.constant 32 : index
    %582 = vector.load %arg4[%581, %c0_149, %c32_150] : memref<8x2x64xf32, #tpu.memory_space<vmem>>, vector<1x2x32xf32>
    %583 = vector.shape_cast %582 : vector<1x2x32xf32> to vector<2x32xf32>
    %584 = vector.shape_cast %575 : vector<2x32xf32> to vector<1x2x32xf32>
    tpu.vector_store %arg4[%581, %c0_149, %c32_150], %584 {strides = array<i32>} : memref<8x2x64xf32, #tpu.memory_space<vmem>>, vector<1x2x32xf32>,
    %585 = tpu.concatenate %550, %575 in 1 : vector<2x32xf32>, vector<2x32xf32> -> vector<2x64xf32>
    %c8_i32 = arith.constant 8 : i32
    return
  }
  func.func @transform_0(%arg0: i32) -> (i32, i32, i32) {
    %c0_i32 = arith.constant 0 : i32
    %c0_i32_0 = arith.constant 0 : i32
    %c0_i32_1 = arith.constant 0 : i32
    %c0_i32_2 = arith.constant 0 : i32
    return %c0_i32, %c0_i32_0, %c0_i32_1 : i32, i32, i32
  }
  func.func @transform_1(%arg0: i32) -> (i32, i32, i32) {
    %c0_i32 = arith.constant 0 : i32
    %c0_i32_0 = arith.constant 0 : i32
    %c0_i32_1 = arith.constant 0 : i32
    %c0_i32_2 = arith.constant 0 : i32
    return %c0_i32, %c0_i32_0, %c0_i32_1 : i32, i32, i32
  }
  func.func @transform_2(%arg0: i32) -> (i32, i32) {
    %c0_i32 = arith.constant 0 : i32
    %c0_i32_0 = arith.constant 0 : i32
    %c0_i32_1 = arith.constant 0 : i32
    return %c0_i32, %c0_i32_0 : i32, i32
  }
  func.func @transform_3(%arg0: i32) -> (i32, i32, i32) {
    %c0_i32 = arith.constant 0 : i32
    %c0_i32_0 = arith.constant 0 : i32
    %c0_i32_1 = arith.constant 0 : i32
    %c0_i32_2 = arith.constant 0 : i32
    return %c0_i32, %c0_i32_0, %c0_i32_1 : i32, i32, i32
  }
}

</mosaic_0001>

<bundles_post_ra>
// kernel: lstm_pooling_classifier_forward.3
= control target key start
LH: loop header
LB: loop body
LE: loop exit
PB: predicated region body
PF: predicated region fallthrough
CT: control target
= control target key end

     0   :  { %v1445_v3 = vmov 0.0   ;;  %s1446_s28 = smov 64   ;;  %s1447_s29 = smov 32   ;;  %vm174_vm0 = vcmask 261120   ;;  %vm38_vm1 = vcmask 523264   ;;  %vm1448_vm2 = vmmov 0   ;;  %s1927_s2 = inlined_call_operand.vmem [shape: f32[64,256], index: 2, kind: input, shape index: {}]   ;;  %s1928_s0 = inlined_call_operand.vmem [shape: f32[8,2,128], index: 0, kind: input, shape index: {}]   ;;  %s1929_s1 = inlined_call_operand.vmem [shape: f32[8,2,128], index: 1, kind: input, shape index: {}]   ;;  %s1930_s3 = inlined_call_operand.vmem [shape: f32[64,1], index: 3, kind: input, shape index: {}]   ;;  %s1931_s4 = inlined_call_operand.<no memory space> [shape: f32[1,1], index: 4, kind: input, shape index: {}]   ;;  %s1932_s5 = inlined_call_operand.vmem [shape: f32[2,1], index: 5, kind: output, shape index: {}]  }
   0x1   :  { %v1482_v0 = vld [vmem:[%s1927_s2 + $0x78] sm:$0xff]  ;;  %v1487_v1 = vld [vmem:[%s1927_s2 + $0x70] sm:$0xff]  ;;  %v1492_v2 = vld [vmem:[%s1927_s2 + $0x68] sm:$0xff]  ;;  %106 = vmatprep.mubr.f32.mxu0 %v1445_v3  ;;  %243 = vmatprep.mubr.f32.mxu1 %v1445_v3  ;;  %vm1235_vm3 = vcmask 1024  }
   0x2   :  { %58 = vmatprep.subr.mxu0 %v1482_v0  ;;  %v1500_v4 = vld [vmem:[%s1927_s2 + $0x60] sm:$0xff]  ;;  %195 = vmatprep.subr.mxu1 %v1482_v0  ;;  %v1507_v5 = vld [vmem:[%s1927_s2 + $0x58] sm:$0xff]  ;;  %v1514_v6 = vld [vmem:[%s1927_s2 + $0x50] sm:$0xff] }
   0x3   :  { %59 = vmatpush1.msra.mxu0 %v1487_v1  ;;  %196 = vmatpush1.msra.mxu1 %v1487_v1  ;;  %v1521_v7 = vld [vmem:[%s1927_s2 + $0x48] sm:$0xff]  ;;  %v1528_v8 = vld [vmem:[%s1927_s2 + $0x40] sm:$0xff]  ;;  %v1535_v9 = vld [vmem:[%s1927_s2 + $0x38] sm:$0xff] }
   0x4   :  { %60 = vmatprep.subr.mxu0 %v1492_v2  ;;  %197 = vmatprep.subr.mxu1 %v1492_v2  ;;  %v1542_v10 = vld [vmem:[%s1927_s2 + $0x30] sm:$0xff]  ;;  %v1549_v11 = vld [vmem:[%s1927_s2 + $0x28] sm:$0xff]  ;;  %v1556_v12 = vld [vmem:[%s1927_s2 + $0x20] sm:$0xff] }
   0x5   :  { %61 = vmatpush1.msra.mxu0 %v1500_v4  ;;  %198 = vmatpush1.msra.mxu1 %v1500_v4  ;;  %v1563_v13 = vld [vmem:[%s1927_s2 + $0x18] sm:$0xff]  ;;  %v1570_v14 = vld [vmem:[%s1927_s2 + $0x10] sm:$0xff]  ;;  %v1577_v15 = vld [vmem:[%s1927_s2 + $0x8] sm:$0xff] }
   0x6   :  { %62 = vmatprep.subr.mxu0 %v1507_v5  ;;  %199 = vmatprep.subr.mxu1 %v1507_v5  ;;  %v1584_v16 = vld [vmem:[%s1927_s2] sm:$0xff]  ;;  %v1241_v19 = vld [vmem:[%s1929_s1 + $0xe] sm:$0x3]  ;;  %v1246_v54 = vld [vmem:[%s1929_s1 + $0xc] sm:$0x3] }
   0x7   :  { %63 = vmatpush1.msra.mxu0 %v1514_v6  ;;  %200 = vmatpush1.msra.mxu1 %v1514_v6  ;;  %v113_v17 = vld [vmem:[%s1928_s0] sm:$0x3]  ;;  %v1245_v52 = vld [vmem:[%s1928_s0 + $0x2] sm:$0x3] }
   0x8   :  { %64 = vmatprep.subr.mxu0 %v1521_v7  ;;  %201 = vmatprep.subr.mxu1 %v1521_v7 }
   0x9   :  { %65 = vmatpush1.msra.mxu0 %v1528_v8  ;;  %202 = vmatpush1.msra.mxu1 %v1528_v8 }
   0xa   :  { %66 = vmatprep.subr.mxu0 %v1535_v9  ;;  %203 = vmatprep.subr.mxu1 %v1535_v9 }
   0xb   :  { %67 = vmatpush1.msra.mxu0 %v1542_v10  ;;  %204 = vmatpush1.msra.mxu1 %v1542_v10 }
   0xc   :  { %68 = vmatprep.subr.mxu0 %v1549_v11  ;;  %205 = vmatprep.subr.mxu1 %v1549_v11 }
   0xd   :  { %69 = vmatpush1.msra.mxu0 %v1556_v12  ;;  %206 = vmatpush1.msra.mxu1 %v1556_v12 }
   0xe   :  { %70 = vmatprep.subr.mxu0 %v1563_v13  ;;  %207 = vmatprep.subr.mxu1 %v1563_v13 }
   0xf   :  { %71 = vmatpush1.msra.mxu0 %v1570_v14  ;;  %208 = vmatpush1.msra.mxu1 %v1570_v14 }
  0x10   :  { %72 = vmatprep.subr.mxu0 %v1577_v15  ;;  %209 = vmatprep.subr.mxu1 %v1577_v15 }
  0x11   :  { %73 = vmatpush1.msra.mxu0 %v1584_v16  ;;  %210 = vmatpush1.msra.mxu1 %v1584_v16 }
  0x12   :  { %107 = vmatmul.mubr.f32.vlgmr.msra.gmra.mxu0 %v1445_v3  ;;  %333 = vmatprep.subr.mxu0 %v1482_v0 }
  0x13   :  { %334 = vmatpush1.msra.mxu0 %v1487_v1  ;;  %381 = vmatprep.mubr.f32.mxu0 %v1445_v3 }
  0x14   :  { %335 = vmatprep.subr.mxu0 %v1492_v2  ;;  %471 = vmatprep.subr.mxu1 %v1482_v0 }
  0x15   :  { %336 = vmatpush1.msra.mxu0 %v1500_v4 }
  0x16   :  { %337 = vmatprep.subr.mxu0 %v1507_v5 }
  0x17   :  { %338 = vmatpush1.msra.mxu0 %v1514_v6 }
  0x18   :  { %339 = vmatprep.subr.mxu0 %v1521_v7 }
  0x19   :  { %340 = vmatpush1.msra.mxu0 %v1528_v8 }
  0x1a   :  { %341 = vmatprep.subr.mxu0 %v1535_v9 }
  0x1b   :  { %342 = vmatpush1.msra.mxu0 %v1542_v10 }
  0x1c   :  { %343 = vmatprep.subr.mxu0 %v1549_v11 }
  0x1d   :  { %344 = vmatpush1.msra.mxu0 %v1556_v12 }
  0x1e   :  { %345 = vmatprep.subr.mxu0 %v1563_v13 }
  0x1f   :  { %346 = vmatpush1.msra.mxu0 %v1570_v14 }
  0x20   :  { %347 = vmatprep.subr.mxu0 %v1577_v15 }
  0x21   :  { %348 = vmatpush1.msra.mxu0 %v1584_v16 }
  0x22   :  { %609 = vmatprep.subr.mxu0 %v1482_v0 }
  0xd2   :  { %v108_v18 = vpop.f32.mrf.mxu0 }
  0xd3   :  { %v114_v20 = vadd.f32 %v113_v17, %v108_v18 }
  0xd4   :  { %v110_v21 = vpop.f32.mrf.mxu0 }
  0xd5   :  { %1313 = vtanh.f32 %v114_v20  ;;  %v117_v22 = vadd.f32 %v1241_v19, %v110_v21  ;;  %v1242_v25 = vmul.f32 -1.442695, %v114_v20 }
  0xd7   :  { %1315 = vtanh.f32 %v117_v22  ;;  %v1243_v26 = vmul.f32 -1.442695, %v117_v22 }
  0xd8   :  { %1317 = vpow2.f32 %v1242_v25 }
  0xd9   :  { %1319 = vpow2.f32 %v1243_v26 }
  0xe2   :  { %v1314_v23 = vpop.eup %1313 }
  0xe3   :  { %127 = vrot.lane.b32.xlu0 %v1314_v23, %s1446_s28 }
  0xe4   :  { %v1316_v24 = vpop.eup %1315 }
  0xe5   :  { %v1318_v27 = vpop.eup %1317 }
  0xe6   :  { %v121_v28 = vadd.f32 1.0, %v1318_v27  ;;  %v1320_v29 = vpop.eup %1319 }
  0xe7   :  { %151 = vrot.lane.b32.xlu0 %v1316_v24, %s1446_s28  ;;  %v145_v30 = vadd.f32 1.0, %v1320_v29 }
  0xe8   :  { %1321 = vrcp.f32 %v121_v28 }
  0xe9   :  { %1323 = vrcp.f32 %v145_v30 }
  0xf5   :  { %v1322_v31 = vpop.eup %1321 }
  0xf6   :  { %v1324_v34 = vpop.eup %1323  ;;  %v125_v37 = vmul.f32 0.0, %v1322_v31 }
  0xf7   :  { %v149_v40 = vmul.f32 0.0, %v1324_v34 }
 0x155   :  { %v128_v32 = vpop.permute.xlu0 %127 }
 0x156   :  { %v130_v33 = vmul.f32 %v1322_v31, %v128_v32 }
 0x158   :  { %132 = vrot.lane.b32.xlu1 %v130_v33, %s1447_s29 }
 0x159   :  { %v152_v35 = vpop.permute.xlu0 %151 }
 0x15a   :  { %v154_v36 = vmul.f32 %v1324_v34, %v152_v35 }
 0x15c   :  { %156 = vrot.lane.b32.xlu1 %v154_v36, %s1447_s29 }
 0x1ca   :  { %v133_v38 = vpop.permute.xlu1 %132 }
 0x1cb   :  { %v1623_v39 = vadd.f32 %v133_v38, %v125_v37 }
 0x1cd   :  { %1325 = vtanh.f32 %v1623_v39 }
 0x1ce   :  { %v157_v41 = vpop.permute.xlu1 %156 }
 0x1cf   :  { %v1626_v42 = vadd.f32 %v157_v41, %v149_v40  ;;  %v1250_v40 = vld [vmem:[%s1928_s0 + $0x4] sm:$0x3] }
 0x1d1   :  { %1327 = vtanh.f32 %v1626_v42 }
 0x1da   :  { %v1326_v43 = vpop.eup %1325 }
 0x1db   :  { %138 = vrot.lane.b32.xlu0 %v1326_v43, %s1446_s28 }
 0x1de   :  { %v1328_v44 = vpop.eup %1327 }
 0x1df   :  { %162 = vrot.lane.b32.xlu1 %v1328_v44, %s1446_s28 }
 0x24d   :  { %v139_v45 = vpop.permute.xlu0 %138 }
 0x24e   :  { %v141_v46 = vmul.f32 %v1322_v31, %v139_v45 }
 0x250   :  { %167 = vrot.lane.b32.xlu0 %v141_v46, %s1447_s29 }
 0x251   :  { %v163_v47 = vpop.permute.xlu1 %162 }
 0x252   :  { %v165_v48 = vmul.f32 %v1324_v34, %v163_v47 }
 0x254   :  { %171 = vrot.lane.b32.xlu1 %v165_v48, %s1446_s28 }
 0x2c2   :  { %v168_v49 = vpop.permute.xlu0 %167 }
 0x2c6   :  { %v172_v50 = vpop.permute.xlu1 %171 }
 0x2c7   :  { %v1634_v51 = vsel %vm174_vm0, %v168_v49, %v172_v50 }
 0x2c8   :  { %1244 = vmatmul.mubr.msk.f32.vlgmr.msra.gmra.mxu1 %vm38_vm1, %v1634_v51 }
 0x2c9   :  { %472 = vmatpush1.msra.mxu1 %v1487_v1  ;;  %519 = vmatprep.mubr.f32.mxu1 %v1445_v3 }
 0x2ca   :  { %473 = vmatprep.subr.mxu1 %v1492_v2 }
 0x2cb   :  { %474 = vmatpush1.msra.mxu1 %v1500_v4 }
 0x2cc   :  { %475 = vmatprep.subr.mxu1 %v1507_v5 }
 0x2cd   :  { %476 = vmatpush1.msra.mxu1 %v1514_v6 }
 0x2ce   :  { %477 = vmatprep.subr.mxu1 %v1521_v7 }
 0x2cf   :  { %478 = vmatpush1.msra.mxu1 %v1528_v8 }
 0x2d0   :  { %479 = vmatprep.subr.mxu1 %v1535_v9 }
 0x2d1   :  { %480 = vmatpush1.msra.mxu1 %v1542_v10 }
 0x2d2   :  { %481 = vmatprep.subr.mxu1 %v1549_v11 }
 0x2d3   :  { %482 = vmatpush1.msra.mxu1 %v1556_v12 }
 0x2d4   :  { %483 = vmatprep.subr.mxu1 %v1563_v13 }
 0x2d5   :  { %484 = vmatpush1.msra.mxu1 %v1570_v14 }
 0x2d6   :  { %485 = vmatprep.subr.mxu1 %v1577_v15 }
 0x2d7   :  { %486 = vmatpush1.msra.mxu1 %v1584_v16 }
 0x2d8   :  { %747 = vmatprep.subr.mxu1 %v1482_v0 }
 0x388   :  { %v245_v53 = vpop.f32.mrf.mxu1 }
 0x389   :  { %v252_v55 = vadd.f32 %v1245_v52, %v245_v53 }
 0x38a   :  { %v247_v56 = vpop.f32.mrf.mxu1 }
 0x38b   :  { %1329 = vtanh.f32 %v252_v55  ;;  %v255_v57 = vadd.f32 %v1246_v54, %v247_v56  ;;  %v1247_v60 = vmul.f32 -1.442695, %v252_v55 }
 0x38d   :  { %1331 = vtanh.f32 %v255_v57  ;;  %v1248_v61 = vmul.f32 -1.442695, %v255_v57 }
 0x38e   :  { %1333 = vpow2.f32 %v1247_v60 }
 0x38f   :  { %1335 = vpow2.f32 %v1248_v61 }
 0x398   :  { %v1330_v58 = vpop.eup %1329 }
 0x399   :  { %265 = vrot.lane.b32.xlu0 %v1330_v58, %s1446_s28 }
 0x39a   :  { %v1332_v59 = vpop.eup %1331 }
 0x39b   :  { %289 = vrot.lane.b32.xlu1 %v1332_v59, %s1446_s28  ;;  %v1334_v62 = vpop.eup %1333 }
 0x39c   :  { %v1336_v63 = vpop.eup %1335  ;;  %v259_v17 = vadd.f32 1.0, %v1334_v62 }
 0x39d   :  { %v283_v18 = vadd.f32 1.0, %v1336_v63 }
 0x39e   :  { %1337 = vrcp.f32 %v259_v17 }
 0x39f   :  { %1339 = vrcp.f32 %v283_v18 }
 0x3ab   :  { %v1338_v19 = vpop.eup %1337 }
 0x3ac   :  { %v1340_v22 = vpop.eup %1339  ;;  %v263_v25 = vmul.f32 %v1338_v19, %v1623_v39 }
 0x3ad   :  { %v287_v28 = vmul.f32 %v1340_v22, %v1626_v42  ;;  %v1251_v42 = vld [vmem:[%s1929_s1 + $0xa] sm:$0x3] }
 0x40b   :  { %v266_v20 = vpop.permute.xlu0 %265 }
 0x40c   :  { %v268_v21 = vmul.f32 %v1338_v19, %v266_v20 }
 0x40d   :  { %v290_v23 = vpop.permute.xlu1 %289 }
 0x40e   :  { %270 = vrot.lane.b32.xlu0 %v268_v21, %s1447_s29  ;;  %v292_v24 = vmul.f32 %v1340_v22, %v290_v23 }
 0x410   :  { %294 = vrot.lane.b32.xlu1 %v292_v24, %s1447_s29 }
 0x480   :  { %v271_v26 = vpop.permute.xlu0 %270 }
 0x481   :  { %v1666_v27 = vadd.f32 %v271_v26, %v263_v25 }
 0x482   :  { %v295_v29 = vpop.permute.xlu1 %294 }
 0x483   :  { %1341 = vtanh.f32 %v1666_v27  ;;  %v1670_v30 = vadd.f32 %v295_v29, %v287_v28 }
 0x485   :  { %1343 = vtanh.f32 %v1670_v30 }
 0x490   :  { %v1342_v31 = vpop.eup %1341 }
 0x491   :  { %276 = vrot.lane.b32.xlu0 %v1342_v31, %s1446_s28 }
 0x492   :  { %v1344_v32 = vpop.eup %1343 }
 0x493   :  { %300 = vrot.lane.b32.xlu1 %v1344_v32, %s1446_s28  ;;  %v1256_v32 = vld [vmem:[%s1929_s1 + $0x8] sm:$0x3] }
 0x503   :  { %v277_v33 = vpop.permute.xlu0 %276 }
 0x504   :  { %v279_v34 = vmul.f32 %v1338_v19, %v277_v33 }
 0x505   :  { %v301_v35 = vpop.permute.xlu1 %300 }
 0x506   :  { %305 = vrot.lane.b32.xlu0 %v279_v34, %s1447_s29  ;;  %v303_v36 = vmul.f32 %v1340_v22, %v301_v35 }
 0x508   :  { %309 = vrot.lane.b32.xlu1 %v303_v36, %s1446_s28 }
 0x578   :  { %v306_v37 = vpop.permute.xlu0 %305 }
 0x57a   :  { %v310_v38 = vpop.permute.xlu1 %309 }
 0x57b   :  { %v1678_v39 = vsel %vm174_vm0, %v306_v37, %v310_v38 }
 0x57c   :  { %1249 = vmatmul.mubr.msk.f32.vlgmr.msra.gmra.mxu0 %vm38_vm1, %v1678_v39  ;;  %v313_v26 = vmax.f32 %v1634_v51, %v1678_v39  ;;  %v1255_v51 = vld [vmem:[%s1928_s0 + $0x6] sm:$0x3] }
 0x57d   :  { %610 = vmatpush1.msra.mxu0 %v1487_v1  ;;  %657 = vmatprep.mubr.f32.mxu0 %v1445_v3 }
 0x57e   :  { %611 = vmatprep.subr.mxu0 %v1492_v2 }
 0x57f   :  { %612 = vmatpush1.msra.mxu0 %v1500_v4 }
 0x580   :  { %613 = vmatprep.subr.mxu0 %v1507_v5 }
 0x581   :  { %614 = vmatpush1.msra.mxu0 %v1514_v6 }
 0x582   :  { %615 = vmatprep.subr.mxu0 %v1521_v7 }
 0x583   :  { %616 = vmatpush1.msra.mxu0 %v1528_v8 }
 0x584   :  { %617 = vmatprep.subr.mxu0 %v1535_v9 }
 0x585   :  { %618 = vmatpush1.msra.mxu0 %v1542_v10 }
 0x586   :  { %619 = vmatprep.subr.mxu0 %v1549_v11 }
 0x587   :  { %620 = vmatpush1.msra.mxu0 %v1556_v12 }
 0x588   :  { %621 = vmatprep.subr.mxu0 %v1563_v13 }
 0x589   :  { %622 = vmatpush1.msra.mxu0 %v1570_v14 }
 0x58a   :  { %623 = vmatprep.subr.mxu0 %v1577_v15 }
 0x58b   :  { %624 = vmatpush1.msra.mxu0 %v1584_v16 }
 0x58c   :  { %885 = vmatprep.subr.mxu0 %v1482_v0 }
 0x63c   :  { %v383_v41 = vpop.f32.mrf.mxu0 }
 0x63d   :  { %v390_v43 = vadd.f32 %v1250_v40, %v383_v41 }
 0x63e   :  { %v385_v44 = vpop.f32.mrf.mxu0 }
 0x63f   :  { %1345 = vtanh.f32 %v390_v43  ;;  %v393_v45 = vadd.f32 %v1251_v42, %v385_v44  ;;  %v1252_v48 = vmul.f32 -1.442695, %v390_v43 }
 0x641   :  { %1347 = vtanh.f32 %v393_v45  ;;  %v1253_v49 = vmul.f32 -1.442695, %v393_v45 }
 0x642   :  { %1349 = vpow2.f32 %v1252_v48 }
 0x643   :  { %1351 = vpow2.f32 %v1253_v49 }
 0x64c   :  { %v1346_v46 = vpop.eup %1345 }
 0x64d   :  { %403 = vrot.lane.b32.xlu0 %v1346_v46, %s1446_s28 }
 0x64e   :  { %v1348_v47 = vpop.eup %1347 }
 0x64f   :  { %427 = vrot.lane.b32.xlu1 %v1348_v47, %s1446_s28  ;;  %v1350_v50 = vpop.eup %1349 }
 0x650   :  { %v1352_v52 = vpop.eup %1351  ;;  %v397_v53 = vadd.f32 1.0, %v1350_v50 }
 0x651   :  { %v421_v54 = vadd.f32 1.0, %v1352_v52 }
 0x652   :  { %1353 = vrcp.f32 %v397_v53 }
 0x653   :  { %1355 = vrcp.f32 %v421_v54 }
 0x65f   :  { %v1354_v55 = vpop.eup %1353 }
 0x660   :  { %v1356_v58 = vpop.eup %1355  ;;  %v401_v61 = vmul.f32 %v1354_v55, %v1666_v27 }
 0x661   :  { %v425_v17 = vmul.f32 %v1356_v58, %v1670_v30 }
 0x6bf   :  { %v404_v56 = vpop.permute.xlu0 %403 }
 0x6c0   :  { %v406_v57 = vmul.f32 %v1354_v55, %v404_v56 }
 0x6c1   :  { %v428_v59 = vpop.permute.xlu1 %427 }
 0x6c2   :  { %408 = vrot.lane.b32.xlu0 %v406_v57, %s1447_s29  ;;  %v430_v60 = vmul.f32 %v1356_v58, %v428_v59 }
 0x6c4   :  { %432 = vrot.lane.b32.xlu1 %v430_v60, %s1447_s29 }
 0x734   :  { %v409_v62 = vpop.permute.xlu0 %408 }
 0x735   :  { %v1710_v63 = vadd.f32 %v409_v62, %v401_v61 }
 0x736   :  { %v433_v18 = vpop.permute.xlu1 %432 }
 0x737   :  { %1357 = vtanh.f32 %v1710_v63  ;;  %v1714_v19 = vadd.f32 %v433_v18, %v425_v17 }
 0x739   :  { %1359 = vtanh.f32 %v1714_v19 }
 0x744   :  { %v1358_v20 = vpop.eup %1357 }
 0x745   :  { %414 = vrot.lane.b32.xlu0 %v1358_v20, %s1446_s28 }
 0x746   :  { %v1360_v21 = vpop.eup %1359 }
 0x747   :  { %438 = vrot.lane.b32.xlu1 %v1360_v21, %s1446_s28  ;;  %v1261_v21 = vld [vmem:[%s1929_s1 + $0x6] sm:$0x3] }
 0x7b7   :  { %v415_v22 = vpop.permute.xlu0 %414 }
 0x7b8   :  { %v417_v23 = vmul.f32 %v1354_v55, %v415_v22 }
 0x7b9   :  { %v439_v24 = vpop.permute.xlu1 %438 }
 0x7ba   :  { %443 = vrot.lane.b32.xlu0 %v417_v23, %s1447_s29  ;;  %v441_v25 = vmul.f32 %v1356_v58, %v439_v24 }
 0x7bc   :  { %447 = vrot.lane.b32.xlu1 %v441_v25, %s1446_s28 }
 0x82c   :  { %v444_v27 = vpop.permute.xlu0 %443 }
 0x82e   :  { %v448_v28 = vpop.permute.xlu1 %447 }
 0x82f   :  { %v450_v29 = vsel %vm174_vm0, %v444_v27, %v448_v28 }
 0x830   :  { %v1724_v30 = vmax.f32 %v313_v26, %v450_v29  ;;  %1254 = vmatmul.mubr.msk.f32.vlgmr.msra.gmra.mxu1 %vm38_vm1, %v450_v29 }
 0x831   :  { %748 = vmatpush1.msra.mxu1 %v1487_v1  ;;  %795 = vmatprep.mubr.f32.mxu1 %v1445_v3 }
 0x832   :  { %749 = vmatprep.subr.mxu1 %v1492_v2 }
 0x833   :  { %750 = vmatpush1.msra.mxu1 %v1500_v4 }
 0x834   :  { %751 = vmatprep.subr.mxu1 %v1507_v5 }
 0x835   :  { %752 = vmatpush1.msra.mxu1 %v1514_v6 }
 0x836   :  { %753 = vmatprep.subr.mxu1 %v1521_v7 }
 0x837   :  { %754 = vmatpush1.msra.mxu1 %v1528_v8 }
 0x838   :  { %755 = vmatprep.subr.mxu1 %v1535_v9 }
 0x839   :  { %756 = vmatpush1.msra.mxu1 %v1542_v10 }
 0x83a   :  { %757 = vmatprep.subr.mxu1 %v1549_v11 }
 0x83b   :  { %758 = vmatpush1.msra.mxu1 %v1556_v12 }
 0x83c   :  { %759 = vmatprep.subr.mxu1 %v1563_v13 }
 0x83d   :  { %760 = vmatpush1.msra.mxu1 %v1570_v14 }
 0x83e   :  { %761 = vmatprep.subr.mxu1 %v1577_v15 }
 0x83f   :  { %762 = vmatpush1.msra.mxu1 %v1584_v16 }
 0x840   :  { %1023 = vmatprep.subr.mxu1 %v1482_v0 }
 0x8f0   :  { %v521_v31 = vpop.f32.mrf.mxu1 }
 0x8f1   :  { %v528_v33 = vadd.f32 %v1255_v51, %v521_v31 }
 0x8f2   :  { %v523_v34 = vpop.f32.mrf.mxu1 }
 0x8f3   :  { %1361 = vtanh.f32 %v528_v33  ;;  %v531_v35 = vadd.f32 %v1256_v32, %v523_v34  ;;  %v1257_v0 = vmul.f32 -1.442695, %v528_v33 }
 0x8f5   :  { %1363 = vtanh.f32 %v531_v35  ;;  %v1258_v38 = vmul.f32 -1.442695, %v531_v35 }
 0x8f6   :  { %1365 = vpow2.f32 %v1257_v0 }
 0x8f7   :  { %1367 = vpow2.f32 %v1258_v38 }
 0x900   :  { %v1362_v36 = vpop.eup %1361 }
 0x901   :  { %541 = vrot.lane.b32.xlu0 %v1362_v36, %s1446_s28 }
 0x902   :  { %v1364_v37 = vpop.eup %1363 }
 0x903   :  { %565 = vrot.lane.b32.xlu1 %v1364_v37, %s1446_s28  ;;  %v1366_v39 = vpop.eup %1365 }
 0x904   :  { %v1368_v40 = vpop.eup %1367  ;;  %v535_v41 = vadd.f32 1.0, %v1366_v39 }
 0x905   :  { %v559_v42 = vadd.f32 1.0, %v1368_v40 }
 0x906   :  { %1369 = vrcp.f32 %v535_v41 }
 0x907   :  { %1371 = vrcp.f32 %v559_v42 }
 0x913   :  { %v1370_v43 = vpop.eup %1369 }
 0x914   :  { %v1372_v46 = vpop.eup %1371  ;;  %v539_v49 = vmul.f32 %v1370_v43, %v1710_v63 }
 0x915   :  { %v563_v53 = vmul.f32 %v1372_v46, %v1714_v19  ;;  %v1260_v19 = vld [vmem:[%s1928_s0 + $0x8] sm:$0x3] }
 0x973   :  { %v542_v44 = vpop.permute.xlu0 %541 }
 0x974   :  { %v544_v45 = vmul.f32 %v1370_v43, %v542_v44 }
 0x975   :  { %v566_v47 = vpop.permute.xlu1 %565 }
 0x976   :  { %546 = vrot.lane.b32.xlu0 %v544_v45, %s1447_s29  ;;  %v568_v48 = vmul.f32 %v1372_v46, %v566_v47 }
 0x978   :  { %570 = vrot.lane.b32.xlu1 %v568_v48, %s1447_s29 }
 0x9e8   :  { %v547_v50 = vpop.permute.xlu0 %546 }
 0x9e9   :  { %v1755_v52 = vadd.f32 %v547_v50, %v539_v49 }
 0x9ea   :  { %v571_v54 = vpop.permute.xlu1 %570 }
 0x9eb   :  { %1373 = vtanh.f32 %v1755_v52  ;;  %v1759_v55 = vadd.f32 %v571_v54, %v563_v53 }
 0x9ed   :  { %1375 = vtanh.f32 %v1759_v55 }
 0x9f8   :  { %v1374_v56 = vpop.eup %1373 }
 0x9f9   :  { %552 = vrot.lane.b32.xlu0 %v1374_v56, %s1446_s28 }
 0x9fa   :  { %v1376_v57 = vpop.eup %1375 }
 0x9fb   :  { %576 = vrot.lane.b32.xlu1 %v1376_v57, %s1446_s28 }
 0xa6b   :  { %v553_v58 = vpop.permute.xlu0 %552 }
 0xa6c   :  { %v555_v59 = vmul.f32 %v1370_v43, %v553_v58 }
 0xa6d   :  { %v577_v60 = vpop.permute.xlu1 %576 }
 0xa6e   :  { %581 = vrot.lane.b32.xlu0 %v555_v59, %s1447_s29  ;;  %v579_v61 = vmul.f32 %v1372_v46, %v577_v60 }
 0xa70   :  { %585 = vrot.lane.b32.xlu1 %v579_v61, %s1446_s28 }
 0xae0   :  { %v582_v62 = vpop.permute.xlu0 %581 }
 0xae2   :  { %v586_v63 = vpop.permute.xlu1 %585 }
 0xae3   :  { %v1767_v17 = vsel %vm174_vm0, %v582_v62, %v586_v63 }
 0xae4   :  { %v589_v18 = vmax.f32 %v1724_v30, %v1767_v17  ;;  %1259 = vmatmul.mubr.msk.f32.vlgmr.msra.gmra.mxu0 %vm38_vm1, %v1767_v17 }
 0xae5   :  { %886 = vmatpush1.msra.mxu0 %v1487_v1  ;;  %933 = vmatprep.mubr.f32.mxu0 %v1445_v3 }
 0xae6   :  { %887 = vmatprep.subr.mxu0 %v1492_v2 }
 0xae7   :  { %888 = vmatpush1.msra.mxu0 %v1500_v4 }
 0xae8   :  { %889 = vmatprep.subr.mxu0 %v1507_v5 }
 0xae9   :  { %890 = vmatpush1.msra.mxu0 %v1514_v6 }
 0xaea   :  { %891 = vmatprep.subr.mxu0 %v1521_v7 }
 0xaeb   :  { %892 = vmatpush1.msra.mxu0 %v1528_v8 }
 0xaec   :  { %893 = vmatprep.subr.mxu0 %v1535_v9 }
 0xaed   :  { %894 = vmatpush1.msra.mxu0 %v1542_v10 }
 0xaee   :  { %895 = vmatprep.subr.mxu0 %v1549_v11 }
 0xaef   :  { %896 = vmatpush1.msra.mxu0 %v1556_v12 }
 0xaf0   :  { %897 = vmatprep.subr.mxu0 %v1563_v13 }
 0xaf1   :  { %898 = vmatpush1.msra.mxu0 %v1570_v14 }
 0xaf2   :  { %899 = vmatprep.subr.mxu0 %v1577_v15 }
 0xaf3   :  { %900 = vmatpush1.msra.mxu0 %v1584_v16 }
 0xaf4   :  { %1290 = vmatprep.subr.mxu0 %v1445_v3 }
 0xba4   :  { %v659_v20 = vpop.f32.mrf.mxu0 }
 0xba5   :  { %v666_v22 = vadd.f32 %v1260_v19, %v659_v20 }
 0xba6   :  { %v661_v23 = vpop.f32.mrf.mxu0 }
 0xba7   :  { %1377 = vtanh.f32 %v666_v22  ;;  %v669_v24 = vadd.f32 %v1261_v21, %v661_v23  ;;  %v1262_v27 = vmul.f32 -1.442695, %v666_v22 }
 0xba9   :  { %1379 = vtanh.f32 %v669_v24  ;;  %v1263_v28 = vmul.f32 -1.442695, %v669_v24 }
 0xbaa   :  { %1381 = vpow2.f32 %v1262_v27 }
 0xbab   :  { %1383 = vpow2.f32 %v1263_v28  ;;  %v1270_v28 = vld [vmem:[%s1928_s0 + $0xc] sm:$0x3] }
 0xbb4   :  { %v1378_v25 = vpop.eup %1377 }
 0xbb5   :  { %679 = vrot.lane.b32.xlu0 %v1378_v25, %s1446_s28 }
 0xbb6   :  { %v1380_v26 = vpop.eup %1379 }
 0xbb7   :  { %703 = vrot.lane.b32.xlu1 %v1380_v26, %s1446_s28  ;;  %v1382_v29 = vpop.eup %1381 }
 0xbb8   :  { %v1384_v51 = vpop.eup %1383  ;;  %v673_v31 = vadd.f32 1.0, %v1382_v29 }
 0xbb9   :  { %v697_v32 = vadd.f32 1.0, %v1384_v51  ;;  %v1271_v51 = vld [vmem:[%s1929_s1 + $0x2] sm:$0x3] }
 0xbba   :  { %1385 = vrcp.f32 %v673_v31 }
 0xbbb   :  { %1387 = vrcp.f32 %v697_v32 }
 0xbc7   :  { %v1386_v33 = vpop.eup %1385 }
 0xbc8   :  { %v1388_v36 = vpop.eup %1387  ;;  %v677_v38 = vmul.f32 %v1386_v33, %v1755_v52 }
 0xbc9   :  { %v701_v41 = vmul.f32 %v1388_v36, %v1759_v55 }
 0xc27   :  { %v680_v34 = vpop.permute.xlu0 %679 }
 0xc28   :  { %v682_v35 = vmul.f32 %v1386_v33, %v680_v34 }
 0xc29   :  { %v704_v37 = vpop.permute.xlu1 %703 }
 0xc2a   :  { %684 = vrot.lane.b32.xlu0 %v682_v35, %s1447_s29  ;;  %v706_v0 = vmul.f32 %v1388_v36, %v704_v37 }
 0xc2c   :  { %708 = vrot.lane.b32.xlu1 %v706_v0, %s1447_s29 }
 0xc9c   :  { %v685_v39 = vpop.permute.xlu0 %684 }
 0xc9d   :  { %v1801_v40 = vadd.f32 %v685_v39, %v677_v38 }
 0xc9e   :  { %v709_v42 = vpop.permute.xlu1 %708 }
 0xc9f   :  { %1389 = vtanh.f32 %v1801_v40  ;;  %v1805_v43 = vadd.f32 %v709_v42, %v701_v41 }
 0xca1   :  { %1391 = vtanh.f32 %v1805_v43 }
 0xcac   :  { %v1390_v44 = vpop.eup %1389 }
 0xcad   :  { %690 = vrot.lane.b32.xlu0 %v1390_v44, %s1446_s28 }
 0xcae   :  { %v1392_v45 = vpop.eup %1391 }
 0xcaf   :  { %714 = vrot.lane.b32.xlu1 %v1392_v45, %s1446_s28 }
 0xd1f   :  { %v691_v46 = vpop.permute.xlu0 %690 }
 0xd20   :  { %v693_v47 = vmul.f32 %v1386_v33, %v691_v46 }
 0xd21   :  { %v715_v48 = vpop.permute.xlu1 %714 }
 0xd22   :  { %719 = vrot.lane.b32.xlu0 %v693_v47, %s1447_s29  ;;  %v717_v49 = vmul.f32 %v1388_v36, %v715_v48 }
 0xd24   :  { %723 = vrot.lane.b32.xlu1 %v717_v49, %s1446_s28 }
 0xd94   :  { %v720_v50 = vpop.permute.xlu0 %719 }
 0xd96   :  { %v724_v52 = vpop.permute.xlu1 %723 }
 0xd97   :  { %v726_v53 = vsel %vm174_vm0, %v720_v50, %v724_v52 }
 0xd98   :  { %v1816_v54 = vmax.f32 %v589_v18, %v726_v53  ;;  %1264 = vmatmul.mubr.msk.f32.vlgmr.msra.gmra.mxu1 %vm38_vm1, %v726_v53 }
 0xd99   :  { %1024 = vmatpush1.msra.mxu1 %v1487_v1  ;;  %1071 = vmatprep.mubr.f32.mxu1 %v1445_v3  ;;  %v1265_v1 = vld [vmem:[%s1928_s0 + $0xa] sm:$0x3] }
 0xd9a   :  { %1025 = vmatprep.subr.mxu1 %v1492_v2 }
 0xd9b   :  { %1026 = vmatpush1.msra.mxu1 %v1500_v4  ;;  %v1266_v4 = vld [vmem:[%s1929_s1 + $0x4] sm:$0x3] }
 0xd9c   :  { %1027 = vmatprep.subr.mxu1 %v1507_v5 }
 0xd9d   :  { %1028 = vmatpush1.msra.mxu1 %v1514_v6 }
 0xd9e   :  { %1029 = vmatprep.subr.mxu1 %v1521_v7 }
 0xd9f   :  { %1030 = vmatpush1.msra.mxu1 %v1528_v8 }
 0xda0   :  { %1031 = vmatprep.subr.mxu1 %v1535_v9 }
 0xda1   :  { %1032 = vmatpush1.msra.mxu1 %v1542_v10 }
 0xda2   :  { %1033 = vmatprep.subr.mxu1 %v1549_v11 }
 0xda3   :  { %1034 = vmatpush1.msra.mxu1 %v1556_v12 }
 0xda4   :  { %1035 = vmatprep.subr.mxu1 %v1563_v13 }
 0xda5   :  { %1036 = vmatpush1.msra.mxu1 %v1570_v14 }
 0xda6   :  { %1037 = vmatprep.subr.mxu1 %v1577_v15 }
 0xda7   :  { %1038 = vmatpush1.msra.mxu1 %v1584_v16 }
 0xe58   :  { %v797_v2 = vpop.f32.mrf.mxu1 }
 0xe59   :  { %v804_v5 = vadd.f32 %v1265_v1, %v797_v2 }
 0xe5a   :  { %v799_v6 = vpop.f32.mrf.mxu1 }
 0xe5b   :  { %1393 = vtanh.f32 %v804_v5  ;;  %v807_v7 = vadd.f32 %v1266_v4, %v799_v6  ;;  %v1267_v10 = vmul.f32 -1.442695, %v804_v5 }
 0xe5d   :  { %1395 = vtanh.f32 %v807_v7  ;;  %v1268_v11 = vmul.f32 -1.442695, %v807_v7 }
 0xe5e   :  { %1397 = vpow2.f32 %v1267_v10 }
 0xe5f   :  { %1399 = vpow2.f32 %v1268_v11  ;;  %v1275_v11 = vld [vmem:[%s1928_s0 + $0xe] sm:$0x3] }
 0xe68   :  { %v1394_v8 = vpop.eup %1393 }
 0xe69   :  { %817 = vrot.lane.b32.xlu0 %v1394_v8, %s1446_s28 }
 0xe6a   :  { %v1396_v9 = vpop.eup %1395 }
 0xe6b   :  { %841 = vrot.lane.b32.xlu1 %v1396_v9, %s1446_s28  ;;  %v1398_v12 = vpop.eup %1397 }
 0xe6c   :  { %v1400_v13 = vpop.eup %1399  ;;  %v811_v14 = vadd.f32 1.0, %v1398_v12 }
 0xe6d   :  { %v835_v15 = vadd.f32 1.0, %v1400_v13  ;;  %v1081_v13 = vld [vmem:[%s1929_s1] sm:$0x3] }
 0xe6e   :  { %1401 = vrcp.f32 %v811_v14 }
 0xe6f   :  { %1403 = vrcp.f32 %v835_v15 }
 0xe7b   :  { %v1402_v16 = vpop.eup %1401 }
 0xe7c   :  { %v1404_v56 = vpop.eup %1403  ;;  %v815_v59 = vmul.f32 %v1402_v16, %v1801_v40 }
 0xe7d   :  { %v839_v62 = vmul.f32 %v1404_v56, %v1805_v43 }
 0xedb   :  { %v818_v30 = vpop.permute.xlu0 %817 }
 0xedc   :  { %v820_v55 = vmul.f32 %v1402_v16, %v818_v30 }
 0xedd   :  { %v842_v57 = vpop.permute.xlu1 %841 }
 0xede   :  { %822 = vrot.lane.b32.xlu0 %v820_v55, %s1447_s29  ;;  %v844_v58 = vmul.f32 %v1404_v56, %v842_v57 }
 0xee0   :  { %846 = vrot.lane.b32.xlu1 %v844_v58, %s1447_s29 }
 0xf50   :  { %v823_v60 = vpop.permute.xlu0 %822 }
 0xf51   :  { %v825_v61 = vadd.f32 %v823_v60, %v815_v59 }
 0xf52   :  { %v847_v63 = vpop.permute.xlu1 %846 }
 0xf53   :  { %1405 = vtanh.f32 %v825_v61  ;;  %v849_v17 = vadd.f32 %v847_v63, %v839_v62 }
 0xf55   :  { %1407 = vtanh.f32 %v849_v17 }
 0xf60   :  { %v1406_v18 = vpop.eup %1405 }
 0xf61   :  { %828 = vrot.lane.b32.xlu0 %v1406_v18, %s1446_s28 }
 0xf62   :  { %v1408_v19 = vpop.eup %1407 }
 0xf63   :  { %852 = vrot.lane.b32.xlu1 %v1408_v19, %s1446_s28 }
 0xfd3   :  { %v829_v20 = vpop.permute.xlu0 %828 }
 0xfd4   :  { %v831_v21 = vmul.f32 %v1402_v16, %v829_v20 }
 0xfd5   :  { %v853_v22 = vpop.permute.xlu1 %852 }
 0xfd6   :  { %857 = vrot.lane.b32.xlu0 %v831_v21, %s1447_s29  ;;  %v855_v23 = vmul.f32 %v1404_v56, %v853_v22 }
 0xfd8   :  { %861 = vrot.lane.b32.xlu1 %v855_v23, %s1446_s28 }
0x1048   :  { %v858_v24 = vpop.permute.xlu0 %857 }
0x104a   :  { %v862_v25 = vpop.permute.xlu1 %861 }
0x104b   :  { %v864_v26 = vsel %vm174_vm0, %v858_v24, %v862_v25 }
0x104c   :  { %v865_v27 = vmax.f32 %v1816_v54, %v864_v26  ;;  %1269 = vmatmul.mubr.msk.f32.vlgmr.msra.gmra.mxu0 %vm38_vm1, %v864_v26 }
0x104d   :  { %1306 = vmatprep.mubr.msk.f32.mxu0 %vm1448_vm2, %v1445_v3 }
0x110c   :  { %v935_v29 = vpop.f32.mrf.mxu0 }
0x110d   :  { %v942_v31 = vadd.f32 %v1270_v28, %v935_v29  ;;  %v1147_v28 = vld [vmem:[%s1930_s3 + $0x30] sm:$0xff]  ;;  %v1146_v29 = vld [vmem:[%s1930_s3 + $0x28] sm:$0xff] }
0x110e   :  { %v937_v32 = vpop.f32.mrf.mxu0 }
0x110f   :  { %1409 = vtanh.f32 %v942_v31  ;;  %v945_v33 = vadd.f32 %v1271_v51, %v937_v32  ;;  %v1272_v36 = vmul.f32 -1.442695, %v942_v31  ;;  %v1145_v51 = vld [vmem:[%s1930_s3 + $0x20] sm:$0xff]  ;;  %v1144_v32 = vld [vmem:[%s1930_s3 + $0x18] sm:$0xff] }
0x1111   :  { %1411 = vtanh.f32 %v945_v33  ;;  %v1273_v37 = vmul.f32 -1.442695, %v945_v33 }
0x1112   :  { %1413 = vpow2.f32 %v1272_v36  ;;  %v1141_v36 = vld [vmem:[%s1930_s3] sm:$0xff] }
0x1113   :  { %1415 = vpow2.f32 %v1273_v37  ;;  %v10_v37 = vstv %s1931_s4 }
0x1114   :  { %11 = vst [vmem:[#allocation2] sm:$0x1] %v10_v37 }
0x111c   :  { %v1410_v34 = vpop.eup %1409 }
0x111d   :  { %955 = vrot.lane.b32.xlu0 %v1410_v34, %s1446_s28  ;;  %v1143_v34 = vld [vmem:[%s1930_s3 + $0x10] sm:$0xff] }
0x111e   :  { %v1412_v35 = vpop.eup %1411 }
0x111f   :  { %979 = vrot.lane.b32.xlu1 %v1412_v35, %s1446_s28  ;;  %v1414_v0 = vpop.eup %1413  ;;  %v1142_v35 = vld [vmem:[%s1930_s3 + $0x8] sm:$0xff] }
0x1120   :  { %v1416_v38 = vpop.eup %1415  ;;  %v949_v39 = vadd.f32 1.0, %v1414_v0 }
0x1121   :  { %v973_v40 = vadd.f32 1.0, %v1416_v38 }
0x1122   :  { %1417 = vrcp.f32 %v949_v39 }
0x1123   :  { %1419 = vrcp.f32 %v973_v40 }
0x112f   :  { %v1418_v41 = vpop.eup %1417 }
0x1130   :  { %v1420_v44 = vpop.eup %1419  ;;  %v953_v47 = vmul.f32 %v1418_v41, %v825_v61 }
0x1131   :  { %v977_v50 = vmul.f32 %v1420_v44, %v849_v17 }
0x118f   :  { %v956_v42 = vpop.permute.xlu0 %955 }
0x1190   :  { %v958_v43 = vmul.f32 %v1418_v41, %v956_v42 }
0x1191   :  { %v980_v45 = vpop.permute.xlu1 %979 }
0x1192   :  { %960 = vrot.lane.b32.xlu0 %v958_v43, %s1447_s29  ;;  %v982_v46 = vmul.f32 %v1420_v44, %v980_v45 }
0x1194   :  { %984 = vrot.lane.b32.xlu1 %v982_v46, %s1447_s29 }
0x1204   :  { %v961_v48 = vpop.permute.xlu0 %960 }
0x1205   :  { %v963_v49 = vadd.f32 %v961_v48, %v953_v47 }
0x1206   :  { %v985_v52 = vpop.permute.xlu1 %984 }
0x1207   :  { %1421 = vtanh.f32 %v963_v49  ;;  %v987_v53 = vadd.f32 %v985_v52, %v977_v50 }
0x1209   :  { %1423 = vtanh.f32 %v987_v53 }
0x1214   :  { %v1422_v54 = vpop.eup %1421 }
0x1215   :  { %966 = vrot.lane.b32.xlu0 %v1422_v54, %s1446_s28 }
0x1216   :  { %v1424_v1 = vpop.eup %1423 }
0x1217   :  { %990 = vrot.lane.b32.xlu1 %v1424_v1, %s1446_s28 }
0x1287   :  { %v967_v2 = vpop.permute.xlu0 %966 }
0x1288   :  { %v969_v4 = vmul.f32 %v1418_v41, %v967_v2 }
0x1289   :  { %v991_v5 = vpop.permute.xlu1 %990 }
0x128a   :  { %995 = vrot.lane.b32.xlu0 %v969_v4, %s1447_s29  ;;  %v993_v6 = vmul.f32 %v1420_v44, %v991_v5 }
0x128c   :  { %999 = vrot.lane.b32.xlu1 %v993_v6, %s1446_s28 }
0x12fc   :  { %v996_v7 = vpop.permute.xlu0 %995 }
0x12fe   :  { %v1000_v8 = vpop.permute.xlu1 %999 }
0x12ff   :  { %v1002_v9 = vsel %vm174_vm0, %v996_v7, %v1000_v8 }
0x1300   :  { %v1869_v10 = vmax.f32 %v865_v27, %v1002_v9  ;;  %1274 = vmatmul.mubr.msk.f32.vlgmr.msra.gmra.mxu1 %vm38_vm1, %v1002_v9  ;;  %v1148_v27 = vld [vmem:[%s1930_s3 + $0x38] sm:$0xff] }
0x1301   :  { %1291 = vmatpush3.msra.mxu0 %v1148_v27 }
0x1302   :  { %1292 = vmatprep.subr.mxu0 %v1445_v3 }
0x1303   :  { %1293 = vmatpush3.msra.mxu0 %v1147_v28 }
0x1304   :  { %1294 = vmatprep.subr.mxu0 %v1445_v3 }
0x1305   :  { %1295 = vmatpush3.msra.mxu0 %v1146_v29 }
0x1306   :  { %1296 = vmatprep.subr.mxu0 %v1445_v3 }
0x1307   :  { %1297 = vmatpush3.msra.mxu0 %v1145_v51 }
0x1308   :  { %1298 = vmatprep.subr.mxu0 %v1445_v3 }
0x1309   :  { %1299 = vmatpush3.msra.mxu0 %v1144_v32 }
0x130a   :  { %1300 = vmatprep.subr.mxu0 %v1445_v3 }
0x130b   :  { %1301 = vmatpush3.msra.mxu0 %v1143_v34 }
0x130c   :  { %1302 = vmatprep.subr.mxu0 %v1445_v3 }
0x130d   :  { %1303 = vmatpush3.msra.mxu0 %v1142_v35 }
0x130e   :  { %1304 = vmatprep.subr.mxu0 %v1445_v3  ;;  %v1278_v3 = vld [vmem:[#allocation2] ss:$0 sm:$0xff] }
0x130f   :  { %1305 = vmatpush3.msra.mxu0 %v1141_v36 }
0x13c0   :  { %v1073_v12 = vpop.f32.mrf.mxu1 }
0x13c1   :  { %v1080_v14 = vadd.f32 %v1275_v11, %v1073_v12 }
0x13c2   :  { %v1075_v15 = vpop.f32.mrf.mxu1 }
0x13c3   :  { %1425 = vtanh.f32 %v1080_v14  ;;  %v1082_v16 = vadd.f32 %v1081_v13, %v1075_v15  ;;  %v1276_v56 = vmul.f32 -1.442695, %v1080_v14 }
0x13c5   :  { %1427 = vtanh.f32 %v1082_v16  ;;  %v1277_v57 = vmul.f32 -1.442695, %v1082_v16 }
0x13c6   :  { %1429 = vpow2.f32 %v1276_v56 }
0x13c7   :  { %1431 = vpow2.f32 %v1277_v57 }
0x13d0   :  { %v1426_v30 = vpop.eup %1425 }
0x13d1   :  { %1092 = vrot.lane.b32.xlu0 %v1426_v30, %s1446_s28 }
0x13d2   :  { %v1428_v55 = vpop.eup %1427 }
0x13d3   :  { %1116 = vrot.lane.b32.xlu1 %v1428_v55, %s1446_s28  ;;  %v1430_v58 = vpop.eup %1429 }
0x13d4   :  { %v1432_v59 = vpop.eup %1431  ;;  %v1086_v60 = vadd.f32 1.0, %v1430_v58 }
0x13d5   :  { %v1110_v61 = vadd.f32 1.0, %v1432_v59 }
0x13d6   :  { %1433 = vrcp.f32 %v1086_v60 }
0x13d7   :  { %1435 = vrcp.f32 %v1110_v61 }
0x13e3   :  { %v1434_v62 = vpop.eup %1433 }
0x13e4   :  { %v1436_v18 = vpop.eup %1435  ;;  %v1090_v21 = vmul.f32 %v1434_v62, %v963_v49 }
0x13e5   :  { %v1114_v24 = vmul.f32 %v1436_v18, %v987_v53 }
0x1443   :  { %v1093_v63 = vpop.permute.xlu0 %1092 }
0x1444   :  { %v1095_v17 = vmul.f32 %v1434_v62, %v1093_v63 }
0x1445   :  { %v1117_v19 = vpop.permute.xlu1 %1116 }
0x1446   :  { %1097 = vrot.lane.b32.xlu0 %v1095_v17, %s1447_s29  ;;  %v1119_v20 = vmul.f32 %v1436_v18, %v1117_v19 }
0x1448   :  { %1121 = vrot.lane.b32.xlu1 %v1119_v20, %s1447_s29 }
0x14b8   :  { %v1098_v22 = vpop.permute.xlu0 %1097 }
0x14b9   :  { %v1100_v23 = vadd.f32 %v1098_v22, %v1090_v21 }
0x14ba   :  { %v1122_v25 = vpop.permute.xlu1 %1121 }
0x14bb   :  { %1437 = vtanh.f32 %v1100_v23  ;;  %v1124_v26 = vadd.f32 %v1122_v25, %v1114_v24 }
0x14bd   :  { %1439 = vtanh.f32 %v1124_v26 }
0x14c8   :  { %v1438_v31 = vpop.eup %1437 }
0x14c9   :  { %1103 = vrot.lane.b32.xlu0 %v1438_v31, %s1446_s28 }
0x14ca   :  { %v1440_v33 = vpop.eup %1439 }
0x14cb   :  { %1127 = vrot.lane.b32.xlu1 %v1440_v33, %s1446_s28 }
0x153b   :  { %v1104_v0 = vpop.permute.xlu0 %1103 }
0x153c   :  { %v1106_v38 = vmul.f32 %v1434_v62, %v1104_v0 }
0x153d   :  { %v1128_v39 = vpop.permute.xlu1 %1127 }
0x153e   :  { %1132 = vrot.lane.b32.xlu0 %v1106_v38, %s1447_s29  ;;  %v1130_v40 = vmul.f32 %v1436_v18, %v1128_v39 }
0x1540   :  { %1136 = vrot.lane.b32.xlu1 %v1130_v40, %s1446_s28 }
0x15b0   :  { %v1133_v41 = vpop.permute.xlu0 %1132 }
0x15b2   :  { %v1137_v42 = vpop.permute.xlu1 %1136 }
0x15b3   :  { %v1139_v43 = vsel %vm174_vm0, %v1133_v41, %v1137_v42 }
0x15b4   :  { %v1140_v44 = vmax.f32 %v1869_v10, %v1139_v43 }
0x15b6   :  { %1307 = vmatmul.mubr.msk.f32.vlgmr.msra.gmra.mxu0 %vm38_vm1, %v1140_v44 }
0x1676   :  { %v1225_v45 = vpop.f32.mrf.mxu0 }
0x1677   :  { %v1226_v46 = vadd.f32 %v1278_v3, %v1225_v45 }
0x1678   :  { %v1308_v47 = vpop.f32.mrf.mxu0 }
0x1679   :  { %v1280_v48 = vmul.f32 -1.442695, %v1226_v46 }
0x167b   :  { %1441 = vpow2.f32 %v1280_v48 }
0x1688   :  { %v1442_v49 = vpop.eup %1441 }
0x1689   :  { %v1232_v50 = vadd.f32 1.0, %v1442_v49 }
0x168b   :  { %1443 = vrcp.f32 %v1232_v50 }
0x1698   :  { %v1444_v52 = vpop.eup %1443 }
0x1699   :  { %1236 = vst.msk [vmem:[%s1932_s5] sm:$0x3] %vm1235_vm3, %v1444_v52 }

// kernel: lstm_pooling_classifier_forward.2
= control target key start
LH: loop header
LB: loop body
LE: loop exit
PB: predicated region body
PF: predicated region fallthrough
CT: control target
= control target key end

     0   :  { %v1448_v3 = vmov 0.0   ;;  %s1449_s21 = smov 64   ;;  %s1450_s22 = smov 32   ;;  %vm162_vm0 = vcmask 254976   ;;  %vm169_vm1 = vcmask 517376   ;;  %vm171_vm2 = vcmask 261120   ;;  %s1950_s2 = inlined_call_operand.vmem [shape: f32[64,256], index: 2, kind: input, shape index: {}]   ;;  %s1951_s0 = inlined_call_operand.vmem [shape: f32[8,2,128], index: 0, kind: input, shape index: {}]   ;;  %s1952_s1 = inlined_call_operand.vmem [shape: f32[8,2,128], index: 1, kind: input, shape index: {}]   ;;  %s1953_s3 = inlined_call_operand.vmem [shape: f32[8,2,64], index: 3, kind: output, shape index: {}]  }
   0x1   :  { %v1474_v0 = vld [vmem:[%s1950_s2 + $0x78] sm:$0xff]  ;;  %v1479_v1 = vld [vmem:[%s1950_s2 + $0x70] sm:$0xff]  ;;  %v1484_v2 = vld [vmem:[%s1950_s2 + $0x68] sm:$0xff]  ;;  %98 = vmatprep.mubr.f32.mxu0 %v1448_v3  ;;  %256 = vmatprep.mubr.f32.mxu1 %v1448_v3  ;;  %vm30_vm3 = vcmask 523264  }
   0x2   :  { %50 = vmatprep.subr.mxu0 %v1474_v0  ;;  %v1492_v4 = vld [vmem:[%s1950_s2 + $0x60] sm:$0xff]  ;;  %208 = vmatprep.subr.mxu1 %v1474_v0  ;;  %v1499_v5 = vld [vmem:[%s1950_s2 + $0x58] sm:$0xff]  ;;  %v1506_v6 = vld [vmem:[%s1950_s2 + $0x50] sm:$0xff] }
   0x3   :  { %51 = vmatpush1.msra.mxu0 %v1479_v1  ;;  %209 = vmatpush1.msra.mxu1 %v1479_v1  ;;  %v1513_v7 = vld [vmem:[%s1950_s2 + $0x48] sm:$0xff]  ;;  %v1520_v8 = vld [vmem:[%s1950_s2 + $0x40] sm:$0xff]  ;;  %v1527_v9 = vld [vmem:[%s1950_s2 + $0x38] sm:$0xff] }
   0x4   :  { %52 = vmatprep.subr.mxu0 %v1484_v2  ;;  %210 = vmatprep.subr.mxu1 %v1484_v2  ;;  %v1534_v10 = vld [vmem:[%s1950_s2 + $0x30] sm:$0xff]  ;;  %v1541_v11 = vld [vmem:[%s1950_s2 + $0x28] sm:$0xff]  ;;  %v1548_v12 = vld [vmem:[%s1950_s2 + $0x20] sm:$0xff] }
   0x5   :  { %53 = vmatpush1.msra.mxu0 %v1492_v4  ;;  %211 = vmatpush1.msra.mxu1 %v1492_v4  ;;  %v1555_v13 = vld [vmem:[%s1950_s2 + $0x18] sm:$0xff]  ;;  %v1562_v14 = vld [vmem:[%s1950_s2 + $0x10] sm:$0xff]  ;;  %v1569_v15 = vld [vmem:[%s1950_s2 + $0x8] sm:$0xff] }
   0x6   :  { %54 = vmatprep.subr.mxu0 %v1499_v5  ;;  %212 = vmatprep.subr.mxu1 %v1499_v5  ;;  %v1576_v16 = vld [vmem:[%s1950_s2] sm:$0xff]  ;;  %v1266_v19 = vld [vmem:[%s1952_s1 + $0xe] sm:$0x3]  ;;  %v1272_v54 = vld [vmem:[%s1952_s1 + $0xc] sm:$0x3] }
   0x7   :  { %55 = vmatpush1.msra.mxu0 %v1506_v6  ;;  %213 = vmatpush1.msra.mxu1 %v1506_v6  ;;  %v105_v17 = vld [vmem:[%s1951_s0] sm:$0x3]  ;;  %v1271_v52 = vld [vmem:[%s1951_s0 + $0x2] sm:$0x3] }
   0x8   :  { %56 = vmatprep.subr.mxu0 %v1513_v7  ;;  %214 = vmatprep.subr.mxu1 %v1513_v7 }
   0x9   :  { %57 = vmatpush1.msra.mxu0 %v1520_v8  ;;  %215 = vmatpush1.msra.mxu1 %v1520_v8 }
   0xa   :  { %58 = vmatprep.subr.mxu0 %v1527_v9  ;;  %216 = vmatprep.subr.mxu1 %v1527_v9 }
   0xb   :  { %59 = vmatpush1.msra.mxu0 %v1534_v10  ;;  %217 = vmatpush1.msra.mxu1 %v1534_v10 }
   0xc   :  { %60 = vmatprep.subr.mxu0 %v1541_v11  ;;  %218 = vmatprep.subr.mxu1 %v1541_v11 }
   0xd   :  { %61 = vmatpush1.msra.mxu0 %v1548_v12  ;;  %219 = vmatpush1.msra.mxu1 %v1548_v12 }
   0xe   :  { %62 = vmatprep.subr.mxu0 %v1555_v13  ;;  %220 = vmatprep.subr.mxu1 %v1555_v13 }
   0xf   :  { %63 = vmatpush1.msra.mxu0 %v1562_v14  ;;  %221 = vmatpush1.msra.mxu1 %v1562_v14 }
  0x10   :  { %64 = vmatprep.subr.mxu0 %v1569_v15  ;;  %222 = vmatprep.subr.mxu1 %v1569_v15 }
  0x11   :  { %65 = vmatpush1.msra.mxu0 %v1576_v16  ;;  %223 = vmatpush1.msra.mxu1 %v1576_v16 }
  0x12   :  { %99 = vmatmul.mubr.f32.vlgmr.msra.gmra.mxu0 %v1448_v3  ;;  %365 = vmatprep.subr.mxu0 %v1474_v0 }
  0x13   :  { %366 = vmatpush1.msra.mxu0 %v1479_v1  ;;  %413 = vmatprep.mubr.f32.mxu0 %v1448_v3 }
  0x14   :  { %367 = vmatprep.subr.mxu0 %v1484_v2  ;;  %522 = vmatprep.subr.mxu1 %v1474_v0 }
  0x15   :  { %368 = vmatpush1.msra.mxu0 %v1492_v4 }
  0x16   :  { %369 = vmatprep.subr.mxu0 %v1499_v5 }
  0x17   :  { %370 = vmatpush1.msra.mxu0 %v1506_v6 }
  0x18   :  { %371 = vmatprep.subr.mxu0 %v1513_v7 }
  0x19   :  { %372 = vmatpush1.msra.mxu0 %v1520_v8 }
  0x1a   :  { %373 = vmatprep.subr.mxu0 %v1527_v9 }
  0x1b   :  { %374 = vmatpush1.msra.mxu0 %v1534_v10 }
  0x1c   :  { %375 = vmatprep.subr.mxu0 %v1541_v11 }
  0x1d   :  { %376 = vmatpush1.msra.mxu0 %v1548_v12 }
  0x1e   :  { %377 = vmatprep.subr.mxu0 %v1555_v13 }
  0x1f   :  { %378 = vmatpush1.msra.mxu0 %v1562_v14 }
  0x20   :  { %379 = vmatprep.subr.mxu0 %v1569_v15 }
  0x21   :  { %380 = vmatpush1.msra.mxu0 %v1576_v16 }
  0x22   :  { %679 = vmatprep.subr.mxu0 %v1474_v0 }
  0xd2   :  { %v100_v18 = vpop.f32.mrf.mxu0 }
  0xd3   :  { %v106_v20 = vadd.f32 %v105_v17, %v100_v18 }
  0xd4   :  { %v102_v21 = vpop.f32.mrf.mxu0 }
  0xd5   :  { %1320 = vtanh.f32 %v106_v20  ;;  %v109_v22 = vadd.f32 %v1266_v19, %v102_v21  ;;  %v1267_v25 = vmul.f32 -1.442695, %v106_v20 }
  0xd7   :  { %1322 = vtanh.f32 %v109_v22  ;;  %v1268_v26 = vmul.f32 -1.442695, %v109_v22 }
  0xd8   :  { %1324 = vpow2.f32 %v1267_v25 }
  0xd9   :  { %1326 = vpow2.f32 %v1268_v26 }
  0xe2   :  { %v1321_v23 = vpop.eup %1320 }
  0xe3   :  { %119 = vrot.lane.b32.xlu0 %v1321_v23, %s1449_s21 }
  0xe4   :  { %v1323_v24 = vpop.eup %1322 }
  0xe5   :  { %v1325_v27 = vpop.eup %1324 }
  0xe6   :  { %v113_v28 = vadd.f32 1.0, %v1325_v27  ;;  %v1327_v29 = vpop.eup %1326 }
  0xe7   :  { %143 = vrot.lane.b32.xlu0 %v1323_v24, %s1449_s21  ;;  %v137_v30 = vadd.f32 1.0, %v1327_v29 }
  0xe8   :  { %1328 = vrcp.f32 %v113_v28 }
  0xe9   :  { %1330 = vrcp.f32 %v137_v30 }
  0xf5   :  { %v1329_v31 = vpop.eup %1328 }
  0xf6   :  { %v1331_v34 = vpop.eup %1330  ;;  %v117_v37 = vmul.f32 0.0, %v1329_v31 }
  0xf7   :  { %v141_v40 = vmul.f32 0.0, %v1331_v34 }
 0x155   :  { %v120_v32 = vpop.permute.xlu0 %119 }
 0x156   :  { %v122_v33 = vmul.f32 %v1329_v31, %v120_v32 }
 0x158   :  { %124 = vrot.lane.b32.xlu1 %v122_v33, %s1450_s22 }
 0x159   :  { %v144_v35 = vpop.permute.xlu0 %143 }
 0x15a   :  { %v146_v36 = vmul.f32 %v1331_v34, %v144_v35 }
 0x15c   :  { %148 = vrot.lane.b32.xlu1 %v146_v36, %s1450_s22 }
 0x1ca   :  { %v125_v38 = vpop.permute.xlu1 %124 }
 0x1cb   :  { %v1615_v39 = vadd.f32 %v125_v38, %v117_v37 }
 0x1cd   :  { %1332 = vtanh.f32 %v1615_v39 }
 0x1ce   :  { %v149_v41 = vpop.permute.xlu1 %148 }
 0x1cf   :  { %v1618_v42 = vadd.f32 %v149_v41, %v141_v40  ;;  %v1278_v40 = vld [vmem:[%s1951_s0 + $0x4] sm:$0x3] }
 0x1d1   :  { %1334 = vtanh.f32 %v1618_v42 }
 0x1da   :  { %v1333_v43 = vpop.eup %1332 }
 0x1db   :  { %130 = vrot.lane.b32.xlu0 %v1333_v43, %s1449_s21 }
 0x1de   :  { %v1335_v44 = vpop.eup %1334 }
 0x1df   :  { %154 = vrot.lane.b32.xlu1 %v1335_v44, %s1449_s21 }
 0x24d   :  { %v131_v45 = vpop.permute.xlu0 %130 }
 0x24e   :  { %v133_v46 = vmul.f32 %v1329_v31, %v131_v45 }
 0x250   :  { %159 = vrot.lane.b32.xlu0 %v133_v46, %s1450_s22 }
 0x251   :  { %v155_v47 = vpop.permute.xlu1 %154 }
 0x252   :  { %v157_v48 = vmul.f32 %v1331_v34, %v155_v47 }
 0x254   :  { %165 = vrot.lane.b32.xlu1 %v157_v48, %s1449_s21 }
 0x2c2   :  { %v160_v49 = vpop.permute.xlu0 %159 }
 0x2c3   :  { %163 = vst.msk [vmem:[%s1953_s3] sm:$0x3] %vm162_vm0, %v160_v49 }
 0x2c6   :  { %v166_v50 = vpop.permute.xlu1 %165 }
 0x2c7   :  { %1269 = vst.msk [vmem:[%s1953_s3 + $0xe] sm:$0x3] %vm169_vm1, %v166_v50  ;;  %v172_v51 = vsel %vm171_vm2, %v160_v49, %v166_v50 }
 0x2c8   :  { %1270 = vmatmul.mubr.msk.f32.vlgmr.msra.gmra.mxu1 %vm30_vm3, %v172_v51 }
 0x2c9   :  { %523 = vmatpush1.msra.mxu1 %v1479_v1  ;;  %570 = vmatprep.mubr.f32.mxu1 %v1448_v3 }
 0x2ca   :  { %524 = vmatprep.subr.mxu1 %v1484_v2 }
 0x2cb   :  { %525 = vmatpush1.msra.mxu1 %v1492_v4 }
 0x2cc   :  { %526 = vmatprep.subr.mxu1 %v1499_v5 }
 0x2cd   :  { %527 = vmatpush1.msra.mxu1 %v1506_v6 }
 0x2ce   :  { %528 = vmatprep.subr.mxu1 %v1513_v7 }
 0x2cf   :  { %529 = vmatpush1.msra.mxu1 %v1520_v8 }
 0x2d0   :  { %530 = vmatprep.subr.mxu1 %v1527_v9 }
 0x2d1   :  { %531 = vmatpush1.msra.mxu1 %v1534_v10 }
 0x2d2   :  { %532 = vmatprep.subr.mxu1 %v1541_v11 }
 0x2d3   :  { %533 = vmatpush1.msra.mxu1 %v1548_v12 }
 0x2d4   :  { %534 = vmatprep.subr.mxu1 %v1555_v13 }
 0x2d5   :  { %535 = vmatpush1.msra.mxu1 %v1562_v14 }
 0x2d6   :  { %536 = vmatprep.subr.mxu1 %v1569_v15 }
 0x2d7   :  { %537 = vmatpush1.msra.mxu1 %v1576_v16 }
 0x2d8   :  { %834 = vmatprep.subr.mxu1 %v1474_v0 }
 0x388   :  { %v258_v53 = vpop.f32.mrf.mxu1 }
 0x389   :  { %v265_v55 = vadd.f32 %v1271_v52, %v258_v53 }
 0x38a   :  { %v260_v56 = vpop.f32.mrf.mxu1 }
 0x38b   :  { %1336 = vtanh.f32 %v265_v55  ;;  %v268_v57 = vadd.f32 %v1272_v54, %v260_v56  ;;  %v1273_v60 = vmul.f32 -1.442695, %v265_v55 }
 0x38d   :  { %1338 = vtanh.f32 %v268_v57  ;;  %v1274_v61 = vmul.f32 -1.442695, %v268_v57 }
 0x38e   :  { %1340 = vpow2.f32 %v1273_v60 }
 0x38f   :  { %1342 = vpow2.f32 %v1274_v61 }
 0x398   :  { %v1337_v58 = vpop.eup %1336 }
 0x399   :  { %278 = vrot.lane.b32.xlu0 %v1337_v58, %s1449_s21 }
 0x39a   :  { %v1339_v59 = vpop.eup %1338 }
 0x39b   :  { %302 = vrot.lane.b32.xlu1 %v1339_v59, %s1449_s21  ;;  %v1341_v62 = vpop.eup %1340 }
 0x39c   :  { %v1343_v63 = vpop.eup %1342  ;;  %v272_v17 = vadd.f32 1.0, %v1341_v62 }
 0x39d   :  { %v296_v18 = vadd.f32 1.0, %v1343_v63 }
 0x39e   :  { %1344 = vrcp.f32 %v272_v17 }
 0x39f   :  { %1346 = vrcp.f32 %v296_v18 }
 0x3ab   :  { %v1345_v19 = vpop.eup %1344 }
 0x3ac   :  { %v1347_v22 = vpop.eup %1346  ;;  %v276_v25 = vmul.f32 %v1345_v19, %v1615_v39 }
 0x3ad   :  { %v300_v28 = vmul.f32 %v1347_v22, %v1618_v42  ;;  %v1279_v42 = vld [vmem:[%s1952_s1 + $0xa] sm:$0x3] }
 0x40b   :  { %v279_v20 = vpop.permute.xlu0 %278 }
 0x40c   :  { %v281_v21 = vmul.f32 %v1345_v19, %v279_v20 }
 0x40d   :  { %v303_v23 = vpop.permute.xlu1 %302 }
 0x40e   :  { %283 = vrot.lane.b32.xlu0 %v281_v21, %s1450_s22  ;;  %v305_v24 = vmul.f32 %v1347_v22, %v303_v23 }
 0x410   :  { %307 = vrot.lane.b32.xlu1 %v305_v24, %s1450_s22 }
 0x480   :  { %v284_v26 = vpop.permute.xlu0 %283 }
 0x481   :  { %v1663_v27 = vadd.f32 %v284_v26, %v276_v25 }
 0x482   :  { %v308_v29 = vpop.permute.xlu1 %307 }
 0x483   :  { %1348 = vtanh.f32 %v1663_v27  ;;  %v1667_v30 = vadd.f32 %v308_v29, %v300_v28  ;;  %v1286_v29 = vld [vmem:[%s1952_s1 + $0x8] sm:$0x3] }
 0x485   :  { %1350 = vtanh.f32 %v1667_v30 }
 0x490   :  { %v1349_v31 = vpop.eup %1348 }
 0x491   :  { %289 = vrot.lane.b32.xlu0 %v1349_v31, %s1449_s21 }
 0x492   :  { %v1351_v32 = vpop.eup %1350 }
 0x493   :  { %313 = vrot.lane.b32.xlu1 %v1351_v32, %s1449_s21 }
 0x503   :  { %v290_v33 = vpop.permute.xlu0 %289 }
 0x504   :  { %v292_v34 = vmul.f32 %v1345_v19, %v290_v33 }
 0x505   :  { %v314_v35 = vpop.permute.xlu1 %313 }
 0x506   :  { %318 = vrot.lane.b32.xlu0 %v292_v34, %s1450_s22  ;;  %v316_v36 = vmul.f32 %v1347_v22, %v314_v35 }
 0x508   :  { %324 = vrot.lane.b32.xlu1 %v316_v36, %s1449_s21 }
 0x578   :  { %v319_v37 = vpop.permute.xlu0 %318 }
 0x579   :  { %1275 = vst.msk [vmem:[%s1953_s3 + $0x2] sm:$0x3] %vm162_vm0, %v319_v37 }
 0x57a   :  { %v325_v38 = vpop.permute.xlu1 %324 }
 0x57b   :  { %1276 = vst.msk [vmem:[%s1953_s3 + $0xc] sm:$0x3] %vm169_vm1, %v325_v38  ;;  %v329_v39 = vsel %vm171_vm2, %v319_v37, %v325_v38 }
 0x57c   :  { %1277 = vmatmul.mubr.msk.f32.vlgmr.msra.gmra.mxu0 %vm30_vm3, %v329_v39 }
 0x57d   :  { %680 = vmatpush1.msra.mxu0 %v1479_v1  ;;  %727 = vmatprep.mubr.f32.mxu0 %v1448_v3 }
 0x57e   :  { %681 = vmatprep.subr.mxu0 %v1484_v2 }
 0x57f   :  { %682 = vmatpush1.msra.mxu0 %v1492_v4 }
 0x580   :  { %683 = vmatprep.subr.mxu0 %v1499_v5 }
 0x581   :  { %684 = vmatpush1.msra.mxu0 %v1506_v6 }
 0x582   :  { %685 = vmatprep.subr.mxu0 %v1513_v7 }
 0x583   :  { %686 = vmatpush1.msra.mxu0 %v1520_v8 }
 0x584   :  { %687 = vmatprep.subr.mxu0 %v1527_v9 }
 0x585   :  { %688 = vmatpush1.msra.mxu0 %v1534_v10 }
 0x586   :  { %689 = vmatprep.subr.mxu0 %v1541_v11 }
 0x587   :  { %690 = vmatpush1.msra.mxu0 %v1548_v12 }
 0x588   :  { %691 = vmatprep.subr.mxu0 %v1555_v13 }
 0x589   :  { %692 = vmatpush1.msra.mxu0 %v1562_v14 }
 0x58a   :  { %693 = vmatprep.subr.mxu0 %v1569_v15 }
 0x58b   :  { %694 = vmatpush1.msra.mxu0 %v1576_v16 }
 0x58c   :  { %989 = vmatprep.subr.mxu0 %v1474_v0 }
 0x63c   :  { %v415_v41 = vpop.f32.mrf.mxu0 }
 0x63d   :  { %v422_v43 = vadd.f32 %v1278_v40, %v415_v41 }
 0x63e   :  { %v417_v44 = vpop.f32.mrf.mxu0 }
 0x63f   :  { %1352 = vtanh.f32 %v422_v43  ;;  %v425_v45 = vadd.f32 %v1279_v42, %v417_v44  ;;  %v1280_v0 = vmul.f32 -1.442695, %v422_v43 }
 0x641   :  { %1354 = vtanh.f32 %v425_v45  ;;  %v1281_v48 = vmul.f32 -1.442695, %v425_v45 }
 0x642   :  { %1356 = vpow2.f32 %v1280_v0 }
 0x643   :  { %1358 = vpow2.f32 %v1281_v48 }
 0x64c   :  { %v1353_v46 = vpop.eup %1352 }
 0x64d   :  { %435 = vrot.lane.b32.xlu0 %v1353_v46, %s1449_s21 }
 0x64e   :  { %v1355_v47 = vpop.eup %1354 }
 0x64f   :  { %459 = vrot.lane.b32.xlu1 %v1355_v47, %s1449_s21  ;;  %v1357_v49 = vpop.eup %1356 }
 0x650   :  { %v1359_v50 = vpop.eup %1358  ;;  %v429_v51 = vadd.f32 1.0, %v1357_v49 }
 0x651   :  { %v453_v52 = vadd.f32 1.0, %v1359_v50 }
 0x652   :  { %1360 = vrcp.f32 %v429_v51 }
 0x653   :  { %1362 = vrcp.f32 %v453_v52 }
 0x65f   :  { %v1361_v53 = vpop.eup %1360 }
 0x660   :  { %v1363_v56 = vpop.eup %1362  ;;  %v433_v59 = vmul.f32 %v1361_v53, %v1663_v27  ;;  %v1285_v27 = vld [vmem:[%s1951_s0 + $0x6] sm:$0x3] }
 0x661   :  { %v457_v62 = vmul.f32 %v1363_v56, %v1667_v30 }
 0x6bf   :  { %v436_v54 = vpop.permute.xlu0 %435 }
 0x6c0   :  { %v438_v55 = vmul.f32 %v1361_v53, %v436_v54 }
 0x6c1   :  { %v460_v57 = vpop.permute.xlu1 %459 }
 0x6c2   :  { %440 = vrot.lane.b32.xlu0 %v438_v55, %s1450_s22  ;;  %v462_v58 = vmul.f32 %v1363_v56, %v460_v57 }
 0x6c4   :  { %464 = vrot.lane.b32.xlu1 %v462_v58, %s1450_s22 }
 0x734   :  { %v441_v60 = vpop.permute.xlu0 %440 }
 0x735   :  { %v1712_v61 = vadd.f32 %v441_v60, %v433_v59 }
 0x736   :  { %v465_v63 = vpop.permute.xlu1 %464 }
 0x737   :  { %1364 = vtanh.f32 %v1712_v61  ;;  %v1716_v17 = vadd.f32 %v465_v63, %v457_v62 }
 0x739   :  { %1366 = vtanh.f32 %v1716_v17 }
 0x744   :  { %v1365_v18 = vpop.eup %1364 }
 0x745   :  { %446 = vrot.lane.b32.xlu0 %v1365_v18, %s1449_s21 }
 0x746   :  { %v1367_v19 = vpop.eup %1366 }
 0x747   :  { %470 = vrot.lane.b32.xlu1 %v1367_v19, %s1449_s21 }
 0x7b7   :  { %v447_v20 = vpop.permute.xlu0 %446 }
 0x7b8   :  { %v449_v21 = vmul.f32 %v1361_v53, %v447_v20 }
 0x7b9   :  { %v471_v22 = vpop.permute.xlu1 %470 }
 0x7ba   :  { %475 = vrot.lane.b32.xlu0 %v449_v21, %s1450_s22  ;;  %v473_v23 = vmul.f32 %v1363_v56, %v471_v22 }
 0x7bc   :  { %481 = vrot.lane.b32.xlu1 %v473_v23, %s1449_s21 }
 0x82c   :  { %v476_v24 = vpop.permute.xlu0 %475 }
 0x82d   :  { %1282 = vst.msk [vmem:[%s1953_s3 + $0x4] sm:$0x3] %vm162_vm0, %v476_v24 }
 0x82e   :  { %v482_v25 = vpop.permute.xlu1 %481 }
 0x82f   :  { %1283 = vst.msk [vmem:[%s1953_s3 + $0xa] sm:$0x3] %vm169_vm1, %v482_v25  ;;  %v486_v26 = vsel %vm171_vm2, %v476_v24, %v482_v25 }
 0x830   :  { %1284 = vmatmul.mubr.msk.f32.vlgmr.msra.gmra.mxu1 %vm30_vm3, %v486_v26 }
 0x831   :  { %835 = vmatpush1.msra.mxu1 %v1479_v1  ;;  %882 = vmatprep.mubr.f32.mxu1 %v1448_v3 }
 0x832   :  { %836 = vmatprep.subr.mxu1 %v1484_v2 }
 0x833   :  { %837 = vmatpush1.msra.mxu1 %v1492_v4 }
 0x834   :  { %838 = vmatprep.subr.mxu1 %v1499_v5 }
 0x835   :  { %839 = vmatpush1.msra.mxu1 %v1506_v6 }
 0x836   :  { %840 = vmatprep.subr.mxu1 %v1513_v7 }
 0x837   :  { %841 = vmatpush1.msra.mxu1 %v1520_v8 }
 0x838   :  { %842 = vmatprep.subr.mxu1 %v1527_v9 }
 0x839   :  { %843 = vmatpush1.msra.mxu1 %v1534_v10 }
 0x83a   :  { %844 = vmatprep.subr.mxu1 %v1541_v11 }
 0x83b   :  { %845 = vmatpush1.msra.mxu1 %v1548_v12 }
 0x83c   :  { %846 = vmatprep.subr.mxu1 %v1555_v13 }
 0x83d   :  { %847 = vmatpush1.msra.mxu1 %v1562_v14 }
 0x83e   :  { %848 = vmatprep.subr.mxu1 %v1569_v15 }
 0x83f   :  { %849 = vmatpush1.msra.mxu1 %v1576_v16 }
 0x8f0   :  { %v572_v28 = vpop.f32.mrf.mxu1 }
 0x8f1   :  { %v579_v30 = vadd.f32 %v1285_v27, %v572_v28 }
 0x8f2   :  { %v574_v31 = vpop.f32.mrf.mxu1 }
 0x8f3   :  { %1368 = vtanh.f32 %v579_v30  ;;  %v582_v32 = vadd.f32 %v1286_v29, %v574_v31  ;;  %v1287_v35 = vmul.f32 -1.442695, %v579_v30 }
 0x8f5   :  { %1370 = vtanh.f32 %v582_v32  ;;  %v1288_v36 = vmul.f32 -1.442695, %v582_v32 }
 0x8f6   :  { %1372 = vpow2.f32 %v1287_v35 }
 0x8f7   :  { %1374 = vpow2.f32 %v1288_v36  ;;  %v1300_v36 = vld [vmem:[%s1952_s1 + $0x4] sm:$0x3] }
 0x900   :  { %v1369_v33 = vpop.eup %1368 }
 0x901   :  { %592 = vrot.lane.b32.xlu0 %v1369_v33, %s1449_s21 }
 0x902   :  { %v1371_v34 = vpop.eup %1370 }
 0x903   :  { %616 = vrot.lane.b32.xlu1 %v1371_v34, %s1449_s21  ;;  %v1373_v37 = vpop.eup %1372  ;;  %v1299_v34 = vld [vmem:[%s1951_s0 + $0xa] sm:$0x3] }
 0x904   :  { %v1375_v38 = vpop.eup %1374  ;;  %v586_v39 = vadd.f32 1.0, %v1373_v37 }
 0x905   :  { %v610_v40 = vadd.f32 1.0, %v1375_v38 }
 0x906   :  { %1376 = vrcp.f32 %v586_v39 }
 0x907   :  { %1378 = vrcp.f32 %v610_v40 }
 0x913   :  { %v1377_v41 = vpop.eup %1376 }
 0x914   :  { %v1379_v44 = vpop.eup %1378  ;;  %v590_v47 = vmul.f32 %v1377_v41, %v1712_v61 }
 0x915   :  { %v614_v49 = vmul.f32 %v1379_v44, %v1716_v17 }
 0x973   :  { %v593_v42 = vpop.permute.xlu0 %592 }
 0x974   :  { %v595_v43 = vmul.f32 %v1377_v41, %v593_v42 }
 0x975   :  { %v617_v45 = vpop.permute.xlu1 %616 }
 0x976   :  { %597 = vrot.lane.b32.xlu0 %v595_v43, %s1450_s22  ;;  %v619_v46 = vmul.f32 %v1379_v44, %v617_v45 }
 0x978   :  { %621 = vrot.lane.b32.xlu1 %v619_v46, %s1450_s22 }
 0x9e8   :  { %v598_v0 = vpop.permute.xlu0 %597 }
 0x9e9   :  { %v1760_v48 = vadd.f32 %v598_v0, %v590_v47 }
 0x9ea   :  { %v622_v50 = vpop.permute.xlu1 %621 }
 0x9eb   :  { %1380 = vtanh.f32 %v1760_v48  ;;  %v1764_v51 = vadd.f32 %v622_v50, %v614_v49 }
 0x9ed   :  { %1382 = vtanh.f32 %v1764_v51 }
 0x9f8   :  { %v1381_v52 = vpop.eup %1380 }
 0x9f9   :  { %603 = vrot.lane.b32.xlu0 %v1381_v52, %s1449_s21 }
 0x9fa   :  { %v1383_v53 = vpop.eup %1382 }
 0x9fb   :  { %627 = vrot.lane.b32.xlu1 %v1383_v53, %s1449_s21 }
 0xa6b   :  { %v604_v54 = vpop.permute.xlu0 %603 }
 0xa6c   :  { %v606_v55 = vmul.f32 %v1377_v41, %v604_v54 }
 0xa6d   :  { %v628_v56 = vpop.permute.xlu1 %627 }
 0xa6e   :  { %632 = vrot.lane.b32.xlu0 %v606_v55, %s1450_s22  ;;  %v630_v57 = vmul.f32 %v1379_v44, %v628_v56 }
 0xa70   :  { %638 = vrot.lane.b32.xlu1 %v630_v57, %s1449_s21 }
 0xae0   :  { %v633_v58 = vpop.permute.xlu0 %632 }
 0xae1   :  { %1289 = vst.msk [vmem:[%s1953_s3 + $0x6] sm:$0x3] %vm162_vm0, %v633_v58 }
 0xae2   :  { %v639_v59 = vpop.permute.xlu1 %638 }
 0xae3   :  { %1290 = vst.msk [vmem:[%s1953_s3 + $0x8] sm:$0x3] %vm169_vm1, %v639_v59  ;;  %v643_v60 = vsel %vm171_vm2, %v633_v58, %v639_v59 }
 0xae4   :  { %1291 = vmatmul.mubr.msk.f32.vlgmr.msra.gmra.mxu0 %vm30_vm3, %v643_v60 }
 0xae5   :  { %990 = vmatpush1.msra.mxu0 %v1479_v1  ;;  %1037 = vmatprep.mubr.f32.mxu0 %v1448_v3  ;;  %v1292_v1 = vld [vmem:[%s1951_s0 + $0x8] sm:$0x3] }
 0xae6   :  { %991 = vmatprep.subr.mxu0 %v1484_v2 }
 0xae7   :  { %992 = vmatpush1.msra.mxu0 %v1492_v4  ;;  %v1293_v4 = vld [vmem:[%s1952_s1 + $0x6] sm:$0x3] }
 0xae8   :  { %993 = vmatprep.subr.mxu0 %v1499_v5 }
 0xae9   :  { %994 = vmatpush1.msra.mxu0 %v1506_v6 }
 0xaea   :  { %995 = vmatprep.subr.mxu0 %v1513_v7 }
 0xaeb   :  { %996 = vmatpush1.msra.mxu0 %v1520_v8 }
 0xaec   :  { %997 = vmatprep.subr.mxu0 %v1527_v9 }
 0xaed   :  { %998 = vmatpush1.msra.mxu0 %v1534_v10 }
 0xaee   :  { %999 = vmatprep.subr.mxu0 %v1541_v11 }
 0xaef   :  { %1000 = vmatpush1.msra.mxu0 %v1548_v12 }
 0xaf0   :  { %1001 = vmatprep.subr.mxu0 %v1555_v13 }
 0xaf1   :  { %1002 = vmatpush1.msra.mxu0 %v1562_v14 }
 0xaf2   :  { %1003 = vmatprep.subr.mxu0 %v1569_v15 }
 0xaf3   :  { %1004 = vmatpush1.msra.mxu0 %v1576_v16 }
 0xba4   :  { %v729_v2 = vpop.f32.mrf.mxu0 }
 0xba5   :  { %v736_v5 = vadd.f32 %v1292_v1, %v729_v2 }
 0xba6   :  { %v731_v6 = vpop.f32.mrf.mxu0 }
 0xba7   :  { %1384 = vtanh.f32 %v736_v5  ;;  %v739_v7 = vadd.f32 %v1293_v4, %v731_v6  ;;  %v1294_v10 = vmul.f32 -1.442695, %v736_v5 }
 0xba9   :  { %1386 = vtanh.f32 %v739_v7  ;;  %v1295_v11 = vmul.f32 -1.442695, %v739_v7 }
 0xbaa   :  { %1388 = vpow2.f32 %v1294_v10  ;;  %v1307_v10 = vld [vmem:[%s1952_s1 + $0x2] sm:$0x3] }
 0xbab   :  { %1390 = vpow2.f32 %v1295_v11 }
 0xbb4   :  { %v1385_v8 = vpop.eup %1384 }
 0xbb5   :  { %749 = vrot.lane.b32.xlu0 %v1385_v8, %s1449_s21  ;;  %v1306_v8 = vld [vmem:[%s1951_s0 + $0xc] sm:$0x3] }
 0xbb6   :  { %v1387_v9 = vpop.eup %1386 }
 0xbb7   :  { %773 = vrot.lane.b32.xlu1 %v1387_v9, %s1449_s21  ;;  %v1389_v12 = vpop.eup %1388 }
 0xbb8   :  { %v1391_v13 = vpop.eup %1390  ;;  %v743_v14 = vadd.f32 1.0, %v1389_v12 }
 0xbb9   :  { %v767_v15 = vadd.f32 1.0, %v1391_v13 }
 0xbba   :  { %1392 = vrcp.f32 %v743_v14 }
 0xbbb   :  { %1394 = vrcp.f32 %v767_v15 }
 0xbc7   :  { %v1393_v16 = vpop.eup %1392 }
 0xbc8   :  { %v1395_v63 = vpop.eup %1394  ;;  %v747_v19 = vmul.f32 %v1393_v16, %v1760_v48 }
 0xbc9   :  { %v771_v22 = vmul.f32 %v1395_v63, %v1764_v51 }
 0xc27   :  { %v750_v61 = vpop.permute.xlu0 %749 }
 0xc28   :  { %v752_v62 = vmul.f32 %v1393_v16, %v750_v61 }
 0xc29   :  { %v774_v17 = vpop.permute.xlu1 %773 }
 0xc2a   :  { %754 = vrot.lane.b32.xlu0 %v752_v62, %s1450_s22  ;;  %v776_v18 = vmul.f32 %v1395_v63, %v774_v17 }
 0xc2c   :  { %778 = vrot.lane.b32.xlu1 %v776_v18, %s1450_s22 }
 0xc9c   :  { %v755_v20 = vpop.permute.xlu0 %754 }
 0xc9d   :  { %v757_v21 = vadd.f32 %v755_v20, %v747_v19 }
 0xc9e   :  { %v779_v23 = vpop.permute.xlu1 %778 }
 0xc9f   :  { %1396 = vtanh.f32 %v757_v21  ;;  %v781_v24 = vadd.f32 %v779_v23, %v771_v22 }
 0xca1   :  { %1398 = vtanh.f32 %v781_v24 }
 0xcac   :  { %v1397_v25 = vpop.eup %1396 }
 0xcad   :  { %760 = vrot.lane.b32.xlu0 %v1397_v25, %s1449_s21 }
 0xcae   :  { %v1399_v26 = vpop.eup %1398 }
 0xcaf   :  { %784 = vrot.lane.b32.xlu1 %v1399_v26, %s1449_s21 }
 0xd1f   :  { %v761_v27 = vpop.permute.xlu0 %760 }
 0xd20   :  { %v763_v28 = vmul.f32 %v1393_v16, %v761_v27 }
 0xd21   :  { %v785_v29 = vpop.permute.xlu1 %784 }
 0xd22   :  { %789 = vrot.lane.b32.xlu0 %v763_v28, %s1450_s22  ;;  %v787_v30 = vmul.f32 %v1395_v63, %v785_v29 }
 0xd24   :  { %794 = vrot.lane.b32.xlu1 %v787_v30, %s1449_s21 }
 0xd94   :  { %v790_v31 = vpop.permute.xlu0 %789 }
 0xd95   :  { %1296 = vst.msk [vmem:[%s1953_s3 + $0x8] sm:$0x3] %vm162_vm0, %v790_v31 }
 0xd96   :  { %v795_v32 = vpop.permute.xlu1 %794 }
 0xd97   :  { %1297 = vst.msk [vmem:[%s1953_s3 + $0x6] sm:$0x3] %vm169_vm1, %v795_v32  ;;  %v798_v33 = vsel %vm171_vm2, %v790_v31, %v795_v32  ;;  %v1124_v31 = vld [vmem:[%s1950_s2 + $0x78] sm:$0xff]  ;;  %v1123_v32 = vld [vmem:[%s1950_s2 + $0x70] sm:$0xff] }
 0xd98   :  { %1298 = vmatmul.mubr.msk.f32.vlgmr.msra.gmra.mxu1 %vm30_vm3, %v798_v33  ;;  %v1122_v33 = vld [vmem:[%s1950_s2 + $0x68] sm:$0xff]  ;;  %1144 = vmatprep.subr.mxu1 %v1124_v31 }
 0xd99   :  { %1192 = vmatprep.mubr.f32.mxu1 %v1448_v3  ;;  %1145 = vmatpush1.msra.mxu1 %v1123_v32 }
 0xd9a   :  { %1146 = vmatprep.subr.mxu1 %v1122_v33 }
 0xe58   :  { %v884_v35 = vpop.f32.mrf.mxu1 }
 0xe59   :  { %v891_v37 = vadd.f32 %v1299_v34, %v884_v35  ;;  %v1121_v34 = vld [vmem:[%s1950_s2 + $0x60] sm:$0xff]  ;;  %v1120_v35 = vld [vmem:[%s1950_s2 + $0x58] sm:$0xff] }
 0xe5a   :  { %v886_v38 = vpop.f32.mrf.mxu1  ;;  %1147 = vmatpush1.msra.mxu1 %v1121_v34 }
 0xe5b   :  { %1400 = vtanh.f32 %v891_v37  ;;  %v894_v39 = vadd.f32 %v1300_v36, %v886_v38  ;;  %v1301_v3 = vmul.f32 -1.442695, %v891_v37  ;;  %v1119_v36 = vld [vmem:[%s1950_s2 + $0x50] sm:$0xff]  ;;  %v1118_v37 = vld [vmem:[%s1950_s2 + $0x48] sm:$0xff]  ;;  %1148 = vmatprep.subr.mxu1 %v1120_v35  ;;  %v1117_v38 = vld [vmem:[%s1950_s2 + $0x40] sm:$0xff] }
 0xe5c   :  { %1149 = vmatpush1.msra.mxu1 %v1119_v36 }
 0xe5d   :  { %1402 = vtanh.f32 %v894_v39  ;;  %v1302_v42 = vmul.f32 -1.442695, %v894_v39  ;;  %v1116_v39 = vld [vmem:[%s1950_s2 + $0x38] sm:$0xff]  ;;  %1150 = vmatprep.subr.mxu1 %v1118_v37 }
 0xe5e   :  { %1404 = vpow2.f32 %v1301_v3  ;;  %1151 = vmatpush1.msra.mxu1 %v1117_v38  ;;  %v1114_v3 = vld [vmem:[%s1950_s2 + $0x28] sm:$0xff] }
 0xe5f   :  { %1406 = vpow2.f32 %v1302_v42  ;;  %1152 = vmatprep.subr.mxu1 %v1116_v39  ;;  %v1113_v42 = vld [vmem:[%s1950_s2 + $0x20] sm:$0xff] }
 0xe68   :  { %v1401_v40 = vpop.eup %1400 }
 0xe69   :  { %904 = vrot.lane.b32.xlu0 %v1401_v40, %s1449_s21 }
 0xe6a   :  { %v1403_v41 = vpop.eup %1402 }
 0xe6b   :  { %928 = vrot.lane.b32.xlu1 %v1403_v41, %s1449_s21  ;;  %v1405_v43 = vpop.eup %1404  ;;  %v1115_v41 = vld [vmem:[%s1950_s2 + $0x30] sm:$0xff] }
 0xe6c   :  { %v1407_v44 = vpop.eup %1406  ;;  %v898_v45 = vadd.f32 1.0, %v1405_v43  ;;  %1153 = vmatpush1.msra.mxu1 %v1115_v41 }
 0xe6d   :  { %v922_v46 = vadd.f32 1.0, %v1407_v44  ;;  %v1112_v44 = vld [vmem:[%s1950_s2 + $0x18] sm:$0xff]  ;;  %1154 = vmatprep.subr.mxu1 %v1114_v3 }
 0xe6e   :  { %1408 = vrcp.f32 %v898_v45  ;;  %1155 = vmatpush1.msra.mxu1 %v1113_v42  ;;  %v1111_v45 = vld [vmem:[%s1950_s2 + $0x10] sm:$0xff] }
 0xe6f   :  { %1410 = vrcp.f32 %v922_v46  ;;  %1156 = vmatprep.subr.mxu1 %v1112_v44  ;;  %v1110_v46 = vld [vmem:[%s1950_s2 + $0x8] sm:$0xff] }
 0xe70   :  { %1157 = vmatpush1.msra.mxu1 %v1111_v45 }
 0xe71   :  { %1158 = vmatprep.subr.mxu1 %v1110_v46 }
 0xe7b   :  { %v1409_v47 = vpop.eup %1408 }
 0xe7c   :  { %v1411_v49 = vpop.eup %1410  ;;  %v902_v52 = vmul.f32 %v1409_v47, %v757_v21 }
 0xe7d   :  { %v926_v55 = vmul.f32 %v1411_v49, %v781_v24 }
 0xedb   :  { %v905_v0 = vpop.permute.xlu0 %904 }
 0xedc   :  { %v907_v48 = vmul.f32 %v1409_v47, %v905_v0 }
 0xedd   :  { %v929_v50 = vpop.permute.xlu1 %928 }
 0xede   :  { %909 = vrot.lane.b32.xlu0 %v907_v48, %s1450_s22  ;;  %v931_v51 = vmul.f32 %v1411_v49, %v929_v50 }
 0xee0   :  { %933 = vrot.lane.b32.xlu1 %v931_v51, %s1450_s22 }
 0xf50   :  { %v910_v53 = vpop.permute.xlu0 %909 }
 0xf51   :  { %v912_v54 = vadd.f32 %v910_v53, %v902_v52 }
 0xf52   :  { %v934_v56 = vpop.permute.xlu1 %933 }
 0xf53   :  { %1412 = vtanh.f32 %v912_v54  ;;  %v936_v57 = vadd.f32 %v934_v56, %v926_v55  ;;  %v1202_v56 = vld [vmem:[%s1952_s1] sm:$0x3] }
 0xf55   :  { %1414 = vtanh.f32 %v936_v57 }
 0xf60   :  { %v1413_v58 = vpop.eup %1412 }
 0xf61   :  { %915 = vrot.lane.b32.xlu0 %v1413_v58, %s1449_s21 }
 0xf62   :  { %v1415_v59 = vpop.eup %1414 }
 0xf63   :  { %939 = vrot.lane.b32.xlu1 %v1415_v59, %s1449_s21 }
 0xfd3   :  { %v916_v60 = vpop.permute.xlu0 %915 }
 0xfd4   :  { %v918_v1 = vmul.f32 %v1409_v47, %v916_v60  ;;  %v1109_v47 = vld [vmem:[%s1950_s2] sm:$0xff] }
 0xfd5   :  { %v940_v2 = vpop.permute.xlu1 %939  ;;  %1159 = vmatpush1.msra.mxu1 %v1109_v47 }
 0xfd6   :  { %944 = vrot.lane.b32.xlu0 %v918_v1, %s1450_s22  ;;  %v942_v4 = vmul.f32 %v1411_v49, %v940_v2 }
 0xfd8   :  { %949 = vrot.lane.b32.xlu1 %v942_v4, %s1449_s21 }
0x1048   :  { %v945_v5 = vpop.permute.xlu0 %944 }
0x1049   :  { %1303 = vst.msk [vmem:[%s1953_s3 + $0xa] sm:$0x3] %vm162_vm0, %v945_v5 }
0x104a   :  { %v950_v6 = vpop.permute.xlu1 %949 }
0x104b   :  { %1304 = vst.msk [vmem:[%s1953_s3 + $0x4] sm:$0x3] %vm169_vm1, %v950_v6  ;;  %v953_v7 = vsel %vm171_vm2, %v945_v5, %v950_v6 }
0x104c   :  { %1305 = vmatmul.mubr.msk.f32.vlgmr.msra.gmra.mxu0 %vm30_vm3, %v953_v7 }
0x110c   :  { %v1039_v9 = vpop.f32.mrf.mxu0 }
0x110d   :  { %v1046_v11 = vadd.f32 %v1306_v8, %v1039_v9 }
0x110e   :  { %v1041_v12 = vpop.f32.mrf.mxu0 }
0x110f   :  { %1416 = vtanh.f32 %v1046_v11  ;;  %v1049_v13 = vadd.f32 %v1307_v10, %v1041_v12  ;;  %v1308_v16 = vmul.f32 -1.442695, %v1046_v11 }
0x1111   :  { %1418 = vtanh.f32 %v1049_v13  ;;  %v1309_v61 = vmul.f32 -1.442695, %v1049_v13 }
0x1112   :  { %1420 = vpow2.f32 %v1308_v16 }
0x1113   :  { %1422 = vpow2.f32 %v1309_v61 }
0x111c   :  { %v1417_v14 = vpop.eup %1416 }
0x111d   :  { %1059 = vrot.lane.b32.xlu0 %v1417_v14, %s1449_s21 }
0x111e   :  { %v1419_v15 = vpop.eup %1418 }
0x111f   :  { %1083 = vrot.lane.b32.xlu1 %v1419_v15, %s1449_s21  ;;  %v1421_v62 = vpop.eup %1420 }
0x1120   :  { %v1423_v63 = vpop.eup %1422  ;;  %v1053_v17 = vadd.f32 1.0, %v1421_v62 }
0x1121   :  { %v1077_v18 = vadd.f32 1.0, %v1423_v63 }
0x1122   :  { %1424 = vrcp.f32 %v1053_v17 }
0x1123   :  { %1426 = vrcp.f32 %v1077_v18 }
0x112f   :  { %v1425_v19 = vpop.eup %1424 }
0x1130   :  { %v1427_v22 = vpop.eup %1426  ;;  %v1057_v25 = vmul.f32 %v1425_v19, %v912_v54  ;;  %v1313_v54 = vld [vmem:[%s1951_s0 + $0xe] sm:$0x3] }
0x1131   :  { %v1081_v28 = vmul.f32 %v1427_v22, %v936_v57 }
0x118f   :  { %v1060_v20 = vpop.permute.xlu0 %1059 }
0x1190   :  { %v1062_v21 = vmul.f32 %v1425_v19, %v1060_v20 }
0x1191   :  { %v1084_v23 = vpop.permute.xlu1 %1083 }
0x1192   :  { %1064 = vrot.lane.b32.xlu0 %v1062_v21, %s1450_s22  ;;  %v1086_v24 = vmul.f32 %v1427_v22, %v1084_v23 }
0x1194   :  { %1088 = vrot.lane.b32.xlu1 %v1086_v24, %s1450_s22 }
0x1204   :  { %v1065_v26 = vpop.permute.xlu0 %1064 }
0x1205   :  { %v1858_v27 = vadd.f32 %v1065_v26, %v1057_v25 }
0x1206   :  { %v1089_v29 = vpop.permute.xlu1 %1088 }
0x1207   :  { %1428 = vtanh.f32 %v1858_v27  ;;  %v1861_v30 = vadd.f32 %v1089_v29, %v1081_v28 }
0x1209   :  { %1430 = vtanh.f32 %v1861_v30 }
0x1214   :  { %v1429_v40 = vpop.eup %1428 }
0x1215   :  { %1070 = vrot.lane.b32.xlu0 %v1429_v40, %s1449_s21 }
0x1216   :  { %v1431_v43 = vpop.eup %1430 }
0x1217   :  { %1094 = vrot.lane.b32.xlu1 %v1431_v43, %s1449_s21 }
0x1287   :  { %v1071_v0 = vpop.permute.xlu0 %1070 }
0x1288   :  { %v1073_v48 = vmul.f32 %v1425_v19, %v1071_v0 }
0x1289   :  { %v1095_v49 = vpop.permute.xlu1 %1094 }
0x128a   :  { %1099 = vrot.lane.b32.xlu0 %v1073_v48, %s1450_s22  ;;  %v1097_v50 = vmul.f32 %v1427_v22, %v1095_v49 }
0x128c   :  { %1104 = vrot.lane.b32.xlu1 %v1097_v50, %s1449_s21 }
0x12fc   :  { %v1100_v51 = vpop.permute.xlu0 %1099 }
0x12fd   :  { %1310 = vst.msk [vmem:[%s1953_s3 + $0xc] sm:$0x3] %vm162_vm0, %v1100_v51 }
0x12fe   :  { %v1105_v52 = vpop.permute.xlu1 %1104 }
0x12ff   :  { %1311 = vst.msk [vmem:[%s1953_s3 + $0x2] sm:$0x3] %vm169_vm1, %v1105_v52  ;;  %v1108_v53 = vsel %vm171_vm2, %v1100_v51, %v1105_v52 }
0x1300   :  { %1312 = vmatmul.mubr.msk.f32.vlgmr.msra.gmra.mxu1 %vm30_vm3, %v1108_v53 }
0x13c0   :  { %v1194_v55 = vpop.f32.mrf.mxu1 }
0x13c1   :  { %v1201_v57 = vadd.f32 %v1313_v54, %v1194_v55 }
0x13c2   :  { %v1196_v58 = vpop.f32.mrf.mxu1 }
0x13c3   :  { %1432 = vtanh.f32 %v1201_v57  ;;  %v1203_v59 = vadd.f32 %v1202_v56, %v1196_v58  ;;  %v1314_v2 = vmul.f32 -1.442695, %v1201_v57 }
0x13c5   :  { %1434 = vtanh.f32 %v1203_v59  ;;  %v1315_v4 = vmul.f32 -1.442695, %v1203_v59 }
0x13c6   :  { %1436 = vpow2.f32 %v1314_v2 }
0x13c7   :  { %1438 = vpow2.f32 %v1315_v4 }
0x13d0   :  { %v1433_v60 = vpop.eup %1432 }
0x13d1   :  { %1213 = vrot.lane.b32.xlu0 %v1433_v60, %s1449_s21 }
0x13d2   :  { %v1435_v1 = vpop.eup %1434 }
0x13d3   :  { %1237 = vrot.lane.b32.xlu1 %v1435_v1, %s1449_s21  ;;  %v1437_v5 = vpop.eup %1436 }
0x13d4   :  { %v1439_v6 = vpop.eup %1438  ;;  %v1207_v7 = vadd.f32 1.0, %v1437_v5 }
0x13d5   :  { %v1231_v8 = vadd.f32 1.0, %v1439_v6 }
0x13d6   :  { %1440 = vrcp.f32 %v1207_v7 }
0x13d7   :  { %1442 = vrcp.f32 %v1231_v8 }
0x13e3   :  { %v1441_v9 = vpop.eup %1440 }
0x13e4   :  { %v1443_v12 = vpop.eup %1442  ;;  %v1211_v15 = vmul.f32 %v1441_v9, %v1858_v27 }
0x13e5   :  { %v1235_v62 = vmul.f32 %v1443_v12, %v1861_v30 }
0x1443   :  { %v1214_v10 = vpop.permute.xlu0 %1213 }
0x1444   :  { %v1216_v11 = vmul.f32 %v1441_v9, %v1214_v10 }
0x1445   :  { %v1238_v13 = vpop.permute.xlu1 %1237 }
0x1446   :  { %1218 = vrot.lane.b32.xlu0 %v1216_v11, %s1450_s22  ;;  %v1240_v14 = vmul.f32 %v1443_v12, %v1238_v13 }
0x1448   :  { %1242 = vrot.lane.b32.xlu1 %v1240_v14, %s1450_s22 }
0x14b8   :  { %v1219_v16 = vpop.permute.xlu0 %1218 }
0x14b9   :  { %v1221_v61 = vadd.f32 %v1219_v16, %v1211_v15 }
0x14ba   :  { %v1243_v63 = vpop.permute.xlu1 %1242 }
0x14bb   :  { %1444 = vtanh.f32 %v1221_v61  ;;  %v1245_v17 = vadd.f32 %v1243_v63, %v1235_v62 }
0x14bd   :  { %1446 = vtanh.f32 %v1245_v17 }
0x14c8   :  { %v1445_v18 = vpop.eup %1444 }
0x14c9   :  { %1224 = vrot.lane.b32.xlu0 %v1445_v18, %s1449_s21 }
0x14ca   :  { %v1447_v19 = vpop.eup %1446 }
0x14cb   :  { %1248 = vrot.lane.b32.xlu1 %v1447_v19, %s1449_s21 }
0x153b   :  { %v1225_v20 = vpop.permute.xlu0 %1224 }
0x153c   :  { %v1227_v21 = vmul.f32 %v1441_v9, %v1225_v20 }
0x153d   :  { %v1249_v22 = vpop.permute.xlu1 %1248 }
0x153e   :  { %1253 = vrot.lane.b32.xlu0 %v1227_v21, %s1450_s22  ;;  %v1251_v23 = vmul.f32 %v1443_v12, %v1249_v22 }
0x1540   :  { %1258 = vrot.lane.b32.xlu1 %v1251_v23, %s1449_s21 }
0x15b0   :  { %v1254_v24 = vpop.permute.xlu0 %1253 }
0x15b1   :  { %1316 = vst.msk [vmem:[%s1953_s3 + $0xe] sm:$0x3] %vm162_vm0, %v1254_v24 }
0x15b2   :  { %v1259_v25 = vpop.permute.xlu1 %1258 }
0x15b3   :  { %1261 = vst.msk [vmem:[%s1953_s3] sm:$0x3] %vm169_vm1, %v1259_v25 }

</bundles_post_ra>
